<compile_context>
chip_gen: v5e
topology: v5e:2x2
jax: 0.10.0
libtpu: 0.0.40
codegen_flags: <defaults>
</compile_context>

<pallas_src>
import jax
import jax.numpy as jnp
import numpy as np
from jax.experimental import pallas as pl
from jax.experimental.pallas import tpu as pltpu

# ----- problem sizes (small, consistent with the module) -----
B = 2
C_IN = 16
C_OUT = 32          # in != out so change_n_channels is a real 1x1 conv
H = 16
W = 16
HW = H * W
REDUCTION = 16
C_HID = C_OUT // REDUCTION   # = 2  (SE hidden width)

# Non-center taps for dilation 1 and dilation 2 (center tap handled separately).
TAPS_D1 = [(dh, dw) for dh in (-1, 0, 1) for dw in (-1, 0, 1) if (dh, dw) != (0, 0)]
TAPS_D2 = [(2 * dh, 2 * dw) for (dh, dw) in TAPS_D1]
ALL_TAPS = TAPS_D1 + TAPS_D2                       # 16 shifts total
D1_SHIFTS = [dh * W + dw for (dh, dw) in TAPS_D1]
D2_SHIFTS = [dh * W + dw for (dh, dw) in TAPS_D2]
ALL_SHIFTS = D1_SHIFTS + D2_SHIFTS

N1 = 17 * C_IN          # 272 rows of stacked input for fused conv1 / residual
N2 = 18 * C_OUT         # 576 rows of stacked input for fused conv2 (main+dil)
R1 = 3 * C_OUT          # 96 output rows: [conv1_main ; conv1_dil ; residual]
R2 = 2 * C_OUT          # 64 output rows: [conv2_main ; conv2_dil]


def _shift_read(x, s):
    """y[..., f] = x[..., (f + s) % HW]  (wrapped lanes are zeroed by the
    validity mask afterwards; pltpu.roll follows jnp.roll semantics)."""
    return pltpu.roll(x, (-s) % HW, axis=1)


# --------------------------------------------------------------------------
# Kernel
# --------------------------------------------------------------------------
def _block_kernel(x_ref, m_ref, sm_ref, w1_ref, w2_ref, bias_ref,
                  se1t_ref, se2_ref, out_ref, s1_ref, s2_ref):
    x = x_ref[0]                       # (C_IN, HW)  f32
    m = m_ref[0]                       # (1, HW)     f32
    sm = sm_ref[...]                   # (16, HW)    f32 border-validity masks
    bias = bias_ref[...]               # (R1+R2, 1)  f32
    b1 = bias[0:R1]
    b2 = bias[R1:R1 + R2]

    # ---- stage 1: stacked shifted x -> one matmul for conv1_main+conv1_dil+1x1
    s1_ref[0:C_IN, :] = x.astype(jnp.bfloat16)                # shared center tap
    for i, s in enumerate(ALL_SHIFTS):                        # 16 shifted taps
        shifted = _shift_read(x, s) * sm[i:i + 1, :]
        s1_ref[(i + 1) * C_IN:(i + 2) * C_IN, :] = shifted.astype(jnp.bfloat16)

    y1 = jnp.dot(w1_ref[...], s1_ref[...],
                 preferred_element_type=jnp.float32) + b1     # (96, HW) f32
    a_m = jnp.maximum(y1[0:C_OUT] * m, 0.0)                   # conv1_main -> ReLU
    a_d = jnp.maximum(y1[C_OUT:2 * C_OUT] * m, 0.0)           # conv1_dil  -> ReLU
    xr = y1[2 * C_OUT:3 * C_OUT]                              # 1x1 residual

    # ---- stage 2: stacked shifted activations -> one matmul for both conv2s
    s2_ref[0:C_OUT, :] = a_m.astype(jnp.bfloat16)             # main center tap
    for i, s in enumerate(D1_SHIFTS):
        shifted = _shift_read(a_m, s) * sm[i:i + 1, :]
        s2_ref[(i + 1) * C_OUT:(i + 2) * C_OUT, :] = shifted.astype(jnp.bfloat16)
    off = 9 * C_OUT
    s2_ref[off:off + C_OUT, :] = a_d.astype(jnp.bfloat16)     # dilated center tap
    for i, s in enumerate(D2_SHIFTS):
        shifted = _shift_read(a_d, s) * sm[8 + i:9 + i, :]
        s2_ref[off + (i + 1) * C_OUT:off + (i + 2) * C_OUT, :] = \
            shifted.astype(jnp.bfloat16)

    y2 = jnp.dot(w2_ref[...], s2_ref[...],
                 preferred_element_type=jnp.float32) + b2     # (64, HW) f32
    xboth = y2 * m                                            # [conv2_main; conv2_dil]

    # ---- squeeze-excitation (both paths, block-diagonal SE weights)
    #   y_se  = sum_spatial(xboth) / sum_spatial(mask)          (64, 1)
    #   h     = relu(se1 @ y_se)  via sublane-reduce            (1, 4)
    #   gate  = sigmoid(se2 @ h)  via lane-reduce               (64, 1)
    msum = jnp.sum(m, axis=1, keepdims=True)                  # (1, 1)
    ysum = jnp.sum(xboth, axis=1, keepdims=True)              # (64, 1)
    y_se = ysum * pl.reciprocal(msum, approx=True)
    h = jnp.maximum(jnp.sum(se1t_ref[...] * y_se, axis=0, keepdims=True), 0.0)
    gate = jax.nn.sigmoid(jnp.sum(se2_ref[...] * h, axis=1, keepdims=True))
    gated = xboth * gate

    out = jnp.maximum(gated[0:C_OUT] + gated[C_OUT:2 * C_OUT] + xr, 0.0) * m
    out_ref[0] = out.astype(out_ref.dtype)


# --------------------------------------------------------------------------
# Wrapper-side slab builders (plain JAX/NumPy, run once outside the kernel)
# --------------------------------------------------------------------------
def _build_shift_masks():
    """(16, HW) f32: row t = 1 where the shifted read for tap t is in-bounds."""
    f = np.arange(HW)
    h, w = f // W, f % W
    rows = []
    for (dh, dw) in ALL_TAPS:
        hh, ww = h + dh, w + dw
        rows.append(((hh >= 0) & (hh < H) & (ww >= 0) & (ww < W)).astype(np.float32))
    return jnp.asarray(np.stack(rows))


def _build_w1_slab(p):
    """(R1, N1) = (96, 272): rows [conv1_main ; conv1_dil ; 1x1 residual]."""
    z = jnp.zeros((C_OUT, C_IN), jnp.float32)

    def col(main, dil, res):
        return jnp.concatenate([main, dil, res], axis=0)      # (96, C_IN)

    cols = [col(p['w1m'][:, :, 1, 1], p['w1d'][:, :, 1, 1], p['wc'])]   # center
    for (dh, dw) in TAPS_D1:
        cols.append(col(p['w1m'][:, :, dh + 1, dw + 1], z, z))
    for (dh, dw) in TAPS_D2:
        cols.append(col(z, p['w1d'][:, :, dh // 2 + 1, dw // 2 + 1], z))
    return jnp.concatenate(cols, axis=1).astype(jnp.bfloat16)


def _build_w2_slab(p):
    """(R2, N2) = (64, 576): block-diagonal [conv2_main | conv2_dil] taps."""
    z = jnp.zeros((C_OUT, C_OUT), jnp.float32)

    def col_m(tap):
        return jnp.concatenate([tap, z], axis=0)               # (64, C_OUT)

    def col_d(tap):
        return jnp.concatenate([z, tap], axis=0)

    cols = [col_m(p['w2m'][:, :, 1, 1])]
    for (dh, dw) in TAPS_D1:
        cols.append(col_m(p['w2m'][:, :, dh + 1, dw + 1]))
    cols.append(col_d(p['w2d'][:, :, 1, 1]))
    for (dh, dw) in TAPS_D2:
        cols.append(col_d(p['w2d'][:, :, dh // 2 + 1, dw // 2 + 1]))
    return jnp.concatenate(cols, axis=1).astype(jnp.bfloat16)


def _build_bias_slab(p):
    """(R1 + R2, 1) f32: [b1m ; b1d ; bc ; b2m ; b2d]."""
    return jnp.concatenate([p['b1m'], p['b1d'], p['bc'],
                            p['b2m'], p['b2d']]).reshape(R1 + R2, 1)


def _build_se_slabs(p):
    """Block-diagonal SE weights, both (2*C_OUT, 2*C_HID) = (64, 4):
       se1_t = blockdiag(se1m, se1d)^T ;  se2 = blockdiag(se2m, se2d)."""
    z = jnp.zeros((C_OUT, C_HID), jnp.float32)
    se1_t = jnp.concatenate(
        [jnp.concatenate([p['se1m'].T, z], axis=1),
         jnp.concatenate([z, p['se1d'].T], axis=1)], axis=0)
    se2 = jnp.concatenate(
        [jnp.concatenate([p['se2m'], z], axis=1),
         jnp.concatenate([z, p['se2d']], axis=1)], axis=0)
    return se1_t, se2


def parallel_dilation_residual_block(x_nchw, mask_nchw, p):
    xf = x_nchw.reshape(B, C_IN, HW)                  # f32 (rolls done in f32)
    mf = mask_nchw.reshape(B, 1, HW)
    smask = _build_shift_masks()
    w1 = _build_w1_slab(p)
    w2 = _build_w2_slab(p)
    bias = _build_bias_slab(p)
    se1_t, se2 = _build_se_slabs(p)

    def inv2(shape):     # grid-invariant 2-D slab (whole array, DMA'd once)
        return pl.BlockSpec(shape, lambda b: (0, 0))

    in_specs = [
        pl.BlockSpec((1, C_IN, HW), lambda b: (b, 0, 0)),     # x (f32)
        pl.BlockSpec((1, 1, HW), lambda b: (b, 0, 0)),        # mask (f32)
        inv2((16, HW)),                                       # shift-validity masks
        inv2((R1, N1)),                                       # fused conv1/residual W
        inv2((R2, N2)),                                       # fused conv2 W (blk-diag)
        inv2((R1 + R2, 1)),                                   # all biases
        inv2((2 * C_OUT, 2 * C_HID)),                         # SE fc1^T (blk-diag)
        inv2((2 * C_OUT, 2 * C_HID)),                         # SE fc2   (blk-diag)
    ]

    out = pl.pallas_call(
        _block_kernel,
        out_shape=jax.ShapeDtypeStruct((B, C_OUT, HW), jnp.float32),
        grid_spec=pltpu.PrefetchScalarGridSpec(
            num_scalar_prefetch=0,
            grid=(B,),
            in_specs=in_specs,
            out_specs=pl.BlockSpec((1, C_OUT, HW), lambda b: (b, 0, 0)),
            scratch_shapes=[pltpu.VMEM((N1, HW), jnp.bfloat16),
                            pltpu.VMEM((N2, HW), jnp.bfloat16)]),
        compiler_params=pltpu.CompilerParams(
            dimension_semantics=("parallel",)),   # one image per TC on v7x
    )(xf, mf, smask, w1, w2, bias, se1_t, se2)
    return out.reshape(B, C_OUT, H, W), mask_nchw   # module returns (output, mask)


# --------------------------------------------------------------------------
# Pure-JAX reference (semantics of the PyTorch module, normalize=False)
# --------------------------------------------------------------------------
def reference(x, mask, p):
    hp = jax.lax.Precision.HIGHEST

    def conv(inp, w, b, d):
        out = jax.lax.conv_general_dilated(
            inp, w, window_strides=(1, 1),
            padding=[(d, d), (d, d)], rhs_dilation=(d, d),
            dimension_numbers=('NCHW', 'OIHW', 'NCHW'), precision=hp)
        return out + b[None, :, None, None]

    def se(inp, msk, w1, w2):
        y = inp.sum((-2, -1)) / msk.sum((-2, -1))
        h = jnp.maximum(jnp.dot(y, w1.T, precision=hp), 0.0)
        s = jax.nn.sigmoid(jnp.dot(h, w2.T, precision=hp))
        return inp * s[:, :, None, None]

    xm = conv(x, p['w1m'], p['b1m'], 1) * mask
    xm = jnp.maximum(xm, 0.0)
    xm = conv(xm, p['w2m'], p['b2m'], 1) * mask
    xm = se(xm, mask, p['se1m'], p['se2m'])

    xd = conv(x, p['w1d'], p['b1d'], 2) * mask
    xd = jnp.maximum(xd, 0.0)
    xd = conv(xd, p['w2d'], p['b2d'], 2) * mask
    xd = se(xd, mask, p['se1d'], p['se2d'])

    xr = jnp.einsum('oi,bihw->bohw', p['wc'], x,
                    precision=hp) + p['bc'][None, :, None, None]
    return jnp.maximum(xm + xd + xr, 0.0) * mask


# --------------------------------------------------------------------------
def make_params(key):
    ks = jax.random.split(key, 14)
    n = lambda k, shape: (jax.random.normal(k, shape, jnp.float32) * 0.1)
    return {
        'w1m': n(ks[0], (C_OUT, C_IN, 3, 3)),  'b1m': n(ks[1], (C_OUT,)),
        'w2m': n(ks[2], (C_OUT, C_OUT, 3, 3)), 'b2m': n(ks[3], (C_OUT,)),
        'se1m': n(ks[4], (C_HID, C_OUT)),      'se2m': n(ks[5], (C_OUT, C_HID)),
        'w1d': n(ks[6], (C_OUT, C_IN, 3, 3)),  'b1d': n(ks[7], (C_OUT,)),
        'w2d': n(ks[8], (C_OUT, C_OUT, 3, 3)), 'b2d': n(ks[9], (C_OUT,)),
        'se1d': n(ks[10], (C_HID, C_OUT)),     'se2d': n(ks[11], (C_OUT, C_HID)),
        'wc': n(ks[12], (C_OUT, C_IN)),        'bc': n(ks[13], (C_OUT,)),
    }


if __name__ == "__main__":
    key = jax.random.PRNGKey(0)
    kx, km, kp = jax.random.split(key, 3)

    x = jax.random.normal(kx, (B, C_IN, H, W), jnp.float32)
    mask = (jax.random.uniform(km, (B, 1, H, W)) > 0.2).astype(jnp.float32)
    params = make_params(kp)

    out, out_mask = parallel_dilation_residual_block(x, mask, params)
    jax.block_until_ready(out)

    ref = reference(x, mask, params)
    # bf16 MXU (two chained convs) -> ~1e-2 level noise; 5e-2 still catches any
    # real indexing/sign bug (those produce O(1) errors).
    np.testing.assert_allclose(np.asarray(out), np.asarray(ref),
                               rtol=5e-2, atol=5e-2)
    np.testing.assert_array_equal(np.asarray(out_mask), np.asarray(mask))
    print("KERNEL_OK")
</pallas_src>

<mosaic_0001>
module attributes {stable_mosaic.version = 11 : i64} {
  func.func @_block_kernel(%arg0: i32, %arg1: memref<1x16x256xf32, #tpu.memory_space<vmem>>, %arg2: memref<1x1x256xf32, #tpu.memory_space<vmem>>, %arg3: memref<16x256xf32, #tpu.memory_space<vmem>>, %arg4: memref<96x272xbf16, #tpu.memory_space<vmem>>, %arg5: memref<64x576xbf16, #tpu.memory_space<vmem>>, %arg6: memref<160x1xf32, #tpu.memory_space<vmem>>, %arg7: memref<64x4xf32, #tpu.memory_space<vmem>>, %arg8: memref<64x4xf32, #tpu.memory_space<vmem>>, %arg9: memref<1x32x256xf32, #tpu.memory_space<vmem>>, %arg10: memref<272x256xbf16, #tpu.memory_space<vmem>>, %arg11: memref<576x256xbf16, #tpu.memory_space<vmem>>) attributes {dimension_semantics = [#tpu.dimension_semantics<parallel>], iteration_bounds = array<i64: 2>, scalar_prefetch = 0 : i64, scratch_operands = 2 : i64, tpu.core_type = #tpu.core_type<tc>, window_params = [{transform_indices = @transform_0, window_bounds = array<i64: 1, 16, 256>}, {transform_indices = @transform_1, window_bounds = array<i64: 1, 1, 256>}, {pipeline_mode = #tpu.pipeline_mode<synchronous>, transform_indices = @transform_2, window_bounds = array<i64: 16, 256>}, {pipeline_mode = #tpu.pipeline_mode<synchronous>, transform_indices = @transform_3, window_bounds = array<i64: 96, 272>}, {pipeline_mode = #tpu.pipeline_mode<synchronous>, transform_indices = @transform_4, window_bounds = array<i64: 64, 576>}, {pipeline_mode = #tpu.pipeline_mode<synchronous>, transform_indices = @transform_5, window_bounds = array<i64: 160, 1>}, {pipeline_mode = #tpu.pipeline_mode<synchronous>, transform_indices = @transform_6, window_bounds = array<i64: 64, 4>}, {pipeline_mode = #tpu.pipeline_mode<synchronous>, transform_indices = @transform_7, window_bounds = array<i64: 64, 4>}, {transform_indices = @transform_8, window_bounds = array<i64: 1, 32, 256>}]} {
    %c0 = arith.constant 0 : index
    %c0_0 = arith.constant 0 : index
    %c0_1 = arith.constant 0 : index
    %0 = vector.load %arg1[%c0, %c0_0, %c0_1] : memref<1x16x256xf32, #tpu.memory_space<vmem>>, vector<1x16x256xf32>
    %1 = vector.shape_cast %0 : vector<1x16x256xf32> to vector<16x256xf32>
    %c0_2 = arith.constant 0 : index
    %c0_3 = arith.constant 0 : index
    %c0_4 = arith.constant 0 : index
    %2 = vector.load %arg2[%c0_2, %c0_3, %c0_4] : memref<1x1x256xf32, #tpu.memory_space<vmem>>, vector<1x1x256xf32>
    %3 = vector.shape_cast %2 : vector<1x1x256xf32> to vector<1x256xf32>
    %c0_5 = arith.constant 0 : index
    %c0_6 = arith.constant 0 : index
    %4 = vector.load %arg3[%c0_5, %c0_6] : memref<16x256xf32, #tpu.memory_space<vmem>>, vector<16x256xf32>
    %c0_7 = arith.constant 0 : index
    %c0_8 = arith.constant 0 : index
    %5 = vector.load %arg6[%c0_7, %c0_8] : memref<160x1xf32, #tpu.memory_space<vmem>>, vector<160x1xf32>
    %6 = vector.extract_strided_slice %5 {offsets = [0, 0], sizes = [96, 1], strides = [1, 1]} : vector<160x1xf32> to vector<96x1xf32>
    %7 = vector.extract_strided_slice %5 {offsets = [96, 0], sizes = [64, 1], strides = [1, 1]} : vector<160x1xf32> to vector<64x1xf32>
    %8 = arith.truncf %1 : vector<16x256xf32> to vector<16x256xbf16>
    %c0_9 = arith.constant 0 : index
    %c0_10 = arith.constant 0 : index
    %9 = vector.load %arg10[%c0_9, %c0_10] : memref<272x256xbf16, #tpu.memory_space<vmem>>, vector<16x256xbf16>
    tpu.vector_store %arg10[%c0_9, %c0_10], %8 {strides = array<i32>} : memref<272x256xbf16, #tpu.memory_space<vmem>>, vector<16x256xbf16>,
    %c17_i32 = arith.constant 17 : i32
    %10 = tpu.dynamic_rotate %1 by %c17_i32 dim 1 : vector<16x256xf32>, i32 -> vector<16x256xf32>
    %11 = vector.extract_strided_slice %4 {offsets = [0, 0], sizes = [1, 256], strides = [1, 1]} : vector<16x256xf32> to vector<1x256xf32>
    %12 = vector.broadcast %11 : vector<1x256xf32> to vector<16x256xf32>
    %13 = arith.mulf %10, %12 : vector<16x256xf32>
    %14 = arith.truncf %13 : vector<16x256xf32> to vector<16x256xbf16>
    %c16 = arith.constant 16 : index
    %c0_11 = arith.constant 0 : index
    %15 = vector.load %arg10[%c16, %c0_11] : memref<272x256xbf16, #tpu.memory_space<vmem>>, vector<16x256xbf16>
    tpu.vector_store %arg10[%c16, %c0_11], %14 {strides = array<i32>} : memref<272x256xbf16, #tpu.memory_space<vmem>>, vector<16x256xbf16>,
    %c16_i32 = arith.constant 16 : i32
    %16 = tpu.dynamic_rotate %1 by %c16_i32 dim 1 : vector<16x256xf32>, i32 -> vector<16x256xf32>
    %17 = vector.extract_strided_slice %4 {offsets = [1, 0], sizes = [1, 256], strides = [1, 1]} : vector<16x256xf32> to vector<1x256xf32>
    %18 = vector.broadcast %17 : vector<1x256xf32> to vector<16x256xf32>
    %19 = arith.mulf %16, %18 : vector<16x256xf32>
    %20 = arith.truncf %19 : vector<16x256xf32> to vector<16x256xbf16>
    %c32 = arith.constant 32 : index
    %c0_12 = arith.constant 0 : index
    %21 = vector.load %arg10[%c32, %c0_12] : memref<272x256xbf16, #tpu.memory_space<vmem>>, vector<16x256xbf16>
    tpu.vector_store %arg10[%c32, %c0_12], %20 {strides = array<i32>} : memref<272x256xbf16, #tpu.memory_space<vmem>>, vector<16x256xbf16>,
    %c15_i32 = arith.constant 15 : i32
    %22 = tpu.dynamic_rotate %1 by %c15_i32 dim 1 : vector<16x256xf32>, i32 -> vector<16x256xf32>
    %23 = vector.extract_strided_slice %4 {offsets = [2, 0], sizes = [1, 256], strides = [1, 1]} : vector<16x256xf32> to vector<1x256xf32>
    %24 = vector.broadcast %23 : vector<1x256xf32> to vector<16x256xf32>
    %25 = arith.mulf %22, %24 : vector<16x256xf32>
    %26 = arith.truncf %25 : vector<16x256xf32> to vector<16x256xbf16>
    %c48 = arith.constant 48 : index
    %c0_13 = arith.constant 0 : index
    %27 = vector.load %arg10[%c48, %c0_13] : memref<272x256xbf16, #tpu.memory_space<vmem>>, vector<16x256xbf16>
    tpu.vector_store %arg10[%c48, %c0_13], %26 {strides = array<i32>} : memref<272x256xbf16, #tpu.memory_space<vmem>>, vector<16x256xbf16>,
    %c1_i32 = arith.constant 1 : i32
    %28 = tpu.dynamic_rotate %1 by %c1_i32 dim 1 : vector<16x256xf32>, i32 -> vector<16x256xf32>
    %29 = vector.extract_strided_slice %4 {offsets = [3, 0], sizes = [1, 256], strides = [1, 1]} : vector<16x256xf32> to vector<1x256xf32>
    %30 = vector.broadcast %29 : vector<1x256xf32> to vector<16x256xf32>
    %31 = arith.mulf %28, %30 : vector<16x256xf32>
    %32 = arith.truncf %31 : vector<16x256xf32> to vector<16x256xbf16>
    %c64 = arith.constant 64 : index
    %c0_14 = arith.constant 0 : index
    %33 = vector.load %arg10[%c64, %c0_14] : memref<272x256xbf16, #tpu.memory_space<vmem>>, vector<16x256xbf16>
    tpu.vector_store %arg10[%c64, %c0_14], %32 {strides = array<i32>} : memref<272x256xbf16, #tpu.memory_space<vmem>>, vector<16x256xbf16>,
    %c255_i32 = arith.constant 255 : i32
    %34 = tpu.dynamic_rotate %1 by %c255_i32 dim 1 : vector<16x256xf32>, i32 -> vector<16x256xf32>
    %35 = vector.extract_strided_slice %4 {offsets = [4, 0], sizes = [1, 256], strides = [1, 1]} : vector<16x256xf32> to vector<1x256xf32>
    %36 = vector.broadcast %35 : vector<1x256xf32> to vector<16x256xf32>
    %37 = arith.mulf %34, %36 : vector<16x256xf32>
    %38 = arith.truncf %37 : vector<16x256xf32> to vector<16x256xbf16>
    %c80 = arith.constant 80 : index
    %c0_15 = arith.constant 0 : index
    %39 = vector.load %arg10[%c80, %c0_15] : memref<272x256xbf16, #tpu.memory_space<vmem>>, vector<16x256xbf16>
    tpu.vector_store %arg10[%c80, %c0_15], %38 {strides = array<i32>} : memref<272x256xbf16, #tpu.memory_space<vmem>>, vector<16x256xbf16>,
    %c241_i32 = arith.constant 241 : i32
    %40 = tpu.dynamic_rotate %1 by %c241_i32 dim 1 : vector<16x256xf32>, i32 -> vector<16x256xf32>
    %41 = vector.extract_strided_slice %4 {offsets = [5, 0], sizes = [1, 256], strides = [1, 1]} : vector<16x256xf32> to vector<1x256xf32>
    %42 = vector.broadcast %41 : vector<1x256xf32> to vector<16x256xf32>
    %43 = arith.mulf %40, %42 : vector<16x256xf32>
    %44 = arith.truncf %43 : vector<16x256xf32> to vector<16x256xbf16>
    %c96 = arith.constant 96 : index
    %c0_16 = arith.constant 0 : index
    %45 = vector.load %arg10[%c96, %c0_16] : memref<272x256xbf16, #tpu.memory_space<vmem>>, vector<16x256xbf16>
    tpu.vector_store %arg10[%c96, %c0_16], %44 {strides = array<i32>} : memref<272x256xbf16, #tpu.memory_space<vmem>>, vector<16x256xbf16>,
    %c240_i32 = arith.constant 240 : i32
    %46 = tpu.dynamic_rotate %1 by %c240_i32 dim 1 : vector<16x256xf32>, i32 -> vector<16x256xf32>
    %47 = vector.extract_strided_slice %4 {offsets = [6, 0], sizes = [1, 256], strides = [1, 1]} : vector<16x256xf32> to vector<1x256xf32>
    %48 = vector.broadcast %47 : vector<1x256xf32> to vector<16x256xf32>
    %49 = arith.mulf %46, %48 : vector<16x256xf32>
    %50 = arith.truncf %49 : vector<16x256xf32> to vector<16x256xbf16>
    %c112 = arith.constant 112 : index
    %c0_17 = arith.constant 0 : index
    %51 = vector.load %arg10[%c112, %c0_17] : memref<272x256xbf16, #tpu.memory_space<vmem>>, vector<16x256xbf16>
    tpu.vector_store %arg10[%c112, %c0_17], %50 {strides = array<i32>} : memref<272x256xbf16, #tpu.memory_space<vmem>>, vector<16x256xbf16>,
    %c239_i32 = arith.constant 239 : i32
    %52 = tpu.dynamic_rotate %1 by %c239_i32 dim 1 : vector<16x256xf32>, i32 -> vector<16x256xf32>
    %53 = vector.extract_strided_slice %4 {offsets = [7, 0], sizes = [1, 256], strides = [1, 1]} : vector<16x256xf32> to vector<1x256xf32>
    %54 = vector.broadcast %53 : vector<1x256xf32> to vector<16x256xf32>
    %55 = arith.mulf %52, %54 : vector<16x256xf32>
    %56 = arith.truncf %55 : vector<16x256xf32> to vector<16x256xbf16>
    %c128 = arith.constant 128 : index
    %c0_18 = arith.constant 0 : index
    %57 = vector.load %arg10[%c128, %c0_18] : memref<272x256xbf16, #tpu.memory_space<vmem>>, vector<16x256xbf16>
    tpu.vector_store %arg10[%c128, %c0_18], %56 {strides = array<i32>} : memref<272x256xbf16, #tpu.memory_space<vmem>>, vector<16x256xbf16>,
    %c34_i32 = arith.constant 34 : i32
    %58 = tpu.dynamic_rotate %1 by %c34_i32 dim 1 : vector<16x256xf32>, i32 -> vector<16x256xf32>
    %59 = vector.extract_strided_slice %4 {offsets = [8, 0], sizes = [1, 256], strides = [1, 1]} : vector<16x256xf32> to vector<1x256xf32>
    %60 = vector.broadcast %59 : vector<1x256xf32> to vector<16x256xf32>
    %61 = arith.mulf %58, %60 : vector<16x256xf32>
    %62 = arith.truncf %61 : vector<16x256xf32> to vector<16x256xbf16>
    %c144 = arith.constant 144 : index
    %c0_19 = arith.constant 0 : index
    %63 = vector.load %arg10[%c144, %c0_19] : memref<272x256xbf16, #tpu.memory_space<vmem>>, vector<16x256xbf16>
    tpu.vector_store %arg10[%c144, %c0_19], %62 {strides = array<i32>} : memref<272x256xbf16, #tpu.memory_space<vmem>>, vector<16x256xbf16>,
    %c32_i32 = arith.constant 32 : i32
    %64 = tpu.dynamic_rotate %1 by %c32_i32 dim 1 : vector<16x256xf32>, i32 -> vector<16x256xf32>
    %65 = vector.extract_strided_slice %4 {offsets = [9, 0], sizes = [1, 256], strides = [1, 1]} : vector<16x256xf32> to vector<1x256xf32>
    %66 = vector.broadcast %65 : vector<1x256xf32> to vector<16x256xf32>
    %67 = arith.mulf %64, %66 : vector<16x256xf32>
    %68 = arith.truncf %67 : vector<16x256xf32> to vector<16x256xbf16>
    %c160 = arith.constant 160 : index
    %c0_20 = arith.constant 0 : index
    %69 = vector.load %arg10[%c160, %c0_20] : memref<272x256xbf16, #tpu.memory_space<vmem>>, vector<16x256xbf16>
    tpu.vector_store %arg10[%c160, %c0_20], %68 {strides = array<i32>} : memref<272x256xbf16, #tpu.memory_space<vmem>>, vector<16x256xbf16>,
    %c30_i32 = arith.constant 30 : i32
    %70 = tpu.dynamic_rotate %1 by %c30_i32 dim 1 : vector<16x256xf32>, i32 -> vector<16x256xf32>
    %71 = vector.extract_strided_slice %4 {offsets = [10, 0], sizes = [1, 256], strides = [1, 1]} : vector<16x256xf32> to vector<1x256xf32>
    %72 = vector.broadcast %71 : vector<1x256xf32> to vector<16x256xf32>
    %73 = arith.mulf %70, %72 : vector<16x256xf32>
    %74 = arith.truncf %73 : vector<16x256xf32> to vector<16x256xbf16>
    %c176 = arith.constant 176 : index
    %c0_21 = arith.constant 0 : index
    %75 = vector.load %arg10[%c176, %c0_21] : memref<272x256xbf16, #tpu.memory_space<vmem>>, vector<16x256xbf16>
    tpu.vector_store %arg10[%c176, %c0_21], %74 {strides = array<i32>} : memref<272x256xbf16, #tpu.memory_space<vmem>>, vector<16x256xbf16>,
    %c2_i32 = arith.constant 2 : i32
    %76 = tpu.dynamic_rotate %1 by %c2_i32 dim 1 : vector<16x256xf32>, i32 -> vector<16x256xf32>
    %77 = vector.extract_strided_slice %4 {offsets = [11, 0], sizes = [1, 256], strides = [1, 1]} : vector<16x256xf32> to vector<1x256xf32>
    %78 = vector.broadcast %77 : vector<1x256xf32> to vector<16x256xf32>
    %79 = arith.mulf %76, %78 : vector<16x256xf32>
    %80 = arith.truncf %79 : vector<16x256xf32> to vector<16x256xbf16>
    %c192 = arith.constant 192 : index
    %c0_22 = arith.constant 0 : index
    %81 = vector.load %arg10[%c192, %c0_22] : memref<272x256xbf16, #tpu.memory_space<vmem>>, vector<16x256xbf16>
    tpu.vector_store %arg10[%c192, %c0_22], %80 {strides = array<i32>} : memref<272x256xbf16, #tpu.memory_space<vmem>>, vector<16x256xbf16>,
    %c254_i32 = arith.constant 254 : i32
    %82 = tpu.dynamic_rotate %1 by %c254_i32 dim 1 : vector<16x256xf32>, i32 -> vector<16x256xf32>
    %83 = vector.extract_strided_slice %4 {offsets = [12, 0], sizes = [1, 256], strides = [1, 1]} : vector<16x256xf32> to vector<1x256xf32>
    %84 = vector.broadcast %83 : vector<1x256xf32> to vector<16x256xf32>
    %85 = arith.mulf %82, %84 : vector<16x256xf32>
    %86 = arith.truncf %85 : vector<16x256xf32> to vector<16x256xbf16>
    %c208 = arith.constant 208 : index
    %c0_23 = arith.constant 0 : index
    %87 = vector.load %arg10[%c208, %c0_23] : memref<272x256xbf16, #tpu.memory_space<vmem>>, vector<16x256xbf16>
    tpu.vector_store %arg10[%c208, %c0_23], %86 {strides = array<i32>} : memref<272x256xbf16, #tpu.memory_space<vmem>>, vector<16x256xbf16>,
    %c226_i32 = arith.constant 226 : i32
    %88 = tpu.dynamic_rotate %1 by %c226_i32 dim 1 : vector<16x256xf32>, i32 -> vector<16x256xf32>
    %89 = vector.extract_strided_slice %4 {offsets = [13, 0], sizes = [1, 256], strides = [1, 1]} : vector<16x256xf32> to vector<1x256xf32>
    %90 = vector.broadcast %89 : vector<1x256xf32> to vector<16x256xf32>
    %91 = arith.mulf %88, %90 : vector<16x256xf32>
    %92 = arith.truncf %91 : vector<16x256xf32> to vector<16x256xbf16>
    %c224 = arith.constant 224 : index
    %c0_24 = arith.constant 0 : index
    %93 = vector.load %arg10[%c224, %c0_24] : memref<272x256xbf16, #tpu.memory_space<vmem>>, vector<16x256xbf16>
    tpu.vector_store %arg10[%c224, %c0_24], %92 {strides = array<i32>} : memref<272x256xbf16, #tpu.memory_space<vmem>>, vector<16x256xbf16>,
    %c224_i32 = arith.constant 224 : i32
    %94 = tpu.dynamic_rotate %1 by %c224_i32 dim 1 : vector<16x256xf32>, i32 -> vector<16x256xf32>
    %95 = vector.extract_strided_slice %4 {offsets = [14, 0], sizes = [1, 256], strides = [1, 1]} : vector<16x256xf32> to vector<1x256xf32>
    %96 = vector.broadcast %95 : vector<1x256xf32> to vector<16x256xf32>
    %97 = arith.mulf %94, %96 : vector<16x256xf32>
    %98 = arith.truncf %97 : vector<16x256xf32> to vector<16x256xbf16>
    %c240 = arith.constant 240 : index
    %c0_25 = arith.constant 0 : index
    %99 = vector.load %arg10[%c240, %c0_25] : memref<272x256xbf16, #tpu.memory_space<vmem>>, vector<16x256xbf16>
    tpu.vector_store %arg10[%c240, %c0_25], %98 {strides = array<i32>} : memref<272x256xbf16, #tpu.memory_space<vmem>>, vector<16x256xbf16>,
    %c222_i32 = arith.constant 222 : i32
    %100 = tpu.dynamic_rotate %1 by %c222_i32 dim 1 : vector<16x256xf32>, i32 -> vector<16x256xf32>
    %101 = vector.extract_strided_slice %4 {offsets = [15, 0], sizes = [1, 256], strides = [1, 1]} : vector<16x256xf32> to vector<1x256xf32>
    %102 = vector.broadcast %101 : vector<1x256xf32> to vector<16x256xf32>
    %103 = arith.mulf %100, %102 : vector<16x256xf32>
    %104 = arith.truncf %103 : vector<16x256xf32> to vector<16x256xbf16>
    %c256 = arith.constant 256 : index
    %c0_26 = arith.constant 0 : index
    %105 = vector.load %arg10[%c256, %c0_26] : memref<272x256xbf16, #tpu.memory_space<vmem>>, vector<16x256xbf16>
    tpu.vector_store %arg10[%c256, %c0_26], %104 {strides = array<i32>} : memref<272x256xbf16, #tpu.memory_space<vmem>>, vector<16x256xbf16>,
    %c0_27 = arith.constant 0 : index
    %c0_28 = arith.constant 0 : index
    %106 = vector.load %arg4[%c0_27, %c0_28] : memref<96x272xbf16, #tpu.memory_space<vmem>>, vector<96x272xbf16>
    %c0_29 = arith.constant 0 : index
    %c0_30 = arith.constant 0 : index
    %107 = vector.load %arg10[%c0_29, %c0_30] : memref<272x256xbf16, #tpu.memory_space<vmem>>, vector<272x256xbf16>
    %cst = arith.constant dense<0.000000e+00> : vector<96x256xf32>
    %108 = tpu.matmul %106, %107, %cst {dimension_numbers = #tpu.dot_dimension_numbers<[1], [0], [0], [1], [0, 0, 1, 1], [], []>} : vector<96x272xbf16>, vector<272x256xbf16>, vector<96x256xf32> -> vector<96x256xf32>
    %109 = vector.broadcast %6 : vector<96x1xf32> to vector<96x256xf32>
    %110 = arith.addf %108, %109 : vector<96x256xf32>
    %111 = vector.extract_strided_slice %110 {offsets = [0, 0], sizes = [32, 256], strides = [1, 1]} : vector<96x256xf32> to vector<32x256xf32>
    %112 = vector.broadcast %3 : vector<1x256xf32> to vector<32x256xf32>
    %113 = arith.mulf %111, %112 : vector<32x256xf32>
    %cst_31 = arith.constant 0.000000e+00 : f32
    %114 = vector.broadcast %cst_31 : f32 to vector<32x256xf32>
    %115 = arith.maximumf %113, %114 : vector<32x256xf32>
    %116 = vector.extract_strided_slice %110 {offsets = [32, 0], sizes = [32, 256], strides = [1, 1]} : vector<96x256xf32> to vector<32x256xf32>
    %117 = vector.broadcast %3 : vector<1x256xf32> to vector<32x256xf32>
    %118 = arith.mulf %116, %117 : vector<32x256xf32>
    %cst_32 = arith.constant 0.000000e+00 : f32
    %119 = vector.broadcast %cst_32 : f32 to vector<32x256xf32>
    %120 = arith.maximumf %118, %119 : vector<32x256xf32>
    %121 = vector.extract_strided_slice %110 {offsets = [64, 0], sizes = [32, 256], strides = [1, 1]} : vector<96x256xf32> to vector<32x256xf32>
    %122 = arith.truncf %115 : vector<32x256xf32> to vector<32x256xbf16>
    %c0_33 = arith.constant 0 : index
    %c0_34 = arith.constant 0 : index
    %123 = vector.load %arg11[%c0_33, %c0_34] : memref<576x256xbf16, #tpu.memory_space<vmem>>, vector<32x256xbf16>
    tpu.vector_store %arg11[%c0_33, %c0_34], %122 {strides = array<i32>} : memref<576x256xbf16, #tpu.memory_space<vmem>>, vector<32x256xbf16>,
    %c17_i32_35 = arith.constant 17 : i32
    %124 = tpu.dynamic_rotate %115 by %c17_i32_35 dim 1 : vector<32x256xf32>, i32 -> vector<32x256xf32>
    %125 = vector.extract_strided_slice %4 {offsets = [0, 0], sizes = [1, 256], strides = [1, 1]} : vector<16x256xf32> to vector<1x256xf32>
    %126 = vector.broadcast %125 : vector<1x256xf32> to vector<32x256xf32>
    %127 = arith.mulf %124, %126 : vector<32x256xf32>
    %128 = arith.truncf %127 : vector<32x256xf32> to vector<32x256xbf16>
    %c32_36 = arith.constant 32 : index
    %c0_37 = arith.constant 0 : index
    %129 = vector.load %arg11[%c32_36, %c0_37] : memref<576x256xbf16, #tpu.memory_space<vmem>>, vector<32x256xbf16>
    tpu.vector_store %arg11[%c32_36, %c0_37], %128 {strides = array<i32>} : memref<576x256xbf16, #tpu.memory_space<vmem>>, vector<32x256xbf16>,
    %c16_i32_38 = arith.constant 16 : i32
    %130 = tpu.dynamic_rotate %115 by %c16_i32_38 dim 1 : vector<32x256xf32>, i32 -> vector<32x256xf32>
    %131 = vector.extract_strided_slice %4 {offsets = [1, 0], sizes = [1, 256], strides = [1, 1]} : vector<16x256xf32> to vector<1x256xf32>
    %132 = vector.broadcast %131 : vector<1x256xf32> to vector<32x256xf32>
    %133 = arith.mulf %130, %132 : vector<32x256xf32>
    %134 = arith.truncf %133 : vector<32x256xf32> to vector<32x256xbf16>
    %c64_39 = arith.constant 64 : index
    %c0_40 = arith.constant 0 : index
    %135 = vector.load %arg11[%c64_39, %c0_40] : memref<576x256xbf16, #tpu.memory_space<vmem>>, vector<32x256xbf16>
    tpu.vector_store %arg11[%c64_39, %c0_40], %134 {strides = array<i32>} : memref<576x256xbf16, #tpu.memory_space<vmem>>, vector<32x256xbf16>,
    %c15_i32_41 = arith.constant 15 : i32
    %136 = tpu.dynamic_rotate %115 by %c15_i32_41 dim 1 : vector<32x256xf32>, i32 -> vector<32x256xf32>
    %137 = vector.extract_strided_slice %4 {offsets = [2, 0], sizes = [1, 256], strides = [1, 1]} : vector<16x256xf32> to vector<1x256xf32>
    %138 = vector.broadcast %137 : vector<1x256xf32> to vector<32x256xf32>
    %139 = arith.mulf %136, %138 : vector<32x256xf32>
    %140 = arith.truncf %139 : vector<32x256xf32> to vector<32x256xbf16>
    %c96_42 = arith.constant 96 : index
    %c0_43 = arith.constant 0 : index
    %141 = vector.load %arg11[%c96_42, %c0_43] : memref<576x256xbf16, #tpu.memory_space<vmem>>, vector<32x256xbf16>
    tpu.vector_store %arg11[%c96_42, %c0_43], %140 {strides = array<i32>} : memref<576x256xbf16, #tpu.memory_space<vmem>>, vector<32x256xbf16>,
    %c1_i32_44 = arith.constant 1 : i32
    %142 = tpu.dynamic_rotate %115 by %c1_i32_44 dim 1 : vector<32x256xf32>, i32 -> vector<32x256xf32>
    %143 = vector.extract_strided_slice %4 {offsets = [3, 0], sizes = [1, 256], strides = [1, 1]} : vector<16x256xf32> to vector<1x256xf32>
    %144 = vector.broadcast %143 : vector<1x256xf32> to vector<32x256xf32>
    %145 = arith.mulf %142, %144 : vector<32x256xf32>
    %146 = arith.truncf %145 : vector<32x256xf32> to vector<32x256xbf16>
    %c128_45 = arith.constant 128 : index
    %c0_46 = arith.constant 0 : index
    %147 = vector.load %arg11[%c128_45, %c0_46] : memref<576x256xbf16, #tpu.memory_space<vmem>>, vector<32x256xbf16>
    tpu.vector_store %arg11[%c128_45, %c0_46], %146 {strides = array<i32>} : memref<576x256xbf16, #tpu.memory_space<vmem>>, vector<32x256xbf16>,
    %c255_i32_47 = arith.constant 255 : i32
    %148 = tpu.dynamic_rotate %115 by %c255_i32_47 dim 1 : vector<32x256xf32>, i32 -> vector<32x256xf32>
    %149 = vector.extract_strided_slice %4 {offsets = [4, 0], sizes = [1, 256], strides = [1, 1]} : vector<16x256xf32> to vector<1x256xf32>
    %150 = vector.broadcast %149 : vector<1x256xf32> to vector<32x256xf32>
    %151 = arith.mulf %148, %150 : vector<32x256xf32>
    %152 = arith.truncf %151 : vector<32x256xf32> to vector<32x256xbf16>
    %c160_48 = arith.constant 160 : index
    %c0_49 = arith.constant 0 : index
    %153 = vector.load %arg11[%c160_48, %c0_49] : memref<576x256xbf16, #tpu.memory_space<vmem>>, vector<32x256xbf16>
    tpu.vector_store %arg11[%c160_48, %c0_49], %152 {strides = array<i32>} : memref<576x256xbf16, #tpu.memory_space<vmem>>, vector<32x256xbf16>,
    %c241_i32_50 = arith.constant 241 : i32
    %154 = tpu.dynamic_rotate %115 by %c241_i32_50 dim 1 : vector<32x256xf32>, i32 -> vector<32x256xf32>
    %155 = vector.extract_strided_slice %4 {offsets = [5, 0], sizes = [1, 256], strides = [1, 1]} : vector<16x256xf32> to vector<1x256xf32>
    %156 = vector.broadcast %155 : vector<1x256xf32> to vector<32x256xf32>
    %157 = arith.mulf %154, %156 : vector<32x256xf32>
    %158 = arith.truncf %157 : vector<32x256xf32> to vector<32x256xbf16>
    %c192_51 = arith.constant 192 : index
    %c0_52 = arith.constant 0 : index
    %159 = vector.load %arg11[%c192_51, %c0_52] : memref<576x256xbf16, #tpu.memory_space<vmem>>, vector<32x256xbf16>
    tpu.vector_store %arg11[%c192_51, %c0_52], %158 {strides = array<i32>} : memref<576x256xbf16, #tpu.memory_space<vmem>>, vector<32x256xbf16>,
    %c240_i32_53 = arith.constant 240 : i32
    %160 = tpu.dynamic_rotate %115 by %c240_i32_53 dim 1 : vector<32x256xf32>, i32 -> vector<32x256xf32>
    %161 = vector.extract_strided_slice %4 {offsets = [6, 0], sizes = [1, 256], strides = [1, 1]} : vector<16x256xf32> to vector<1x256xf32>
    %162 = vector.broadcast %161 : vector<1x256xf32> to vector<32x256xf32>
    %163 = arith.mulf %160, %162 : vector<32x256xf32>
    %164 = arith.truncf %163 : vector<32x256xf32> to vector<32x256xbf16>
    %c224_54 = arith.constant 224 : index
    %c0_55 = arith.constant 0 : index
    %165 = vector.load %arg11[%c224_54, %c0_55] : memref<576x256xbf16, #tpu.memory_space<vmem>>, vector<32x256xbf16>
    tpu.vector_store %arg11[%c224_54, %c0_55], %164 {strides = array<i32>} : memref<576x256xbf16, #tpu.memory_space<vmem>>, vector<32x256xbf16>,
    %c239_i32_56 = arith.constant 239 : i32
    %166 = tpu.dynamic_rotate %115 by %c239_i32_56 dim 1 : vector<32x256xf32>, i32 -> vector<32x256xf32>
    %167 = vector.extract_strided_slice %4 {offsets = [7, 0], sizes = [1, 256], strides = [1, 1]} : vector<16x256xf32> to vector<1x256xf32>
    %168 = vector.broadcast %167 : vector<1x256xf32> to vector<32x256xf32>
    %169 = arith.mulf %166, %168 : vector<32x256xf32>
    %170 = arith.truncf %169 : vector<32x256xf32> to vector<32x256xbf16>
    %c256_57 = arith.constant 256 : index
    %c0_58 = arith.constant 0 : index
    %171 = vector.load %arg11[%c256_57, %c0_58] : memref<576x256xbf16, #tpu.memory_space<vmem>>, vector<32x256xbf16>
    tpu.vector_store %arg11[%c256_57, %c0_58], %170 {strides = array<i32>} : memref<576x256xbf16, #tpu.memory_space<vmem>>, vector<32x256xbf16>,
    %172 = arith.truncf %120 : vector<32x256xf32> to vector<32x256xbf16>
    %c288 = arith.constant 288 : index
    %c0_59 = arith.constant 0 : index
    %173 = vector.load %arg11[%c288, %c0_59] : memref<576x256xbf16, #tpu.memory_space<vmem>>, vector<32x256xbf16>
    tpu.vector_store %arg11[%c288, %c0_59], %172 {strides = array<i32>} : memref<576x256xbf16, #tpu.memory_space<vmem>>, vector<32x256xbf16>,
    %c34_i32_60 = arith.constant 34 : i32
    %174 = tpu.dynamic_rotate %120 by %c34_i32_60 dim 1 : vector<32x256xf32>, i32 -> vector<32x256xf32>
    %175 = vector.extract_strided_slice %4 {offsets = [8, 0], sizes = [1, 256], strides = [1, 1]} : vector<16x256xf32> to vector<1x256xf32>
    %176 = vector.broadcast %175 : vector<1x256xf32> to vector<32x256xf32>
    %177 = arith.mulf %174, %176 : vector<32x256xf32>
    %178 = arith.truncf %177 : vector<32x256xf32> to vector<32x256xbf16>
    %c320 = arith.constant 320 : index
    %c0_61 = arith.constant 0 : index
    %179 = vector.load %arg11[%c320, %c0_61] : memref<576x256xbf16, #tpu.memory_space<vmem>>, vector<32x256xbf16>
    tpu.vector_store %arg11[%c320, %c0_61], %178 {strides = array<i32>} : memref<576x256xbf16, #tpu.memory_space<vmem>>, vector<32x256xbf16>,
    %c32_i32_62 = arith.constant 32 : i32
    %180 = tpu.dynamic_rotate %120 by %c32_i32_62 dim 1 : vector<32x256xf32>, i32 -> vector<32x256xf32>
    %181 = vector.extract_strided_slice %4 {offsets = [9, 0], sizes = [1, 256], strides = [1, 1]} : vector<16x256xf32> to vector<1x256xf32>
    %182 = vector.broadcast %181 : vector<1x256xf32> to vector<32x256xf32>
    %183 = arith.mulf %180, %182 : vector<32x256xf32>
    %184 = arith.truncf %183 : vector<32x256xf32> to vector<32x256xbf16>
    %c352 = arith.constant 352 : index
    %c0_63 = arith.constant 0 : index
    %185 = vector.load %arg11[%c352, %c0_63] : memref<576x256xbf16, #tpu.memory_space<vmem>>, vector<32x256xbf16>
    tpu.vector_store %arg11[%c352, %c0_63], %184 {strides = array<i32>} : memref<576x256xbf16, #tpu.memory_space<vmem>>, vector<32x256xbf16>,
    %c30_i32_64 = arith.constant 30 : i32
    %186 = tpu.dynamic_rotate %120 by %c30_i32_64 dim 1 : vector<32x256xf32>, i32 -> vector<32x256xf32>
    %187 = vector.extract_strided_slice %4 {offsets = [10, 0], sizes = [1, 256], strides = [1, 1]} : vector<16x256xf32> to vector<1x256xf32>
    %188 = vector.broadcast %187 : vector<1x256xf32> to vector<32x256xf32>
    %189 = arith.mulf %186, %188 : vector<32x256xf32>
    %190 = arith.truncf %189 : vector<32x256xf32> to vector<32x256xbf16>
    %c384 = arith.constant 384 : index
    %c0_65 = arith.constant 0 : index
    %191 = vector.load %arg11[%c384, %c0_65] : memref<576x256xbf16, #tpu.memory_space<vmem>>, vector<32x256xbf16>
    tpu.vector_store %arg11[%c384, %c0_65], %190 {strides = array<i32>} : memref<576x256xbf16, #tpu.memory_space<vmem>>, vector<32x256xbf16>,
    %c2_i32_66 = arith.constant 2 : i32
    %192 = tpu.dynamic_rotate %120 by %c2_i32_66 dim 1 : vector<32x256xf32>, i32 -> vector<32x256xf32>
    %193 = vector.extract_strided_slice %4 {offsets = [11, 0], sizes = [1, 256], strides = [1, 1]} : vector<16x256xf32> to vector<1x256xf32>
    %194 = vector.broadcast %193 : vector<1x256xf32> to vector<32x256xf32>
    %195 = arith.mulf %192, %194 : vector<32x256xf32>
    %196 = arith.truncf %195 : vector<32x256xf32> to vector<32x256xbf16>
    %c416 = arith.constant 416 : index
    %c0_67 = arith.constant 0 : index
    %197 = vector.load %arg11[%c416, %c0_67] : memref<576x256xbf16, #tpu.memory_space<vmem>>, vector<32x256xbf16>
    tpu.vector_store %arg11[%c416, %c0_67], %196 {strides = array<i32>} : memref<576x256xbf16, #tpu.memory_space<vmem>>, vector<32x256xbf16>,
    %c254_i32_68 = arith.constant 254 : i32
    %198 = tpu.dynamic_rotate %120 by %c254_i32_68 dim 1 : vector<32x256xf32>, i32 -> vector<32x256xf32>
    %199 = vector.extract_strided_slice %4 {offsets = [12, 0], sizes = [1, 256], strides = [1, 1]} : vector<16x256xf32> to vector<1x256xf32>
    %200 = vector.broadcast %199 : vector<1x256xf32> to vector<32x256xf32>
    %201 = arith.mulf %198, %200 : vector<32x256xf32>
    %202 = arith.truncf %201 : vector<32x256xf32> to vector<32x256xbf16>
    %c448 = arith.constant 448 : index
    %c0_69 = arith.constant 0 : index
    %203 = vector.load %arg11[%c448, %c0_69] : memref<576x256xbf16, #tpu.memory_space<vmem>>, vector<32x256xbf16>
    tpu.vector_store %arg11[%c448, %c0_69], %202 {strides = array<i32>} : memref<576x256xbf16, #tpu.memory_space<vmem>>, vector<32x256xbf16>,
    %c226_i32_70 = arith.constant 226 : i32
    %204 = tpu.dynamic_rotate %120 by %c226_i32_70 dim 1 : vector<32x256xf32>, i32 -> vector<32x256xf32>
    %205 = vector.extract_strided_slice %4 {offsets = [13, 0], sizes = [1, 256], strides = [1, 1]} : vector<16x256xf32> to vector<1x256xf32>
    %206 = vector.broadcast %205 : vector<1x256xf32> to vector<32x256xf32>
    %207 = arith.mulf %204, %206 : vector<32x256xf32>
    %208 = arith.truncf %207 : vector<32x256xf32> to vector<32x256xbf16>
    %c480 = arith.constant 480 : index
    %c0_71 = arith.constant 0 : index
    %209 = vector.load %arg11[%c480, %c0_71] : memref<576x256xbf16, #tpu.memory_space<vmem>>, vector<32x256xbf16>
    tpu.vector_store %arg11[%c480, %c0_71], %208 {strides = array<i32>} : memref<576x256xbf16, #tpu.memory_space<vmem>>, vector<32x256xbf16>,
    %c224_i32_72 = arith.constant 224 : i32
    %210 = tpu.dynamic_rotate %120 by %c224_i32_72 dim 1 : vector<32x256xf32>, i32 -> vector<32x256xf32>
    %211 = vector.extract_strided_slice %4 {offsets = [14, 0], sizes = [1, 256], strides = [1, 1]} : vector<16x256xf32> to vector<1x256xf32>
    %212 = vector.broadcast %211 : vector<1x256xf32> to vector<32x256xf32>
    %213 = arith.mulf %210, %212 : vector<32x256xf32>
    %214 = arith.truncf %213 : vector<32x256xf32> to vector<32x256xbf16>
    %c512 = arith.constant 512 : index
    %c0_73 = arith.constant 0 : index
    %215 = vector.load %arg11[%c512, %c0_73] : memref<576x256xbf16, #tpu.memory_space<vmem>>, vector<32x256xbf16>
    tpu.vector_store %arg11[%c512, %c0_73], %214 {strides = array<i32>} : memref<576x256xbf16, #tpu.memory_space<vmem>>, vector<32x256xbf16>,
    %c222_i32_74 = arith.constant 222 : i32
    %216 = tpu.dynamic_rotate %120 by %c222_i32_74 dim 1 : vector<32x256xf32>, i32 -> vector<32x256xf32>
    %217 = vector.extract_strided_slice %4 {offsets = [15, 0], sizes = [1, 256], strides = [1, 1]} : vector<16x256xf32> to vector<1x256xf32>
    %218 = vector.broadcast %217 : vector<1x256xf32> to vector<32x256xf32>
    %219 = arith.mulf %216, %218 : vector<32x256xf32>
    %220 = arith.truncf %219 : vector<32x256xf32> to vector<32x256xbf16>
    %c544 = arith.constant 544 : index
    %c0_75 = arith.constant 0 : index
    %221 = vector.load %arg11[%c544, %c0_75] : memref<576x256xbf16, #tpu.memory_space<vmem>>, vector<32x256xbf16>
    tpu.vector_store %arg11[%c544, %c0_75], %220 {strides = array<i32>} : memref<576x256xbf16, #tpu.memory_space<vmem>>, vector<32x256xbf16>,
    %c0_76 = arith.constant 0 : index
    %c0_77 = arith.constant 0 : index
    %222 = vector.load %arg5[%c0_76, %c0_77] : memref<64x576xbf16, #tpu.memory_space<vmem>>, vector<64x576xbf16>
    %c0_78 = arith.constant 0 : index
    %c0_79 = arith.constant 0 : index
    %223 = vector.load %arg11[%c0_78, %c0_79] : memref<576x256xbf16, #tpu.memory_space<vmem>>, vector<576x256xbf16>
    %cst_80 = arith.constant dense<0.000000e+00> : vector<64x256xf32>
    %224 = tpu.matmul %222, %223, %cst_80 {dimension_numbers = #tpu.dot_dimension_numbers<[1], [0], [0], [1], [0, 0, 1, 1], [], []>} : vector<64x576xbf16>, vector<576x256xbf16>, vector<64x256xf32> -> vector<64x256xf32>
    %225 = vector.broadcast %7 : vector<64x1xf32> to vector<64x256xf32>
    %226 = arith.addf %224, %225 : vector<64x256xf32>
    %227 = vector.broadcast %3 : vector<1x256xf32> to vector<64x256xf32>
    %228 = arith.mulf %226, %227 : vector<64x256xf32>
    %cst_81 = arith.constant dense<0.000000e+00> : vector<1xf32>
    %229 = vector.multi_reduction <add>, %3, %cst_81 [1] : vector<1x256xf32> to vector<1xf32>
    %230 = vector.shape_cast %229 : vector<1xf32> to vector<1x1xf32>
    %cst_82 = arith.constant dense<0.000000e+00> : vector<64xf32>
    %231 = vector.multi_reduction <add>, %228, %cst_82 [1] : vector<64x256xf32> to vector<64xf32>
    %232 = vector.shape_cast %231 : vector<64xf32> to vector<64x1xf32>
    %233 = tpu.reciprocal %230 {approx = true} : vector<1x1xf32> -> vector<1x1xf32>
    %234 = vector.broadcast %233 : vector<1x1xf32> to vector<64x1xf32>
    %235 = arith.mulf %232, %234 : vector<64x1xf32>
    %c0_83 = arith.constant 0 : index
    %c0_84 = arith.constant 0 : index
    %236 = vector.load %arg7[%c0_83, %c0_84] : memref<64x4xf32, #tpu.memory_space<vmem>>, vector<64x4xf32>
    %237 = vector.broadcast %235 : vector<64x1xf32> to vector<64x4xf32>
    %238 = arith.mulf %236, %237 : vector<64x4xf32>
    %cst_85 = arith.constant dense<0.000000e+00> : vector<4xf32>
    %239 = vector.multi_reduction <add>, %238, %cst_85 [0] : vector<64x4xf32> to vector<4xf32>
    %240 = vector.shape_cast %239 : vector<4xf32> to vector<1x4xf32>
    %cst_86 = arith.constant 0.000000e+00 : f32
    %241 = vector.broadcast %cst_86 : f32 to vector<1x4xf32>
    %242 = arith.maximumf %240, %241 : vector<1x4xf32>
    %c0_87 = arith.constant 0 : index
    %c0_88 = arith.constant 0 : index
    %243 = vector.load %arg8[%c0_87, %c0_88] : memref<64x4xf32, #tpu.memory_space<vmem>>, vector<64x4xf32>
    %244 = vector.broadcast %242 : vector<1x4xf32> to vector<64x4xf32>
    %245 = arith.mulf %243, %244 : vector<64x4xf32>
    %cst_89 = arith.constant dense<0.000000e+00> : vector<64xf32>
    %246 = vector.multi_reduction <add>, %245, %cst_89 [1] : vector<64x4xf32> to vector<64xf32>
    %247 = vector.shape_cast %246 : vector<64xf32> to vector<64x1xf32>
    %248 = arith.negf %247 : vector<64x1xf32>
    %249 = math.exp %248 : vector<64x1xf32>
    %cst_90 = arith.constant 1.000000e+00 : f32
    %250 = vector.broadcast %cst_90 : f32 to vector<64x1xf32>
    %251 = arith.addf %250, %249 : vector<64x1xf32>
    %252 = arith.divf %250, %251 : vector<64x1xf32>
    %253 = vector.broadcast %252 : vector<64x1xf32> to vector<64x256xf32>
    %254 = arith.mulf %228, %253 : vector<64x256xf32>
    %255 = vector.extract_strided_slice %254 {offsets = [0, 0], sizes = [32, 256], strides = [1, 1]} : vector<64x256xf32> to vector<32x256xf32>
    %256 = vector.extract_strided_slice %254 {offsets = [32, 0], sizes = [32, 256], strides = [1, 1]} : vector<64x256xf32> to vector<32x256xf32>
    %257 = arith.addf %255, %256 : vector<32x256xf32>
    %258 = arith.addf %257, %121 : vector<32x256xf32>
    %cst_91 = arith.constant 0.000000e+00 : f32
    %259 = vector.broadcast %cst_91 : f32 to vector<32x256xf32>
    %260 = arith.maximumf %258, %259 : vector<32x256xf32>
    %261 = vector.broadcast %3 : vector<1x256xf32> to vector<32x256xf32>
    %262 = arith.mulf %260, %261 : vector<32x256xf32>
    %c0_92 = arith.constant 0 : index
    %c0_93 = arith.constant 0 : index
    %c0_94 = arith.constant 0 : index
    %263 = vector.load %arg9[%c0_92, %c0_93, %c0_94] : memref<1x32x256xf32, #tpu.memory_space<vmem>>, vector<1x32x256xf32>
    %264 = vector.shape_cast %263 : vector<1x32x256xf32> to vector<32x256xf32>
    %265 = vector.shape_cast %262 : vector<32x256xf32> to vector<1x32x256xf32>
    tpu.vector_store %arg9[%c0_92, %c0_93, %c0_94], %265 {strides = array<i32>} : memref<1x32x256xf32, #tpu.memory_space<vmem>>, vector<1x32x256xf32>,
    return
  }
  func.func @transform_0(%arg0: i32) -> (i32, i32, i32) {
    %c0_i32 = arith.constant 0 : i32
    %c0_i32_0 = arith.constant 0 : i32
    %c0_i32_1 = arith.constant 0 : i32
    return %arg0, %c0_i32, %c0_i32_0 : i32, i32, i32
  }
  func.func @transform_1(%arg0: i32) -> (i32, i32, i32) {
    %c0_i32 = arith.constant 0 : i32
    %c0_i32_0 = arith.constant 0 : i32
    %c0_i32_1 = arith.constant 0 : i32
    return %arg0, %c0_i32, %c0_i32_0 : i32, i32, i32
  }
  func.func @transform_2(%arg0: i32) -> (i32, i32) {
    %c0_i32 = arith.constant 0 : i32
    %c0_i32_0 = arith.constant 0 : i32
    %c0_i32_1 = arith.constant 0 : i32
    return %c0_i32, %c0_i32_0 : i32, i32
  }
  func.func @transform_3(%arg0: i32) -> (i32, i32) {
    %c0_i32 = arith.constant 0 : i32
    %c0_i32_0 = arith.constant 0 : i32
    %c0_i32_1 = arith.constant 0 : i32
    return %c0_i32, %c0_i32_0 : i32, i32
  }
  func.func @transform_4(%arg0: i32) -> (i32, i32) {
    %c0_i32 = arith.constant 0 : i32
    %c0_i32_0 = arith.constant 0 : i32
    %c0_i32_1 = arith.constant 0 : i32
    return %c0_i32, %c0_i32_0 : i32, i32
  }
  func.func @transform_5(%arg0: i32) -> (i32, i32) {
    %c0_i32 = arith.constant 0 : i32
    %c0_i32_0 = arith.constant 0 : i32
    %c0_i32_1 = arith.constant 0 : i32
    return %c0_i32, %c0_i32_0 : i32, i32
  }
  func.func @transform_6(%arg0: i32) -> (i32, i32) {
    %c0_i32 = arith.constant 0 : i32
    %c0_i32_0 = arith.constant 0 : i32
    %c0_i32_1 = arith.constant 0 : i32
    return %c0_i32, %c0_i32_0 : i32, i32
  }
  func.func @transform_7(%arg0: i32) -> (i32, i32) {
    %c0_i32 = arith.constant 0 : i32
    %c0_i32_0 = arith.constant 0 : i32
    %c0_i32_1 = arith.constant 0 : i32
    return %c0_i32, %c0_i32_0 : i32, i32
  }
  func.func @transform_8(%arg0: i32) -> (i32, i32, i32) {
    %c0_i32 = arith.constant 0 : i32
    %c0_i32_0 = arith.constant 0 : i32
    %c0_i32_1 = arith.constant 0 : i32
    return %arg0, %c0_i32, %c0_i32_0 : i32, i32, i32
  }
}

</mosaic_0001>

<bundles_post_ra>
// kernel: tpu_custom_call.1
= control target key start
LH: loop header
LB: loop body
LE: loop exit
PB: predicated region body
PF: predicated region fallthrough
CT: control target
= control target key end

     0   :  { %13 = vsyncpa [#allocation5], 0  ;;  %s6811_s0 = inlined_call_operand.vmem [shape: f32[2,16,256], index: 0, kind: input, shape index: {}]   ;;  %s6812_s1 = inlined_call_operand.vmem [shape: f32[2,1,256], index: 1, kind: input, shape index: {}]   ;;  %s6813_s2 = inlined_call_operand.vmem [shape: f32[16,256], index: 2, kind: input, shape index: {}]   ;;  %s6814_s3 = inlined_call_operand.vmem [shape: bf16[96,272], index: 3, kind: input, shape index: {}]   ;;  %s6815_s4 = inlined_call_operand.vmem [shape: bf16[64,576], index: 4, kind: input, shape index: {}]   ;;  %s6816_s5 = inlined_call_operand.vmem [shape: f32[160,1], index: 5, kind: input, shape index: {}]   ;;  %s6817_s6 = inlined_call_operand.vmem [shape: f32[64,4], index: 6, kind: input, shape index: {}]   ;;  %s6818_s7 = inlined_call_operand.vmem [shape: f32[64,4], index: 7, kind: input, shape index: {}]   ;;  %s6819_s8 = inlined_call_operand.hbm [shape: f32[2,32,256], index: 8, kind: output, shape index: {}]  }
   0x1   :  { %15 = vsyncpa [#allocation5 + $0x1], 0  ;;  %s4369_s27 = smov 0   ;;  %s4371_s28 = smov 0  }
   0x2   :  { %s4373_s29 = smov 0   ;;  %s4375_s30 = smov 0  }
   0x3 LB: > { %s4390_s9 = sadd.s32 4294967295, %s4304_s30   ;;  %s3381_s10 = sadd.s32 4294967294, %s4304_s30   ;;  %s4304_s30 = sphi %s4375_s30, %s7048_s30   ;;  %s4300_s29 = sphi %s4373_s29, %s7047_s29   ;;  %s4296_s28 = sphi %s4371_s28, %s7046_s28   ;;  %s4292_s27 = sphi %s4369_s27, %s7045_s27  }
   0x4   : > { %s4394_s11 = sadd.s32 1, %s4304_s30   ;;  %s206_s12 = sadd.s32 1, %s4300_s29 }
   0x5   : > { %s203_s13 = ssub.s32 %s4304_s30, %s4394_s11  ;;  %p216_p0 = scmp.ne.s32.totalorder %s4300_s29, %s4296_s28 }
   0x6   : > { %p204_p1 = scmp.eq.s32.totalorder %s203_s13, 0  ;;  %p217_p2 = scmp.eq.s32.totalorder %s4390_s9, 1 }
   0x7   : > { %p222_p3 = scmp.ne.s32.totalorder %s4296_s28, %s4292_s27  ;;  %p223_p4 = scmp.eq.s32.totalorder %s3381_s10, 1 }
   0x8   : > { %s4405_s14 = scalar_select %p204_p1, %s4300_s29, %s206_s12  }
   0x9   : > { %p4407_p5 = por %p217_p2, %p216_p0  ;;  %p4411_p6 = por %p223_p4, %p222_p3 }
   0xa   : > { %p3384_p7 = scmp.ge.s32.totalorder %s4304_s30, 1  ;;  %p274_p8 = scmp.lt.s32.totalorder %s4304_s30, 3 }
   0xc   : > { %p275_p9 = pnand %p3384_p7, %p274_p8 }
   0xe   : > { %278 = sbr.rel (%p275_p9) target bundleno = 1518 (0x5ee), region = 52 }
  0x13   : > { %p312_p10 = scmp.lt.s32.totalorder %s4390_s9, 1  ;;  %s6842_s22 = smov 112   ;;  %v363_v6 = vlaneseq  ;;  %v4524_v9 = vld [vmem:[%s6813_s2] sm:$0xff]  ;;  %v4529_v10 = vld [vmem:[%s6813_s2 + $0x8] sm:$0xff]  ;;  %vm1103_vm9 = vcmask 130048  }
  0x14   : > { %s6840_s23 = smov 113   ;;  %s4308_s24 = smov 127   ;;  %v4537_v11 = vperm.slane %v4524_v9, 6  ;;  %v4540_v12 = vperm.slane %v4529_v10, 6  ;;  %v4570_v29 = vperm.slane %v4524_v9, 5  ;;  %v4573_v30 = vperm.slane %v4529_v10, 5 }
  0x15   : > { %s4419_s17 = scalar_select %p312_p10, %s4390_s9, 1  ;;  %v4519_v8 = vand.u32 127, %v363_v6  ;;  %v4597_v48 = vperm.slane %v4524_v9, 4  ;;  %v4600_v49 = vperm.slane %v4529_v10, 4 }
  0x16   : > { %s6845_s25 = smov 1   ;;  %s4310_s26 = smov 15  }
  0x17   : > { %s3998_s18 = sshll.u32 %s4419_s17, 5  ;;  %s4311_s10 = smov 16   ;;  %vm503_vm0 = vcmp.lt.s32.totalorder %v4519_v8, 112  ;;  %vm480_vm1 = vcmp.lt.s32.totalorder %v4519_v8, 113  ;;  %vm457_vm2 = vcmp.lt.s32.totalorder %v4519_v8, 127  ;;  %vm434_vm3 = vcmp.lt.s32.totalorder %v4519_v8, 1 }
  0x18   : > { %s316_s21 = scalar_lea.vmem %s6811_s0, %s3998_s18  ;;  %s6822_s12 = smov 94   ;;  %vm411_vm4 = vcmp.lt.s32.totalorder %v4519_v8, 15  ;;  %vm388_vm5 = vcmp.lt.s32.totalorder %v4519_v8, 16  ;;  %vm710_vm6 = vcmp.lt.s32.totalorder %v4519_v8, 94  ;;  %vm365_vm7 = vcmp.lt.s32.totalorder %v4519_v8, 17 }
  0x19   : > { %v4425_v0 = vld [vmem:[%s316_s21 + $0x8] sm:$0xff]  ;;  %v4427_v1 = vld [vmem:[%s316_s21] sm:$0xff]  ;;  %v4435_v2 = vld [vmem:[%s316_s21 + $0x18] sm:$0xff]  ;;  %s6824_s13 = smov 17   ;;  %s6820_s18 = smov 96   ;;  %vm6844_vm8 = vcmp.lt.s32.totalorder %v4519_v8, 96 }
  0x1a   : > { %499 = vrot.lane.b32.xlu1 %v4425_v0, %s6842_s22  ;;  %495 = vrot.lane.b32.xlu0 %v4427_v1, %s6842_s22  ;;  %v4437_v3 = vld [vmem:[%s316_s21 + $0x10] sm:$0xff]  ;;  %s6830_s19 = smov 98   ;;  %s6832_s20 = smov 126   ;;  %vm664_vm10 = vcmp.lt.s32.totalorder %v4519_v8, 98  ;;  %vm641_vm11 = vcmp.lt.s32.totalorder %v4519_v8, 126  ;;  %vm618_vm12 = vcmp.lt.s32.totalorder %v4519_v8, 2 }
  0x1b   : > { %472 = vrot.lane.b32.xlu2 %v4427_v1, %s6840_s23  ;;  %s6836_s21 = smov 34   ;;  %vm595_vm13 = vcmp.lt.s32.totalorder %v4519_v8, 30  ;;  %vm572_vm14 = vcmp.lt.s32.totalorder %v4519_v8, 32  ;;  %vm549_vm15 = vcmp.lt.s32.totalorder %v4519_v8, 34 }
  0x22   : > { %501 = vrot.lane.b32.xlu1 %v4435_v2, %s6842_s22  ;;  %497 = vrot.lane.b32.xlu0 %v4437_v3, %s6842_s22  ;;  %s6940_s22 = smov 34  }
  0x23   : > { %474 = vrot.lane.b32.xlu2 %v4437_v3, %s6840_s23 }
  0x2a   : > { %478 = vrot.lane.b32.xlu1 %v4435_v2, %s6840_s23  ;;  %476 = vrot.lane.b32.xlu0 %v4425_v0, %s6840_s23  ;;  %s3388_s23 = sshll.u32 %s4419_s17, 1  ;;  %s6935_s17 = smov 1  }
  0x2b   : > { %449 = vrot.lane.b32.xlu2 %v4427_v1, %s4308_s24 }
  0x32   : > { %453 = vrot.lane.b32.xlu1 %v4425_v0, %s4308_s24  ;;  %451 = vrot.lane.b32.xlu0 %v4437_v3, %s4308_s24 }
  0x33   : > { %455 = vrot.lane.b32.xlu2 %v4435_v2, %s4308_s24 }
  0x3a   : > { %428 = vrot.lane.b32.xlu1 %v4437_v3, %s6845_s25  ;;  %426 = vrot.lane.b32.xlu0 %v4427_v1, %s6845_s25 }
  0x3b   : > { %430 = vrot.lane.b32.xlu2 %v4425_v0, %s6845_s25 }
  0x42   : > { %403 = vrot.lane.b32.xlu1 %v4427_v1, %s4310_s26  ;;  %432 = vrot.lane.b32.xlu0 %v4435_v2, %s6845_s25  ;;  %s6936_s25 = smov 112  }
  0x43   : > { %405 = vrot.lane.b32.xlu2 %v4437_v3, %s4310_s26 }
  0x4a   : > { %409 = vrot.lane.b32.xlu1 %v4435_v2, %s4310_s26  ;;  %407 = vrot.lane.b32.xlu0 %v4425_v0, %s4310_s26 }
  0x4b   : > { %380 = vrot.lane.b32.xlu2 %v4427_v1, %s4311_s10 }
  0x52   : > { %384 = vrot.lane.b32.xlu1 %v4425_v0, %s4311_s10  ;;  %382 = vrot.lane.b32.xlu0 %v4437_v3, %s4311_s10 }
  0x53   : > { %386 = vrot.lane.b32.xlu2 %v4435_v2, %s4311_s10 }
  0x5a   : > { %704 = vrot.lane.b32.xlu1 %v4437_v3, %s6822_s12  ;;  %702 = vrot.lane.b32.xlu0 %v4427_v1, %s6822_s12 }
  0x5b   : > { %706 = vrot.lane.b32.xlu2 %v4425_v0, %s6822_s12 }
  0x62   : > { %355 = vrot.lane.b32.xlu1 %v4427_v1, %s6824_s13  ;;  %708 = vrot.lane.b32.xlu0 %v4435_v2, %s6822_s12  ;;  %s6826_s12 = smov 30  }
  0x63   : > { %357 = vrot.lane.b32.xlu2 %v4437_v3, %s6824_s13 }
  0x6a   : > { %361 = vrot.lane.b32.xlu1 %v4435_v2, %s6824_s13  ;;  %359 = vrot.lane.b32.xlu0 %v4425_v0, %s6824_s13  ;;  %s6834_s13 = smov 32  }
  0x6b   : > { %679 = vrot.lane.b32.xlu2 %v4427_v1, %s6820_s18 }
  0x72   : > { %683 = vrot.lane.b32.xlu1 %v4425_v0, %s6820_s18  ;;  %681 = vrot.lane.b32.xlu0 %v4437_v3, %s6820_s18 }
  0x73   : > { %685 = vrot.lane.b32.xlu2 %v4435_v2, %s6820_s18  ;;  %s6828_s18 = smov 2  }
  0x75   : > { %v473_v4 = vpop.permute.xlu2 %472 }
  0x7a   : > { %658 = vrot.lane.b32.xlu1 %v4437_v3, %s6830_s19  ;;  %656 = vrot.lane.b32.xlu0 %v4427_v1, %s6830_s19 }
  0x7b   : > { %660 = vrot.lane.b32.xlu2 %v4425_v0, %s6830_s19 }
  0x7d   : > { %v475_v5 = vpop.permute.xlu2 %474 }
  0x82   : > { %633 = vrot.lane.b32.xlu1 %v4427_v1, %s6832_s20  ;;  %662 = vrot.lane.b32.xlu0 %v4435_v2, %s6830_s19  ;;  %s320_s19 = scalar_lea.vmem %s6812_s1, %s3388_s23  ;;  %s6941_s23 = smov 32  }
  0x83   : > { %635 = vrot.lane.b32.xlu2 %v4437_v3, %s6832_s20 }
  0x85   : > { %v4517_v7 = vpop.permute.xlu2 %449 }
  0x8a   : > { %639 = vrot.lane.b32.xlu1 %v4435_v2, %s6832_s20  ;;  %637 = vrot.lane.b32.xlu0 %v4425_v0, %s6832_s20  ;;  %s6937_s20 = smov 113  }
  0x8b   : > { %610 = vrot.lane.b32.xlu2 %v4427_v1, %s6828_s18 }
  0x8c   : > { %v500_v13 = vpop.permute.xlu1 %499  ;;  %v496_v14 = vpop.permute.xlu0 %495 }
  0x8d   : > { %v504_v15 = vsel %vm503_vm0, %v496_v14, %v500_v13  ;;  %v506_v16 = vsel %vm503_vm0, %v500_v13, %v496_v14  ;;  %v456_v17 = vpop.permute.xlu2 %455 }
  0x8e   : > { %v510_v18 = vmul.f32 %v4537_v11, %v504_v15  ;;  %v511_v19 = vmul.f32 %v4540_v12, %v506_v16  ;;  %v4629_v15 = vperm.slane %v4529_v10, 3 }
  0x90   : > { %v514_v20 = vpack.c.bf16 %v511_v19, %v510_v18 }
  0x92   : > { %516 = vst [vmem:[#allocation2 + $0x70] sm:$0xff] %v514_v20  ;;  %614 = vrot.lane.b32.xlu1 %v4425_v0, %s6828_s18  ;;  %612 = vrot.lane.b32.xlu0 %v4437_v3, %s6828_s18 }
  0x93   : > { %616 = vrot.lane.b32.xlu2 %v4435_v2, %s6828_s18  ;;  %s6942_s18 = smov 126  }
  0x94   : > { %v502_v21 = vpop.permute.xlu1 %501  ;;  %v498_v22 = vpop.permute.xlu0 %497 }
  0x95   : > { %v505_v23 = vsel %vm503_vm0, %v498_v22, %v502_v21  ;;  %v507_v24 = vsel %vm503_vm0, %v502_v21, %v498_v22  ;;  %v4560_v25 = vpop.permute.xlu2 %430 }
  0x96   : > { %v512_v26 = vmul.f32 %v4537_v11, %v505_v23  ;;  %v513_v27 = vmul.f32 %v4540_v12, %v507_v24 }
  0x98   : > { %v515_v28 = vpack.c.bf16 %v513_v27, %v512_v26 }
  0x99   : > { %v3519_v44 = vld [vmem:[#allocation2 + $0x70] sm:$0xf]  ;;  %v4031_v46 = vld [vmem:[#allocation2 + $0x74] sm:$0xf] }
  0x9a   : > { %517 = vst [vmem:[#allocation2 + $0x78] sm:$0xff] %v515_v28  ;;  %589 = vrot.lane.b32.xlu1 %v4437_v3, %s6826_s12  ;;  %587 = vrot.lane.b32.xlu0 %v4427_v1, %s6826_s12 }
  0x9b   : > { %591 = vrot.lane.b32.xlu2 %v4425_v0, %s6826_s12 }
  0x9c   : > { %v479_v31 = vpop.permute.xlu1 %478  ;;  %v477_v32 = vpop.permute.xlu0 %476 }
  0x9d   : > { %v482_v33 = vsel %vm480_vm1, %v475_v5, %v479_v31  ;;  %v484_v34 = vsel %vm480_vm1, %v479_v31, %v475_v5  ;;  %v481_v35 = vsel %vm480_vm1, %v473_v4, %v477_v32  ;;  %v483_v36 = vsel %vm480_vm1, %v477_v32, %v473_v4  ;;  %v4585_v37 = vpop.permute.xlu2 %405 }
  0x9e   : > { %v489_v38 = vmul.f32 %v4570_v29, %v482_v33  ;;  %v490_v39 = vmul.f32 %v4573_v30, %v484_v34  ;;  %v487_v40 = vmul.f32 %v4570_v29, %v481_v35  ;;  %v488_v41 = vmul.f32 %v4573_v30, %v483_v36 }
  0xa0   : > { %v492_v42 = vpack.c.bf16 %v490_v39, %v489_v38  ;;  %v491_v43 = vpack.c.bf16 %v488_v41, %v487_v40 }
  0xa1   : > { %v4032_v45 = vld [vmem:[#allocation2 + $0x74] sm:$0xf0]  ;;  %v3521_v47 = vld [vmem:[#allocation2 + $0x78] sm:$0xf0] }
  0xa2   : > { %494 = vst [vmem:[#allocation2 + $0x68] sm:$0xff] %v492_v42  ;;  %564 = vrot.lane.b32.xlu1 %v4427_v1, %s6834_s13  ;;  %593 = vrot.lane.b32.xlu0 %v4435_v2, %s6826_s12  ;;  %v3520_v50 = vor.u32 %v4032_v45, %v3519_v44  ;;  %v3524_v51 = vor.u32 %v4031_v46, %v3521_v47  ;;  %s6838_s12 = smov 111   ;;  %v4664_v44 = vperm.slane %v4529_v10, 2 }
  0xa3   : > { %493 = vst [vmem:[#allocation2 + $0x60] sm:$0xff] %v491_v43  ;;  %566 = vrot.lane.b32.xlu2 %v4437_v3, %s6834_s13  ;;  %v4661_v43 = vperm.slane %v4524_v9, 2 }
  0xa4   : > { %v454_v52 = vpop.permute.xlu1 %453  ;;  %1122 = vmatpush.bf16.msra.mxu0 %v3520_v50  ;;  %1239 = vmatpush.bf16.msra.mxu3 %v3524_v51  ;;  %v452_v53 = vpop.permute.xlu0 %451 }
  0xa5   : > { %v458_v54 = vsel %vm457_vm2, %v4517_v7, %v454_v52  ;;  %v460_v55 = vsel %vm457_vm2, %v454_v52, %v4517_v7  ;;  %v459_v56 = vsel %vm457_vm2, %v452_v53, %v456_v17  ;;  %v461_v57 = vsel %vm457_vm2, %v456_v17, %v452_v53  ;;  %v4614_v58 = vpop.permute.xlu2 %380 }
  0xa6   : > { %v464_v59 = vmul.f32 %v4597_v48, %v458_v54  ;;  %v465_v60 = vmul.f32 %v4600_v49, %v460_v55  ;;  %v466_v61 = vmul.f32 %v4597_v48, %v459_v56  ;;  %v467_v62 = vmul.f32 %v4600_v49, %v461_v57 }
  0xa7   : > { %v4622_v7 = vperm.slane %v4524_v9, 3 }
  0xa8   : > { %v468_v63 = vpack.c.bf16 %v465_v60, %v464_v59  ;;  %v469_v4 = vpack.c.bf16 %v467_v62, %v466_v61 }
  0xa9   : > { %v4030_v5 = vld [vmem:[#allocation2 + $0x64] sm:$0xf0]  ;;  %v3513_v6 = vld [vmem:[#allocation2 + $0x68] sm:$0xf0] }
  0xaa   : > { %470 = vst [vmem:[#allocation2 + $0x50] sm:$0xff] %v468_v63  ;;  %570 = vrot.lane.b32.xlu1 %v4435_v2, %s6834_s13  ;;  %568 = vrot.lane.b32.xlu0 %v4425_v0, %s6834_s13  ;;  %v3511_v13 = vld [vmem:[#allocation2 + $0x60] sm:$0xf]  ;;  %v4029_v14 = vld [vmem:[#allocation2 + $0x64] sm:$0xf]  ;;  %s6943_s13 = smov 98  }
  0xab   : > { %471 = vst [vmem:[#allocation2 + $0x58] sm:$0xff] %v469_v4  ;;  %v3512_v16 = vor.u32 %v4030_v5, %v3511_v13  ;;  %v3516_v17 = vor.u32 %v4029_v14, %v3513_v6  ;;  %541 = vrot.lane.b32.xlu2 %v4427_v1, %s6836_s21  ;;  %v4690_v4 = vperm.slane %v4524_v9, 1  ;;  %v4693_v5 = vperm.slane %v4529_v10, 1 }
  0xac   : > { %v429_v18 = vpop.permute.xlu1 %428  ;;  %v427_v19 = vpop.permute.xlu0 %426 }
  0xad   : > { %1123 = vmatpush.bf16.msra.mxu0 %v3512_v16  ;;  %1240 = vmatpush.bf16.msra.mxu3 %v3516_v17  ;;  %v435_v20 = vsel %vm434_vm3, %v427_v19, %v4560_v25  ;;  %v437_v21 = vsel %vm434_vm3, %v4560_v25, %v427_v19  ;;  %v4639_v22 = vpop.permute.xlu2 %386 }
  0xae   : > { %v441_v23 = vmul.f32 %v4622_v7, %v437_v21  ;;  %v442_v24 = vmul.f32 %v4629_v15, %v435_v20 }
  0xb0   : > { %v445_v26 = vpack.c.bf16 %v442_v24, %v441_v23 }
  0xb1   : > { %v3503_v27 = vld [vmem:[#allocation2 + $0x50] sm:$0xf]  ;;  %v4027_v28 = vld [vmem:[#allocation2 + $0x54] sm:$0xf] }
  0xb2   : > { %447 = vst [vmem:[#allocation2 + $0x40] sm:$0xff] %v445_v26  ;;  %545 = vrot.lane.b32.xlu1 %v4425_v0, %s6836_s21  ;;  %543 = vrot.lane.b32.xlu0 %v4437_v3, %s6836_s21  ;;  %v4028_v31 = vld [vmem:[#allocation2 + $0x54] sm:$0xf0]  ;;  %v3505_v32 = vld [vmem:[#allocation2 + $0x58] sm:$0xf0] }
  0xb3   : > { %v3504_v33 = vor.u32 %v4028_v31, %v3503_v27  ;;  %v3508_v25 = vor.u32 %v4027_v28, %v3505_v32  ;;  %547 = vrot.lane.b32.xlu2 %v4435_v2, %s6836_s21  ;;  %v4721_v28 = vld [vmem:[%s6813_s2 + $0x18] sm:$0xff]  ;;  %s6939_s21 = smov 111  }
  0xb4   : > { %v404_v34 = vpop.permute.xlu1 %403  ;;  %v433_v35 = vpop.permute.xlu0 %432 }
  0xb5   : > { %1124 = vmatpush.bf16.msra.mxu0 %v3504_v33  ;;  %1241 = vmatpush.bf16.msra.mxu3 %v3508_v25  ;;  %v436_v36 = vsel %vm434_vm3, %v429_v18, %v433_v35  ;;  %v438_v38 = vsel %vm434_vm3, %v433_v35, %v429_v18  ;;  %v4653_v39 = vpop.permute.xlu2 %706  ;;  %v352_v33 = vpack.c.bf16 %v4435_v2, %v4437_v3 }
  0xb6   : > { %v443_v40 = vmul.f32 %v4622_v7, %v438_v38  ;;  %v444_v41 = vmul.f32 %v4629_v15, %v436_v36 }
  0xb7   : > { %354 = vst [vmem:[#allocation2 + $0x8] sm:$0xff] %v352_v33  ;;  %v4001_v33 = vld [vmem:[%s6814_s3 + $0x10] sm:$0xf0] }
  0xb8   : > { %v446_v42 = vpack.c.bf16 %v444_v41, %v443_v40  ;;  %v4732_v40 = vperm.slane %v4721_v28, 7 }
  0xb9   : > { %v4025_v62 = vld [vmem:[#allocation2 + $0x44] sm:$0xf] }
  0xba   : > { %448 = vst [vmem:[#allocation2 + $0x48] sm:$0xff] %v446_v42  ;;  %518 = vrot.lane.b32.xlu0 %v4427_v1, %s6838_s12  ;;  %520 = vrot.lane.b32.xlu1 %v4437_v3, %s6838_s12 }
  0xbb   : > { %522 = vrot.lane.b32.xlu2 %v4425_v0, %s6838_s12  ;;  %6910 = vst [vmem:[#allocation8_spill] sm:$0xff] %v4732_v40 }
  0xbc   : > { %v410_v45 = vpop.permute.xlu1 %409  ;;  %v408_v46 = vpop.permute.xlu0 %407 }
  0xbd   : > { %v413_v47 = vsel %vm411_vm4, %v4585_v37, %v410_v45  ;;  %v415_v50 = vsel %vm411_vm4, %v410_v45, %v4585_v37  ;;  %v412_v51 = vsel %vm411_vm4, %v404_v34, %v408_v46  ;;  %v414_v52 = vsel %vm411_vm4, %v408_v46, %v404_v34  ;;  %v4680_v53 = vpop.permute.xlu2 %357  ;;  %v3495_v37 = vld [vmem:[#allocation2 + $0x40] sm:$0xf] }
  0xbe   : > { %v420_v54 = vmul.f32 %v4661_v43, %v415_v50  ;;  %v421_v55 = vmul.f32 %v4664_v44, %v413_v47  ;;  %v418_v56 = vmul.f32 %v4661_v43, %v414_v52  ;;  %v419_v57 = vmul.f32 %v4664_v44, %v412_v51 }
  0xc0   : > { %v423_v59 = vpack.c.bf16 %v421_v55, %v420_v54  ;;  %v422_v60 = vpack.c.bf16 %v419_v57, %v418_v56 }
  0xc1   : > { %v4026_v61 = vld [vmem:[#allocation2 + $0x44] sm:$0xf0]  ;;  %v3497_v63 = vld [vmem:[#allocation2 + $0x48] sm:$0xf0] }
  0xc2   : > { %425 = vst [vmem:[#allocation2 + $0x38] sm:$0xff] %v423_v59  ;;  %524 = vrot.lane.b32.xlu0 %v4435_v2, %s6838_s12  ;;  %v3496_v6 = vor.u32 %v4026_v61, %v3495_v37  ;;  %v3500_v13 = vor.u32 %v4025_v62, %v3497_v63  ;;  %s6938_s12 = smov 17  }
  0xc3   : > { %424 = vst [vmem:[#allocation2 + $0x30] sm:$0xff] %v422_v60 }
  0xc4   : > { %v385_v14 = vpop.permute.xlu1 %384  ;;  %1125 = vmatpush.bf16.msra.mxu0 %v3496_v6  ;;  %1242 = vmatpush.bf16.msra.mxu3 %v3500_v13  ;;  %v383_v16 = vpop.permute.xlu0 %382  ;;  %v4752_v13 = vperm.slane %v4524_v9, 0 }
  0xc5   : > { %v389_v17 = vsel %vm388_vm5, %v4614_v58, %v385_v14  ;;  %v391_v18 = vsel %vm388_vm5, %v385_v14, %v4614_v58  ;;  %v390_v19 = vsel %vm388_vm5, %v383_v16, %v4639_v22  ;;  %v392_v20 = vsel %vm388_vm5, %v4639_v22, %v383_v16  ;;  %v4707_v21 = vpop.permute.xlu2 %679  ;;  %v4716_v58 = vld [vmem:[%s6813_s2 + $0x10] sm:$0xff] }
  0xc6   : > { %v395_v23 = vmul.f32 %v4690_v4, %v391_v18  ;;  %v396_v24 = vmul.f32 %v4693_v5, %v389_v17  ;;  %v397_v26 = vmul.f32 %v4690_v4, %v392_v20  ;;  %v398_v27 = vmul.f32 %v4693_v5, %v390_v19 }
  0xc7   : > { %v351_v22 = vpack.c.bf16 %v4425_v0, %v4427_v1  ;;  %v4729_v35 = vperm.slane %v4716_v58, 7  ;;  %v4755_v14 = vperm.slane %v4529_v10, 0 }
  0xc8   : > { %v399_v31 = vpack.c.bf16 %v396_v24, %v395_v23  ;;  %v400_v32 = vpack.c.bf16 %v398_v27, %v397_v26 }
  0xc9   : > { %v4024_v25 = vld [vmem:[#allocation2 + $0x34] sm:$0xf0]  ;;  %v3489_v34 = vld [vmem:[#allocation2 + $0x38] sm:$0xf0]  ;;  %6909 = vst [vmem:[#allocation7_spill] sm:$0xff] %v4729_v35 }
  0xca   : > { %353 = vst [vmem:[#allocation2] sm:$0xff] %v351_v22  ;;  %v3487_v36 = vld [vmem:[#allocation2 + $0x30] sm:$0xf]  ;;  %v4023_v38 = vld [vmem:[#allocation2 + $0x34] sm:$0xf] }
  0xcb   : > { %401 = vst [vmem:[#allocation2 + $0x20] sm:$0xff] %v399_v31  ;;  %v3488_v0 = vor.u32 %v4024_v25, %v3487_v36  ;;  %v3492_v1 = vor.u32 %v4023_v38, %v3489_v34  ;;  %v4779_v36 = vperm.slane %v4716_v58, 6  ;;  %v4782_v38 = vperm.slane %v4721_v28, 6 }
  0xcc   : > { %402 = vst [vmem:[#allocation2 + $0x28] sm:$0xff] %v400_v32  ;;  %v705_v41 = vpop.permute.xlu1 %704  ;;  %v703_v42 = vpop.permute.xlu0 %702 }
  0xcd   : > { %1126 = vmatpush.bf16.msra.mxu0 %v3488_v0  ;;  %1243 = vmatpush.bf16.msra.mxu3 %v3492_v1  ;;  %v711_v2 = vsel %vm710_vm6, %v703_v42, %v4653_v39  ;;  %v713_v3 = vsel %vm710_vm6, %v4653_v39, %v703_v42  ;;  %v686_v47 = vpop.permute.xlu2 %685  ;;  %6911 = vst [vmem:[#allocation9_spill] sm:$0xff] %v4779_v36 }
  0xce   : > { %v717_v45 = vmul.f32 %v4729_v35, %v711_v2  ;;  %v718_v46 = vmul.f32 %v4732_v40, %v713_v3  ;;  %6912 = vst [vmem:[#allocation10_spill] sm:$0xff] %v4782_v38 }
  0xd0   : > { %v721_v50 = vpack.c.bf16 %v718_v46, %v717_v45 }
  0xd2   : > { %v3479_v51 = vld [vmem:[#allocation2 + $0x20] sm:$0xf]  ;;  %v4021_v52 = vld [vmem:[#allocation2 + $0x24] sm:$0xf]  ;;  %723 = vst [vmem:[#allocation2 + $0x100] sm:$0xff] %v721_v50 }
  0xd3   : > { %v4022_v54 = vld [vmem:[#allocation2 + $0x24] sm:$0xf0]  ;;  %v3481_v55 = vld [vmem:[#allocation2 + $0x28] sm:$0xf0] }
  0xd4   : > { %v3480_v56 = vor.u32 %v4022_v54, %v3479_v51  ;;  %v3484_v57 = vor.u32 %v4021_v52, %v3481_v55  ;;  %v356_v59 = vpop.permute.xlu1 %355  ;;  %v709_v60 = vpop.permute.xlu0 %708 }
  0xd5   : > { %v712_v39 = vsel %vm710_vm6, %v705_v41, %v709_v60  ;;  %v714_v37 = vsel %vm710_vm6, %v709_v60, %v705_v41  ;;  %v4748_v6 = vpop.permute.xlu2 %660 }
  0xd6   : > { %1127 = vmatpush.bf16.msra.mxu0 %v3480_v56  ;;  %1244 = vmatpush.bf16.msra.mxu3 %v3484_v57  ;;  %v719_v61 = vmul.f32 %v4729_v35, %v712_v39  ;;  %v720_v62 = vmul.f32 %v4732_v40, %v714_v37  ;;  %v4018_v39 = vld [vmem:[#allocation2 + $0x4] sm:$0xf0] }
  0xd8   : > { %v722_v63 = vpack.c.bf16 %v720_v62, %v719_v61  ;;  %v4809_v62 = vperm.slane %v4721_v28, 5 }
  0xd9   : > { %v3591_v25 = vld [vmem:[#allocation2 + $0x100] sm:$0xf] }
  0xda   : > { %724 = vst [vmem:[#allocation2 + $0x108] sm:$0xff] %v722_v63 }
  0xdb   : > { %6914 = vst [vmem:[#allocation12_spill] sm:$0xff] %v4809_v62 }
  0xdc   : > { %v362_v16 = vpop.permute.xlu1 %361  ;;  %v360_v17 = vpop.permute.xlu0 %359 }
  0xdd   : > { %v367_v18 = vsel %vm365_vm7, %v4680_v53, %v362_v16  ;;  %v369_v19 = vsel %vm365_vm7, %v362_v16, %v4680_v53  ;;  %v366_v20 = vsel %vm365_vm7, %v356_v59, %v360_v17  ;;  %v368_v23 = vsel %vm365_vm7, %v360_v17, %v356_v59  ;;  %v3399_v53 = vld [vmem:[%s6814_s3 + $0x8] sm:$0xf]  ;;  %v4786_v41 = vpop.permute.xlu2 %635  ;;  %v3463_v59 = vld [vmem:[#allocation2] sm:$0xf] }
  0xde   : > { %v374_v24 = vmul.f32 %v4752_v13, %v369_v19  ;;  %v375_v26 = vmul.f32 %v4755_v14, %v367_v18  ;;  %v372_v27 = vmul.f32 %v4752_v13, %v368_v23  ;;  %v373_v22 = vmul.f32 %v4755_v14, %v366_v20 }
  0xdf   : > { %v4784_v1 = vor.u32 %v4001_v33, %v3399_v53  ;;  %v3464_v23 = vor.u32 %v4018_v39, %v3463_v59  ;;  %v4049_v53 = vld [vmem:[#allocation2 + $0x104] sm:$0xf] }
  0xe0   : > { %v377_v31 = vpack.c.bf16 %v375_v26, %v374_v24  ;;  %v376_v32 = vpack.c.bf16 %v373_v22, %v372_v27  ;;  %v3391_v26 = vld [vmem:[%s6814_s3] sm:$0xf]  ;;  %v4000_v27 = vld [vmem:[%s6814_s3 + $0x8] sm:$0xf0] }
  0xe1   : > { %v4050_v34 = vld [vmem:[#allocation2 + $0x104] sm:$0xf0]  ;;  %v3593_v24 = vld [vmem:[#allocation2 + $0x108] sm:$0xf0] }
  0xe2   : > { %379 = vst [vmem:[#allocation2 + $0x18] sm:$0xff] %v377_v31  ;;  %v3592_v0 = vor.u32 %v4050_v34, %v3591_v25  ;;  %v3596_v25 = vor.u32 %v4049_v53, %v3593_v24  ;;  %v3411_v34 = vld [vmem:[%s6814_s3 + $0x20] sm:$0xf] }
  0xe3   : > { %378 = vst [vmem:[#allocation2 + $0x10] sm:$0xff] %v376_v32 }
  0xe4   : > { %v684_v42 = vpop.permute.xlu1 %683  ;;  %1207 = vmatpush.bf16.msra.mxu2 %v3592_v0  ;;  %v682_v2 = vpop.permute.xlu0 %681  ;;  %v4004_v0 = vld [vmem:[%s6814_s3 + $0x28] sm:$0xf0] }
  0xe5   : > { %v688_v3 = vsel %vm6844_vm8, %v4707_v21, %v684_v42  ;;  %v690_v45 = vsel %vm6844_vm8, %v684_v42, %v4707_v21  ;;  %v689_v46 = vsel %vm6844_vm8, %v682_v2, %v686_v47  ;;  %v691_v50 = vsel %vm6844_vm8, %v686_v47, %v682_v2  ;;  %v4823_v22 = vpop.permute.xlu2 %610 }
  0xe6   : > { %v694_v51 = vmul.f32 %v4779_v36, %v688_v3  ;;  %v695_v52 = vmul.f32 %v4782_v38, %v690_v45  ;;  %v696_v54 = vmul.f32 %v4779_v36, %v689_v46  ;;  %v697_v55 = vmul.f32 %v4782_v38, %v691_v50 }
  0xe7   : > { %3597 = vmatmul.msk.bf16.vlgmr.msra.gmra.mxu2 %vm1103_vm9, %v4784_v1  ;;  %v4806_v21 = vperm.slane %v4716_v58, 5  ;;  %vm526_vm8 = vcmp.lt.s32.totalorder %v4519_v8, 111 }
  0xe8   : > { %v698_v56 = vpack.c.bf16 %v695_v52, %v694_v51  ;;  %v699_v57 = vpack.c.bf16 %v697_v55, %v696_v54  ;;  %v4833_v51 = vor.u32 %v4004_v0, %v3411_v34  ;;  %v4017_v52 = vld [vmem:[#allocation2 + $0x4] sm:$0xf]  ;;  %v3465_v54 = vld [vmem:[#allocation2 + $0x8] sm:$0xf0]  ;;  %v3423_v0 = vld [vmem:[%s6814_s3 + $0x38] sm:$0xf] }
  0xe9   : > { %6913 = vst [vmem:[#allocation11_spill] sm:$0xff] %v4806_v21  ;;  %v4020_v47 = vld [vmem:[#allocation2 + $0x14] sm:$0xf0]  ;;  %v3473_v60 = vld [vmem:[#allocation2 + $0x18] sm:$0xf0] }
  0xea   : > { %700 = vst [vmem:[#allocation2 + $0xf0] sm:$0xff] %v698_v56  ;;  %v3471_v37 = vld [vmem:[#allocation2 + $0x10] sm:$0xf]  ;;  %v4019_v61 = vld [vmem:[#allocation2 + $0x14] sm:$0xf] }
  0xeb   : > { %701 = vst [vmem:[#allocation2 + $0xf8] sm:$0xff] %v699_v57  ;;  %v3472_v63 = vor.u32 %v4020_v47, %v3471_v37  ;;  %v3476_v16 = vor.u32 %v4019_v61, %v3473_v60  ;;  %v3468_v57 = vor.u32 %v4017_v52, %v3465_v54  ;;  %v4881_v52 = vperm.slane %v4721_v28, 3 }
  0xec   : > { %v659_v17 = vpop.permute.xlu1 %658  ;;  %v657_v18 = vpop.permute.xlu0 %656 }
  0xed   : > { %1128 = vmatpush.bf16.msra.mxu0 %v3472_v63  ;;  %1245 = vmatpush.bf16.msra.mxu3 %v3476_v16  ;;  %v665_v19 = vsel %vm664_vm10, %v657_v18, %v4748_v6  ;;  %v667_v20 = vsel %vm664_vm10, %v4748_v6, %v657_v18  ;;  %v3392_v6 = vor.u32 %v4000_v27, %v3391_v26  ;;  %v617_v37 = vpop.permute.xlu2 %616  ;;  %v4845_v63 = vperm.slane %v4716_v58, 4  ;;  %v3403_v26 = vld [vmem:[%s6814_s3 + $0x18] sm:$0xf]  ;;  %v4003_v27 = vld [vmem:[%s6814_s3 + $0x20] sm:$0xf0] }
  0xee   : > { %v671_v31 = vmul.f32 %v4806_v21, %v665_v19  ;;  %v672_v32 = vmul.f32 %v4809_v62, %v667_v20  ;;  %v4848_v16 = vperm.slane %v4721_v28, 4  ;;  %6918 = vst [vmem:[#allocation16_spill] sm:$0xff] %v4881_v52 }
  0xef   : > { %6915 = vst [vmem:[#allocation13_spill] sm:$0xff] %v4845_v63 }
  0xf0   : > { %v675_v33 = vpack.c.bf16 %v672_v32, %v671_v31  ;;  %6916 = vst [vmem:[#allocation14_spill] sm:$0xff] %v4848_v16 }
  0xf1   : > { %1129 = vmatpush.bf16.msra.mxu0 %v3464_v23  ;;  %v3583_v42 = vld [vmem:[#allocation2 + $0xf0] sm:$0xf]  ;;  %v4047_v2 = vld [vmem:[#allocation2 + $0xf4] sm:$0xf]  ;;  %1246 = vmatpush.bf16.msra.mxu3 %v3468_v57 }
  0xf2   : > { %677 = vst [vmem:[#allocation2 + $0xe0] sm:$0xff] %v675_v33  ;;  %v4048_v3 = vld [vmem:[#allocation2 + $0xf4] sm:$0xf0]  ;;  %v3585_v45 = vld [vmem:[#allocation2 + $0xf8] sm:$0xf0] }
  0xf3   : > { %v3584_v46 = vor.u32 %v4048_v3, %v3583_v42  ;;  %v3588_v50 = vor.u32 %v4047_v2, %v3585_v45  ;;  %v4007_v42 = vld [vmem:[%s6814_s3 + $0x40] sm:$0xf0] }
  0xf4   : > { %1130 = vmatmul.bf16.vlgmr.msra.gmra.mxu0 %v3392_v6  ;;  %v634_v55 = vpop.permute.xlu1 %633  ;;  %v663_v56 = vpop.permute.xlu0 %662  ;;  %1247 = vmatmul.bf16.vlgmr.msra.gmra.mxu3 %v3392_v6  ;;  %v3404_v6 = vor.u32 %v4003_v27, %v3403_v26  ;;  %v4903_v27 = vperm.slane %v4716_v58, 2 }
  0xf5   : > { %1324 = vmatpush.bf16.msrb.mxu0 %v3596_v25  ;;  %1161 = vmatpush.bf16.msra.mxu1 %v3584_v46  ;;  %v666_v59 = vsel %vm664_vm10, %v659_v17, %v663_v56  ;;  %v668_v47 = vsel %vm664_vm10, %v663_v56, %v659_v17  ;;  %v592_v46 = vpop.permute.xlu2 %591  ;;  %v4883_v56 = vor.u32 %v4007_v42, %v3423_v0  ;;  %v3415_v42 = vld [vmem:[%s6814_s3 + $0x30] sm:$0xf] }
  0xf6   : > { %1278 = vmatpush.bf16.msrb.mxu2 %v3588_v50  ;;  %v673_v60 = vmul.f32 %v4806_v21, %v666_v59  ;;  %v674_v39 = vmul.f32 %v4809_v62, %v668_v47  ;;  %v4878_v50 = vperm.slane %v4716_v58, 3  ;;  %6919 = vst [vmem:[#allocation17_spill] sm:$0xff] %v4903_v27 }
  0xf7   : > { %3598 = vmatmul.msk.bf16.gmra.mxu2 %vm1103_vm9, %v4833_v51 }
  0xf8   : > { %v676_v61 = vpack.c.bf16 %v674_v39, %v673_v60  ;;  %6917 = vst [vmem:[#allocation15_spill] sm:$0xff] %v4878_v50 }
  0xf9   : > { %v3575_v34 = vld [vmem:[#allocation2 + $0xe0] sm:$0xf]  ;;  %v4045_v3 = vld [vmem:[#allocation2 + $0xe4] sm:$0xf] }
  0xfa   : > { %678 = vst [vmem:[#allocation2 + $0xe8] sm:$0xff] %v676_v61 }
  0xfc   : > { %v640_v17 = vpop.permute.xlu1 %639  ;;  %v638_v18 = vpop.permute.xlu0 %637 }
  0xfd   : > { %v643_v19 = vsel %vm641_vm11, %v4786_v41, %v640_v17  ;;  %v645_v20 = vsel %vm641_vm11, %v640_v17, %v4786_v41  ;;  %v642_v23 = vsel %vm641_vm11, %v634_v55, %v638_v18  ;;  %v644_v24 = vsel %vm641_vm11, %v638_v18, %v634_v55 }
  0xfe   : > { %v650_v31 = vmul.f32 %v4845_v63, %v643_v19  ;;  %v651_v32 = vmul.f32 %v4848_v16, %v645_v20  ;;  %v648_v41 = vmul.f32 %v4845_v63, %v642_v23  ;;  %v649_v53 = vmul.f32 %v4848_v16, %v644_v24 }
 0x100   : > { %v653_v33 = vpack.c.bf16 %v651_v32, %v650_v31  ;;  %v652_v25 = vpack.c.bf16 %v649_v53, %v648_v41  ;;  %v4906_v32 = vperm.slane %v4721_v28, 2 }
 0x101   : > { %v4046_v2 = vld [vmem:[#allocation2 + $0xe4] sm:$0xf0]  ;;  %v3577_v45 = vld [vmem:[#allocation2 + $0xe8] sm:$0xf0] }
 0x102   : > { %655 = vst [vmem:[#allocation2 + $0xd8] sm:$0xff] %v653_v33  ;;  %v3576_v54 = vor.u32 %v4046_v2, %v3575_v34  ;;  %v3580_v55 = vor.u32 %v4045_v3, %v3577_v45  ;;  %v567_v33 = vpop.permute.xlu2 %566  ;;  %v4006_v2 = vld [vmem:[%s6814_s3 + $0x38] sm:$0xf0] }
 0x103   : > { %654 = vst [vmem:[#allocation2 + $0xd0] sm:$0xff] %v652_v25 }
 0x104   : > { %1135 = vmatmul.bf16.gmra.mxu0 %v3404_v6  ;;  %v615_v57 = vpop.permute.xlu1 %614  ;;  %1162 = vmatpush.bf16.msra.mxu1 %v3576_v54  ;;  %v613_v59 = vpop.permute.xlu0 %612  ;;  %6920 = vst [vmem:[#allocation18_spill] sm:$0xff] %v4906_v32 }
 0x105   : > { %v619_v47 = vsel %vm618_vm12, %v4823_v22, %v615_v57  ;;  %v621_v60 = vsel %vm618_vm12, %v615_v57, %v4823_v22  ;;  %1279 = vmatpush.bf16.msrb.mxu2 %v3580_v55  ;;  %v620_v39 = vsel %vm618_vm12, %v613_v59, %v617_v37  ;;  %v622_v61 = vsel %vm618_vm12, %v617_v37, %v613_v59  ;;  %v3435_v57 = vld [vmem:[%s6814_s3 + $0x50] sm:$0xf] }
 0x106   : > { %v625_v17 = vmul.f32 %v4878_v50, %v621_v60  ;;  %v626_v18 = vmul.f32 %v4881_v52, %v619_v47  ;;  %v627_v19 = vmul.f32 %v4878_v50, %v622_v61  ;;  %v628_v20 = vmul.f32 %v4881_v52, %v620_v39  ;;  %1252 = vmatmul.bf16.gmra.mxu3 %v3404_v6 }
 0x107   : > { %3599 = vmatmul.msk.bf16.gmra.mxu2 %vm1103_vm9, %v4883_v56  ;;  %v3416_v55 = vor.u32 %v4006_v2, %v3415_v42 }
 0x108   : > { %v629_v23 = vpack.c.bf16 %v626_v18, %v625_v17  ;;  %v630_v22 = vpack.c.bf16 %v628_v20, %v627_v19 }
 0x109   : > { %v4044_v24 = vld [vmem:[#allocation2 + $0xd4] sm:$0xf0]  ;;  %v3569_v26 = vld [vmem:[#allocation2 + $0xd8] sm:$0xf0] }
 0x10a   : > { %631 = vst [vmem:[#allocation2 + $0xc0] sm:$0xff] %v629_v23  ;;  %v3567_v37 = vld [vmem:[#allocation2 + $0xd0] sm:$0xf]  ;;  %v4043_v31 = vld [vmem:[#allocation2 + $0xd4] sm:$0xf] }
 0x10b   : > { %632 = vst [vmem:[#allocation2 + $0xc8] sm:$0xff] %v630_v22  ;;  %v3568_v41 = vor.u32 %v4044_v24, %v3567_v37  ;;  %v3572_v53 = vor.u32 %v4043_v31, %v3569_v26  ;;  %v542_v37 = vpop.permute.xlu2 %541 }
 0x10c   : > { %v590_v25 = vpop.permute.xlu1 %589  ;;  %v588_v34 = vpop.permute.xlu0 %587 }
 0x10d   : > { %1163 = vmatpush.bf16.msra.mxu1 %v3568_v41  ;;  %1280 = vmatpush.bf16.msrb.mxu2 %v3572_v53  ;;  %v596_v0 = vsel %vm595_vm13, %v588_v34, %v592_v46  ;;  %v598_v6 = vsel %vm595_vm13, %v592_v46, %v588_v34  ;;  %v4010_v46 = vld [vmem:[%s6814_s3 + $0x58] sm:$0xf0]  ;;  %v4938_v41 = vperm.slane %v4716_v58, 1  ;;  %v4941_v53 = vperm.slane %v4721_v28, 1 }
 0x10e   : > { %v602_v3 = vmul.f32 %v4903_v27, %v598_v6  ;;  %v603_v45 = vmul.f32 %v4906_v32, %v596_v0  ;;  %v4926_v18 = vor.u32 %v4010_v46, %v3435_v57 }
 0x10f   : > { %6921 = vst [vmem:[#allocation19_spill] sm:$0xff] %v4938_v41 }
 0x110   : > { %v606_v54 = vpack.c.bf16 %v603_v45, %v602_v3  ;;  %6922 = vst [vmem:[#allocation20_spill] sm:$0xff] %v4941_v53  ;;  %v3427_v3 = vld [vmem:[%s6814_s3 + $0x48] sm:$0xf]  ;;  %v4009_v45 = vld [vmem:[%s6814_s3 + $0x50] sm:$0xf0] }
 0x111   : > { %v3559_v59 = vld [vmem:[#allocation2 + $0xc0] sm:$0xf]  ;;  %v4041_v47 = vld [vmem:[#allocation2 + $0xc4] sm:$0xf] }
 0x112   : > { %608 = vst [vmem:[#allocation2 + $0xb0] sm:$0xff] %v606_v54  ;;  %v4042_v60 = vld [vmem:[#allocation2 + $0xc4] sm:$0xf0]  ;;  %v3561_v39 = vld [vmem:[#allocation2 + $0xc8] sm:$0xf0] }
 0x113   : > { %v3560_v61 = vor.u32 %v4042_v60, %v3559_v59  ;;  %v3564_v17 = vor.u32 %v4041_v47, %v3561_v39  ;;  %v3428_v47 = vor.u32 %v4009_v45, %v3427_v3  ;;  %v548_v60 = vpop.permute.xlu2 %547 }
 0x114   : > { %1140 = vmatmul.bf16.gmra.mxu0 %v3416_v55  ;;  %v565_v19 = vpop.permute.xlu1 %564  ;;  %v594_v20 = vpop.permute.xlu0 %593 }
 0x115   : > { %1164 = vmatpush.bf16.msra.mxu1 %v3560_v61  ;;  %1281 = vmatpush.bf16.msrb.mxu2 %v3564_v17  ;;  %v597_v23 = vsel %vm595_vm13, %v590_v25, %v594_v20  ;;  %v599_v22 = vsel %vm595_vm13, %v594_v20, %v590_v25  ;;  %v3447_v61 = vld [vmem:[%s6814_s3 + $0x68] sm:$0xf]  ;;  %v4013_v17 = vld [vmem:[%s6814_s3 + $0x70] sm:$0xf0] }
 0x116   : > { %v604_v24 = vmul.f32 %v4903_v27, %v599_v22  ;;  %v605_v26 = vmul.f32 %v4906_v32, %v597_v23  ;;  %1257 = vmatmul.bf16.gmra.mxu3 %v3416_v55  ;;  %v4969_v22 = vperm.slane %v4716_v58, 0 }
 0x117   : > { %3600 = vmatmul.msk.bf16.gmra.mxu2 %vm1103_vm9, %v4926_v18 }
 0x118   : > { %v607_v31 = vpack.c.bf16 %v605_v26, %v604_v24  ;;  %6923 = vst [vmem:[#allocation21_spill] sm:$0xff] %v4969_v22  ;;  %v4972_v24 = vperm.slane %v4721_v28, 0 }
 0x119   : > { %v3551_v39 = vld [vmem:[#allocation2 + $0xb0] sm:$0xf]  ;;  %v4039_v20 = vld [vmem:[#allocation2 + $0xb4] sm:$0xf] }
 0x11a   : > { %609 = vst [vmem:[#allocation2 + $0xb8] sm:$0xff] %v607_v31 }
 0x11b   : > { %6924 = vst [vmem:[#allocation22_spill] sm:$0xff] %v4972_v24 }
 0x11c   : > { %v571_v25 = vpop.permute.xlu1 %570  ;;  %v569_v34 = vpop.permute.xlu0 %568 }
 0x11d   : > { %v574_v0 = vsel %vm572_vm14, %v567_v33, %v571_v25  ;;  %v576_v6 = vsel %vm572_vm14, %v571_v25, %v567_v33  ;;  %v573_v42 = vsel %vm572_vm14, %v565_v19, %v569_v34  ;;  %v575_v2 = vsel %vm572_vm14, %v569_v34, %v565_v19 }
 0x11e   : > { %v581_v54 = vmul.f32 %v4938_v41, %v576_v6  ;;  %v582_v55 = vmul.f32 %v4941_v53, %v574_v0  ;;  %v579_v33 = vmul.f32 %v4938_v41, %v575_v2  ;;  %v580_v57 = vmul.f32 %v4941_v53, %v573_v42 }
 0x11f   : > { %v4974_v25 = vor.u32 %v4013_v17, %v3447_v61  ;;  %v523_v61 = vpop.permute.xlu2 %522 }
 0x120   : > { %v584_v46 = vpack.c.bf16 %v582_v55, %v581_v54  ;;  %v583_v59 = vpack.c.bf16 %v580_v57, %v579_v33  ;;  %v4322_v33 = vmov 0   ;;  %v333_v57 = vld [vmem:[%s6816_s5 + $0x10] sm:$0xff] }
 0x121   : > { %v4040_v19 = vld [vmem:[#allocation2 + $0xb4] sm:$0xf0]  ;;  %v3553_v23 = vld [vmem:[#allocation2 + $0xb8] sm:$0xf0]  ;;  %4207 = vset.pattern.permute.xlu0 %v4322_v33  ;;  %4205 = vset.pattern.permute.xlu1 %v4322_v33 }
 0x122   : > { %586 = vst [vmem:[#allocation2 + $0xa8] sm:$0xff] %v584_v46  ;;  %v3552_v26 = vor.u32 %v4040_v19, %v3551_v39  ;;  %v3556_v31 = vor.u32 %v4039_v20, %v3553_v23  ;;  %v331_v46 = vld [vmem:[%s6816_s5] sm:$0xff]  ;;  %v4998_v39 = vperm.slane %v4524_v9, 7  ;;  %795 = vperm.xlu1 %4205, %v333_v57   ;;  %v5001_v20 = vperm.slane %v4529_v10, 7  ;;  %4206 = vset.pattern.permute.xlu2 %v4322_v33  ;;  %v4012_v10 = vld [vmem:[%s6814_s3 + $0x68] sm:$0xf0] }
 0x123   : > { %585 = vst [vmem:[#allocation2 + $0xa0] sm:$0xff] %v583_v59  ;;  %785 = vperm.xlu0 %4207, %v331_v46  }
 0x124   : > { %1145 = vmatmul.bf16.gmra.mxu0 %v3428_v47  ;;  %v546_v34 = vpop.permute.xlu1 %545  ;;  %1165 = vmatpush.bf16.msra.mxu1 %v3552_v26  ;;  %v544_v0 = vpop.permute.xlu0 %543 }
 0x125   : > { %v550_v6 = vsel %vm549_vm15, %v542_v37, %v546_v34  ;;  %v552_v42 = vsel %vm549_vm15, %v546_v34, %v542_v37  ;;  %1282 = vmatpush.bf16.msrb.mxu2 %v3556_v31  ;;  %v551_v58 = vsel %vm549_vm15, %v544_v0, %v548_v60  ;;  %v553_v28 = vsel %vm549_vm15, %v548_v60, %v544_v0  ;;  %v3439_v34 = vld [vmem:[%s6814_s3 + $0x60] sm:$0xf] }
 0x126   : > { %v556_v2 = vmul.f32 %v4969_v22, %v552_v42  ;;  %v557_v3 = vmul.f32 %v4972_v24, %v550_v6  ;;  %v558_v45 = vmul.f32 %v4969_v22, %v553_v28  ;;  %v559_v54 = vmul.f32 %v4972_v24, %v551_v58  ;;  %1262 = vmatmul.bf16.gmra.mxu3 %v3428_v47  ;;  %v332_v42 = vld [vmem:[%s6816_s5 + $0x8] sm:$0xff] }
 0x127   : > { %3601 = vmatmul.msk.bf16.gmra.mxu2 %vm1103_vm9, %v4974_v25  ;;  %v336_v58 = vld [vmem:[%s6816_s5 + $0x28] sm:$0xff] }
 0x128   : > { %v560_v55 = vpack.c.bf16 %v557_v3, %v556_v2  ;;  %v561_v37 = vpack.c.bf16 %v559_v54, %v558_v45  ;;  %v3440_v2 = vor.u32 %v4012_v10, %v3439_v34  ;;  %v3459_v3 = vld [vmem:[%s6814_s3 + $0x80] sm:$0xf]  ;;  %v4016_v45 = vld [vmem:[%s6814_s3 + $0x88] sm:$0xf0]  ;;  %v4015_v34 = vld [vmem:[%s6814_s3 + $0x80] sm:$0xf0] }
 0x129   : > { %v4038_v59 = vld [vmem:[#allocation2 + $0xa4] sm:$0xf0]  ;;  %v3545_v60 = vld [vmem:[#allocation2 + $0xa8] sm:$0xf0] }
 0x12a   : > { %562 = vst [vmem:[#allocation2 + $0x90] sm:$0xff] %v560_v55  ;;  %v3543_v17 = vld [vmem:[#allocation2 + $0xa0] sm:$0xf]  ;;  %v4037_v19 = vld [vmem:[#allocation2 + $0xa4] sm:$0xf]  ;;  %790 = vperm.xlu1 %4205, %v332_v42  }
 0x12b   : > { %563 = vst [vmem:[#allocation2 + $0x98] sm:$0xff] %v561_v37  ;;  %v3544_v23 = vor.u32 %v4038_v59, %v3543_v17  ;;  %v3548_v26 = vor.u32 %v4037_v19, %v3545_v60  ;;  %810 = vperm.xlu0 %4207, %v336_v58   ;;  %v5027_v60 = vor.u32 %v4016_v45, %v3459_v3  ;;  %v3393_v42 = vld [vmem:[%s6814_s3 + $0xc] sm:$0xf0] }
 0x12c   : > { %v519_v31 = vpop.permute.xlu0 %518  ;;  %v521_v37 = vpop.permute.xlu1 %520 }
 0x12d   : > { %1166 = vmatpush.bf16.msra.mxu1 %v3544_v23  ;;  %1283 = vmatpush.bf16.msrb.mxu2 %v3548_v26  ;;  %v527_v9 = vsel %vm526_vm8, %v519_v31, %v523_v61  ;;  %v529_v47 = vsel %vm526_vm8, %v523_v61, %v519_v31 }
 0x12e   : > { %v533_v0 = vmul.f32 %v4998_v39, %v527_v9  ;;  %v534_v6 = vmul.f32 %v5001_v20, %v529_v47  ;;  %v337_v9 = vld [vmem:[%s6816_s5 + $0x30] sm:$0xff]  ;;  %v3451_v47 = vld [vmem:[%s6814_s3 + $0x78] sm:$0xf] }
 0x12f   : > { %v3452_v10 = vor.u32 %v4015_v34, %v3451_v47 }
 0x130   : > { %v537_v28 = vpack.c.bf16 %v534_v6, %v533_v0  ;;  %v3999_v6 = vld [vmem:[%s6814_s3 + $0x4] sm:$0xf] }
 0x131   : > { %v3535_v54 = vld [vmem:[#allocation2 + $0x90] sm:$0xf]  ;;  %v4035_v55 = vld [vmem:[#allocation2 + $0x94] sm:$0xf] }
 0x132   : > { %539 = vst [vmem:[#allocation2 + $0x80] sm:$0xff] %v537_v28  ;;  %v4036_v33 = vld [vmem:[#allocation2 + $0x94] sm:$0xf0]  ;;  %v3537_v57 = vld [vmem:[#allocation2 + $0x98] sm:$0xf0]  ;;  %815 = vperm.xlu1 %4205, %v337_v9  }
 0x133   : > { %v3536_v46 = vor.u32 %v4036_v33, %v3535_v54  ;;  %v3540_v59 = vor.u32 %v4035_v55, %v3537_v57  ;;  %v3396_v54 = vor.u32 %v3999_v6, %v3393_v42  ;;  %v4002_v55 = vld [vmem:[%s6814_s3 + $0x1c] sm:$0xf]  ;;  %v4005_v57 = vld [vmem:[%s6814_s3 + $0x34] sm:$0xf] }
 0x134   : > { %1150 = vmatmul.bf16.gmra.mxu0 %v3440_v2  ;;  %v525_v61 = vpop.permute.xlu0 %524 }
 0x135   : > { %1167 = vmatpush.bf16.msra.mxu1 %v3536_v46  ;;  %1284 = vmatpush.bf16.msrb.mxu2 %v3540_v59  ;;  %v528_v17 = vsel %vm526_vm8, %v521_v37, %v525_v61  ;;  %v530_v19 = vsel %vm526_vm8, %v525_v61, %v521_v37  ;;  %v3405_v37 = vld [vmem:[%s6814_s3 + $0x24] sm:$0xf0]  ;;  %v3417_v46 = vld [vmem:[%s6814_s3 + $0x3c] sm:$0xf0]  ;;  %v334_v61 = vld [vmem:[%s6816_s5 + $0x18] sm:$0xff] }
 0x136   : > { %v535_v23 = vmul.f32 %v4998_v39, %v528_v17  ;;  %v536_v26 = vmul.f32 %v5001_v20, %v530_v19  ;;  %1267 = vmatmul.bf16.gmra.mxu3 %v3440_v2  ;;  %v3408_v33 = vor.u32 %v4002_v55, %v3405_v37  ;;  %v3420_v59 = vor.u32 %v4005_v57, %v3417_v46  ;;  %v338_v17 = vld [vmem:[%s6816_s5 + $0x38] sm:$0xff]  ;;  %v4008_v19 = vld [vmem:[%s6814_s3 + $0x4c] sm:$0xf] }
 0x137   : > { %3602 = vmatmul.msk.bf16.gmra.mxu2 %vm1103_vm9, %v5027_v60  ;;  %800 = vperm.xlu2 %4206, %v334_v61  }
 0x138   : > { %v538_v31 = vpack.c.bf16 %v536_v26, %v535_v23 }
 0x139   : > { %v3527_v0 = vld [vmem:[#allocation2 + $0x80] sm:$0xf]  ;;  %v4033_v28 = vld [vmem:[#allocation2 + $0x84] sm:$0xf] }
 0x13a   : > { %540 = vst [vmem:[#allocation2 + $0x88] sm:$0xff] %v538_v31  ;;  %v335_v31 = vld [vmem:[%s6816_s5 + $0x20] sm:$0xff] }
 0x13f   : > { %820 = vperm.xlu2 %4206, %v338_v17   ;;  %v326_v17 = vld [vmem:[%s320_s19] sm:$0x3]  ;;  %s6944_s19 = smov 2  }
 0x141   : > { %v4034_v58 = vld [vmem:[#allocation2 + $0x84] sm:$0xf0]  ;;  %v3529_v2 = vld [vmem:[#allocation2 + $0x88] sm:$0xf0] }
 0x142   : > { %v3528_v3 = vor.u32 %v4034_v58, %v3527_v0  ;;  %v3532_v45 = vor.u32 %v4033_v28, %v3529_v2 }
 0x144   : > { %1155 = vmatmul.bf16.gmra.mxu0 %v3452_v10  ;;  %1168 = vmatpush.bf16.msra.mxu1 %v3528_v3 }
 0x145   : > { %1285 = vmatpush.bf16.msrb.mxu2 %v3532_v45 }
 0x146   : > { %1272 = vmatmul.bf16.gmra.mxu3 %v3452_v10 }
 0x147   : > { %1169 = vmatmul.bf16.vlgmr.msra.gmra.mxu1 %v3396_v54  ;;  %805 = vperm.xlu2 %4206, %v335_v31   ;;  %v5131_v31 = vperm.slane %v326_v17, 0 }
 0x148   : > { %1286 = vmatmul.bf16.vlgmr.msrb.gmra.mxu2 %v3396_v54 }
 0x149   : > { %6932 = vst [vmem:[#allocation30_spill] sm:$0xff] %v5131_v31 }
 0x154   : > { %3603 = vmatmul.msk.bf16.vlgmr.msrb.gmra.mxu0 %vm1103_vm9, %v4784_v1 }
 0x157   : > { %1174 = vmatmul.bf16.gmra.mxu1 %v3408_v33 }
 0x158   : > { %1291 = vmatmul.bf16.gmra.mxu2 %v3408_v33 }
 0x164   : > { %3604 = vmatmul.msk.bf16.gmra.mxu0 %vm1103_vm9, %v4833_v51  ;;  %v3429_v51 = vld [vmem:[%s6814_s3 + $0x54] sm:$0xf0] }
 0x165   : > { %v3432_v9 = vor.u32 %v4008_v19, %v3429_v51 }
 0x167   : > { %1179 = vmatmul.bf16.gmra.mxu1 %v3420_v59 }
 0x168   : > { %1296 = vmatmul.bf16.gmra.mxu2 %v3420_v59 }
 0x16a   : > { %v1209_v1 = vpop.f32.mrf.mxu2 }
 0x171   : > { %v1131_v23 = vpop.f32.mrf.mxu0 }
 0x172   : > { %v1211_v26 = vpop.f32.mrf.mxu2 }
 0x174   : > { %3605 = vmatmul.msk.bf16.gmra.mxu0 %vm1103_vm9, %v4883_v56 }
 0x177   : > { %1184 = vmatmul.bf16.gmra.mxu1 %v3432_v9  ;;  %v1248_v46 = vpop.f32.mrf.mxu3 }
 0x178   : > { %1301 = vmatmul.bf16.gmra.mxu2 %v3432_v9 }
 0x179   : > { %v1133_v47 = vpop.f32.mrf.mxu0 }
 0x17a   : > { %v5085_v34 = vpop.f32.mrf.mxu2 }
 0x181   : > { %v1136_v10 = vpop.f32.mrf.mxu0 }
 0x182   : > { %v5087_v0 = vpop.f32.mrf.mxu2 }
 0x184   : > { %3606 = vmatmul.msk.bf16.gmra.mxu0 %vm1103_vm9, %v4926_v18 }
 0x189   : > { %v5091_v6 = vpop.f32.mrf.mxu0 }
 0x18a   : > { %v5093_v42 = vpop.f32.mrf.mxu2 }
 0x191   : > { %v5095_v58 = vpop.f32.mrf.mxu0 }
 0x192   : > { %v5097_v56 = vpop.f32.mrf.mxu2 }
 0x194   : > { %3607 = vmatmul.msk.bf16.gmra.mxu0 %vm1103_vm9, %v4974_v25  ;;  %v796_v57 = vpop.permute.xlu1 %795 }
 0x195   : > { %v1137_v35 = vadd.f32 %v1136_v10, %v796_v57 }
 0x199   : > { %v5101_v28 = vpop.f32.mrf.mxu0 }
 0x19a   : > { %v5103_v2 = vpop.f32.mrf.mxu2 }
 0x1a1   : > { %v5105_v3 = vpop.f32.mrf.mxu0 }
 0x1a2   : > { %v5107_v45 = vpop.f32.mrf.mxu2 }
 0x1a4   : > { %3608 = vmatmul.msk.bf16.gmra.mxu0 %vm1103_vm9, %v5027_v60  ;;  %v786_v60 = vpop.permute.xlu0 %785  ;;  %vm2964_vm9 = vcmask 1040384  }
 0x1a5   : > { %v1132_v61 = vadd.f32 %v1131_v23, %v786_v60 }
 0x1a9   : > { %v5111_v18 = vpop.f32.mrf.mxu0 }
 0x1aa   : > { %v5113_v54 = vpop.f32.mrf.mxu2 }
 0x1ab   : > { %6925 = vst [vmem:[#allocation23_spill] sm:$0xff] %v5113_v54 }
 0x1b1   : > { %v5115_v55 = vpop.f32.mrf.mxu0 }
 0x1b2   : > { %6926 = vst [vmem:[#allocation24_spill] sm:$0xff] %v5115_v55  ;;  %v5117_v37 = vpop.f32.mrf.mxu2 }
 0x1b3   : > { %6927 = vst [vmem:[#allocation25_spill] sm:$0xff] %v5117_v37 }
 0x1b9   : > { %v5119_v25 = vpop.f32.mrf.mxu0 }
 0x1ba   : > { %6928 = vst [vmem:[#allocation26_spill] sm:$0xff] %v5119_v25  ;;  %v5121_v33 = vpop.f32.mrf.mxu2  ;;  %v1250_v25 = vpop.f32.mrf.mxu3 }
 0x1bb   : > { %6929 = vst [vmem:[#allocation27_spill] sm:$0xff] %v5121_v33  ;;  %v791_v33 = vpop.permute.xlu1 %790 }
 0x1bc   : > { %v1134_v38 = vadd.f32 %v1133_v47, %v791_v33 }
 0x1c1   : > { %v5127_v59 = vpop.f32.mrf.mxu0 }
 0x1c2   : > { %6930 = vst [vmem:[#allocation28_spill] sm:$0xff] %v5127_v59  ;;  %v5129_v19 = vpop.f32.mrf.mxu2 }
 0x1c3   : > { %6931 = vst [vmem:[#allocation29_spill] sm:$0xff] %v5129_v19 }
 0x1c4   : > { %v1170_v51 = vpop.f32.mrf.mxu1 }
 0x1c5   : > { %v1171_v9 = vadd.f32 %v1170_v51, %v1132_v61  ;;  %v801_v61 = vpop.permute.xlu2 %800  ;;  %v5144_v51 = vperm.slane %v326_v17, 1 }
 0x1c7   : > { %v1210_v37 = vadd.f32 %v1209_v1, %v1171_v9  ;;  %v1249_v1 = vadd.f32 %v1248_v46, %v786_v60  ;;  %6934 = vst [vmem:[#allocation32_spill] sm:$0xff] %v5144_v51 }
 0x1c9   : > { %v1361_v54 = vmul.f32 %v5131_v31, %v1210_v37  ;;  %v5134_v55 = vpop.f32.mrf.mxu0 }
 0x1ca   : > { %6933 = vst [vmem:[#allocation31_spill] sm:$0xff] %v5134_v55 }
 0x1cb   : > { %v5136_v36 = vmax.f32 %v1361_v54, 0.0  ;;  %v1287_v32 = vpop.f32.mrf.mxu2 }
 0x1cc   : > { %v1172_v59 = vpop.f32.mrf.mxu1  ;;  %v1288_v47 = vadd.f32 %v1287_v32, %v1249_v1 }
 0x1cd   : > { %v1173_v23 = vadd.f32 %v1172_v59, %v1134_v38  ;;  %1561 = vrot.lane.b32.xlu0 %v5136_v36, %s4308_s24  ;;  %1441 = vrot.lane.b32.xlu2 %v5136_v36, %s4311_s10  ;;  %v1253_v38 = vpop.f32.mrf.mxu3  ;;  %v5158_v60 = vpop.permute.xlu2 %820 }
 0x1ce   : > { %1481 = vrot.lane.b32.xlu1 %v5136_v36, %s4310_s26 }
 0x1cf   : > { %v1212_v37 = vadd.f32 %v1211_v26, %v1173_v23  ;;  %v1251_v26 = vadd.f32 %v1250_v25, %v791_v33 }
 0x1d1   : > { %v1363_v54 = vmul.f32 %v5131_v31, %v1212_v37  ;;  %v1326_v9 = vpop.f32.mrf.mxu0 }
 0x1d2   : > { %v1327_v19 = vadd.f32 %v1326_v9, %v1288_v47 }
 0x1d3   : > { %v5147_v59 = vmax.f32 %v1363_v54, 0.0  ;;  %v1289_v55 = vpop.f32.mrf.mxu2 }
 0x1d4   : > { %v1362_v27 = vmul.f32 %v5144_v51, %v1327_v19  ;;  %v1175_v40 = vpop.f32.mrf.mxu1  ;;  %v1290_v17 = vadd.f32 %v1289_v55, %v1251_v26  ;;  %v1139_v55 = vadd.f32 %v5091_v6, %v801_v61 }
 0x1d5   : > { %1443 = vrot.lane.b32.xlu0 %v5147_v59, %s4311_s10  ;;  %1521 = vrot.lane.b32.xlu2 %v5136_v36, %s6935_s17  ;;  %v1176_v46 = vadd.f32 %v1175_v40, %v1137_v35  ;;  %v1255_v33 = vpop.f32.mrf.mxu3  ;;  %v1254_v40 = vadd.f32 %v1253_v38, %v796_v57  ;;  %v806_v26 = vpop.permute.xlu2 %805 }
 0x1d6   : > { %v5154_v32 = vmax.f32 %v1362_v27, 0.0  ;;  %1641 = vrot.lane.b32.xlu1 %v5136_v36, %s6936_s25  ;;  %v1142_v6 = vadd.f32 %v5095_v58, %v806_v26 }
 0x1d7   : > { %v1215_v1 = vadd.f32 %v5085_v34, %v1176_v46 }
 0x1d8   : > { %v1393_v19 = vpack.c.bf16 %v5154_v32, %v5136_v36 }
 0x1d9   : > { %v1328_v10 = vpop.f32.mrf.mxu0  ;;  %v1365_v34 = vmul.f32 %v5131_v31, %v1215_v1 }
 0x1da   : > { %v1329_v23 = vadd.f32 %v1328_v10, %v1290_v17  ;;  %1397 = vst [vmem:[#allocation3] sm:$0xff] %v1393_v19  ;;  %v1256_v19 = vadd.f32 %v1255_v33, %v801_v61 }
 0x1db   : > { %v1292_v37 = vpop.f32.mrf.mxu2  ;;  %v5176_v10 = vmax.f32 %v1365_v34, 0.0 }
 0x1dc   : > { %v1364_v25 = vmul.f32 %v5144_v51, %v1329_v23  ;;  %v1177_v27 = vpop.f32.mrf.mxu1  ;;  %v1293_v47 = vadd.f32 %v1292_v37, %v1254_v40 }
 0x1dd   : > { %1523 = vrot.lane.b32.xlu0 %v5147_v59, %s6935_s17  ;;  %1483 = vrot.lane.b32.xlu2 %v5147_v59, %s4310_s26  ;;  %v1178_v17 = vadd.f32 %v1177_v27, %v1139_v55 }
 0x1de   : > { %v5168_v35 = vmax.f32 %v1364_v25, 0.0  ;;  %1601 = vrot.lane.b32.xlu1 %v5136_v36, %s6937_s20  ;;  %v1258_v25 = vpop.f32.mrf.mxu3 }
 0x1df   : > { %v1217_v37 = vadd.f32 %v5087_v0, %v1178_v17  ;;  %v1259_v34 = vadd.f32 %v1258_v25, %v806_v26 }
 0x1e0   : > { %v1394_v54 = vpack.c.bf16 %v5168_v35, %v5147_v59 }
 0x1e1   : > { %v1331_v9 = vpop.f32.mrf.mxu0  ;;  %v1367_v40 = vmul.f32 %v5131_v31, %v1217_v37 }
 0x1e2   : > { %v1332_v46 = vadd.f32 %v1331_v9, %v1293_v47  ;;  %1398 = vst [vmem:[#allocation3 + $0x8] sm:$0xff] %v1394_v54 }
 0x1e3   : > { %v1294_v57 = vpop.f32.mrf.mxu2  ;;  %v5198_v17 = vmax.f32 %v1367_v40, 0.0 }
 0x1e4   : > { %v1366_v38 = vmul.f32 %v5144_v51, %v1332_v46  ;;  %v1180_v23 = vpop.f32.mrf.mxu1  ;;  %v1295_v61 = vadd.f32 %v1294_v57, %v1256_v19  ;;  %v811_v46 = vpop.permute.xlu0 %810 }
 0x1e5   : > { %1445 = vrot.lane.b32.xlu0 %v5176_v10, %s4311_s10  ;;  %1643 = vrot.lane.b32.xlu2 %v5147_v59, %s6936_s25  ;;  %v1181_v27 = vadd.f32 %v1180_v23, %v1142_v6  ;;  %v1144_v57 = vadd.f32 %v5101_v28, %v811_v46 }
 0x1e6   : > { %v5184_v1 = vmax.f32 %v1366_v38, 0.0  ;;  %1401 = vrot.lane.b32.xlu1 %v5136_v36, %s6938_s12  ;;  %v1260_v23 = vpop.f32.mrf.mxu3 }
 0x1e7   : > { %v1220_v0 = vadd.f32 %v5093_v42, %v1181_v27  ;;  %v1261_v28 = vadd.f32 %v1260_v23, %v811_v46 }
 0x1e8   : > { %v1395_v33 = vpack.c.bf16 %v5184_v1, %v5176_v10 }
 0x1e9   : > { %v1333_v58 = vpop.f32.mrf.mxu0  ;;  %v1377_v38 = vmul.f32 %v5131_v31, %v1220_v0 }
 0x1ea   : > { %v1334_v55 = vadd.f32 %v1333_v58, %v1295_v61  ;;  %1399 = vst [vmem:[#allocation3 + $0x10] sm:$0xff] %v1395_v33  ;;  %v816_v58 = vpop.permute.xlu1 %815 }
 0x1eb   : > { %v1297_v47 = vpop.f32.mrf.mxu2  ;;  %v5209_v33 = vmax.f32 %v1377_v38, 0.0 }
 0x1ec   : > { %v1368_v54 = vmul.f32 %v5144_v51, %v1334_v55  ;;  %v1182_v9 = vpop.f32.mrf.mxu1  ;;  %v1298_v26 = vadd.f32 %v1297_v47, %v1259_v34 }
 0x1ed   : > { %1605 = vrot.lane.b32.xlu0 %v5176_v10, %s6937_s20  ;;  %1603 = vrot.lane.b32.xlu2 %v5147_v59, %s6937_s20  ;;  %v1183_v37 = vadd.f32 %v1182_v9, %v1144_v57 }
 0x1ee   : > { %v5200_v19 = vmax.f32 %v1368_v54, 0.0  ;;  %1563 = vrot.lane.b32.xlu1 %v5147_v59, %s4308_s24  ;;  %v1147_v54 = vadd.f32 %v5105_v3, %v816_v58  ;;  %v1263_v46 = vpop.f32.mrf.mxu3 }
 0x1ef   : > { %v1222_v55 = vadd.f32 %v5097_v56, %v1183_v37  ;;  %v1264_v3 = vadd.f32 %v1263_v46, %v816_v58 }
 0x1f0   : > { %v1396_v42 = vpack.c.bf16 %v5200_v19, %v5198_v17 }
 0x1f1   : > { %v1336_v6 = vpop.f32.mrf.mxu0 }
 0x1f2   : > { %v1337_v61 = vadd.f32 %v1336_v6, %v1298_v26  ;;  %1400 = vst [vmem:[#allocation3 + $0x18] sm:$0xff] %v1396_v42  ;;  %v1379_v26 = vmul.f32 %v5131_v31, %v1222_v55 }
 0x1f3   : > { %v1299_v25 = vpop.f32.mrf.mxu2 }
 0x1f4   : > { %v1378_v27 = vmul.f32 %v5144_v51, %v1337_v61  ;;  %v1185_v40 = vpop.f32.mrf.mxu1  ;;  %v1300_v47 = vadd.f32 %v1299_v25, %v1261_v28  ;;  %v5229_v23 = vmax.f32 %v1379_v26, 0.0  ;;  %v1149_v25 = vadd.f32 %v5111_v18, %v5158_v60 }
 0x1f5   : > { %1405 = vrot.lane.b32.xlu0 %v5176_v10, %s6938_s12  ;;  %1403 = vrot.lane.b32.xlu2 %v5147_v59, %s6938_s12  ;;  %v1186_v57 = vadd.f32 %v1185_v40, %v1147_v54 }
 0x1f6   : > { %v5216_v34 = vmax.f32 %v1378_v27, 0.0  ;;  %1525 = vrot.lane.b32.xlu1 %v5176_v10, %s6935_s17 }
 0x1f7   : > { %v1225_v6 = vadd.f32 %v5103_v2, %v1186_v57  ;;  %v1265_v2 = vpop.f32.mrf.mxu3 }
 0x1f8   : > { %v1721_v9 = vpack.c.bf16 %v5216_v34, %v5209_v33  ;;  %v1266_v18 = vadd.f32 %v1265_v2, %v5158_v60 }
 0x1f9   : > { %v1338_v0 = vpop.f32.mrf.mxu0  ;;  %v1381_v58 = vmul.f32 %v5131_v31, %v1225_v6 }
 0x1fa   : > { %v1339_v38 = vadd.f32 %v1338_v0, %v1300_v47  ;;  %1725 = vst [vmem:[#allocation3 + $0x120] sm:$0xff] %v1721_v9 }
 0x1fb   : > { %v1302_v42 = vpop.f32.mrf.mxu2  ;;  %v5247_v0 = vmax.f32 %v1381_v58, 0.0 }
 0x1fc   : > { %v1380_v56 = vmul.f32 %v5144_v51, %v1339_v38  ;;  %v1187_v61 = vpop.f32.mrf.mxu1  ;;  %v1303_v27 = vadd.f32 %v1302_v42, %v1264_v3 }
 0x1fd   : > { %1685 = vrot.lane.b32.xlu0 %v5176_v10, %s6939_s21  ;;  %1485 = vrot.lane.b32.xlu2 %v5176_v10, %s4310_s26  ;;  %v1188_v55 = vadd.f32 %v1187_v61, %v1149_v25 }
 0x1fe   : > { %v5232_v37 = vmax.f32 %v1380_v56, 0.0  ;;  %1487 = vrot.lane.b32.xlu1 %v5198_v17, %s4310_s26 }
 0x1ff   : > { %v1227_v26 = vadd.f32 %v5107_v45, %v1188_v55 }
 0x200   : > { %v1722_v40 = vpack.c.bf16 %v5232_v37, %v5229_v23 }
 0x201   : > { %v1341_v28 = vpop.f32.mrf.mxu0  ;;  %v1383_v56 = vmul.f32 %v5131_v31, %v1227_v26 }
 0x202   : > { %v1342_v47 = vadd.f32 %v1341_v28, %v1303_v27  ;;  %1726 = vst [vmem:[#allocation3 + $0x128] sm:$0xff] %v1722_v40 }
 0x203   : > { %v1304_v9 = vpop.f32.mrf.mxu2  ;;  %v5262_v45 = vmax.f32 %v1383_v56, 0.0 }
 0x204   : > { %v1382_v54 = vmul.f32 %v5144_v51, %v1342_v47  ;;  %v1305_v38 = vadd.f32 %v1304_v9, %v1266_v18 }
 0x205   : > { %1647 = vrot.lane.b32.xlu0 %v5198_v17, %s6936_s25  ;;  %1645 = vrot.lane.b32.xlu2 %v5176_v10, %s6936_s25 }
 0x206   : > { %v5250_v57 = vmax.f32 %v1382_v54, 0.0  ;;  %1447 = vrot.lane.b32.xlu1 %v5198_v17, %s4311_s10 }
 0x208   : > { %v1723_v46 = vpack.c.bf16 %v5250_v57, %v5247_v0 }
 0x209   : > { %v1343_v42 = vpop.f32.mrf.mxu0 }
 0x20a   : > { %v1344_v3 = vadd.f32 %v1343_v42, %v1305_v38  ;;  %1727 = vst [vmem:[#allocation3 + $0x130] sm:$0xff] %v1723_v46 }
 0x20c   : > { %v1384_v60 = vmul.f32 %v5144_v51, %v1344_v3 }
 0x20d   : > { %1567 = vrot.lane.b32.xlu0 %v5198_v17, %s4308_s24  ;;  %1565 = vrot.lane.b32.xlu2 %v5176_v10, %s4308_s24 }
 0x20e   : > { %v5264_v6 = vmax.f32 %v1384_v60, 0.0  ;;  %1607 = vrot.lane.b32.xlu1 %v5198_v17, %s6937_s20 }
 0x210   : > { %v1724_v61 = vpack.c.bf16 %v5264_v6, %v5262_v45 }
 0x212   : > { %1728 = vst [vmem:[#allocation3 + $0x138] sm:$0xff] %v1724_v61 }
 0x215   : > { %1731 = vrot.lane.b32.xlu0 %v5229_v23, %s6940_s22  ;;  %1527 = vrot.lane.b32.xlu2 %v5198_v17, %s6935_s17 }
 0x216   : > { %1407 = vrot.lane.b32.xlu1 %v5198_v17, %s6938_s12 }
 0x21d   : > { %1773 = vrot.lane.b32.xlu0 %v5247_v0, %s6941_s23  ;;  %1729 = vrot.lane.b32.xlu2 %v5209_v33, %s6940_s22 }
 0x21e   : > { %1687 = vrot.lane.b32.xlu1 %v5198_v17, %s6939_s21 }
 0x225   : > { %1733 = vrot.lane.b32.xlu0 %v5247_v0, %s6940_s22  ;;  %1771 = vrot.lane.b32.xlu2 %v5229_v23, %s6941_s23 }
 0x226   : > { %1769 = vrot.lane.b32.xlu1 %v5209_v33, %s6941_s23 }
 0x227   : > { %v5288_v10 = vpop.permute.xlu2 %1441 }
 0x22d   : > { %1893 = vrot.lane.b32.xlu0 %v5247_v0, %s6942_s18  ;;  %1931 = vrot.lane.b32.xlu2 %v5229_v23, %s6943_s13 }
 0x22e   : > { %1929 = vrot.lane.b32.xlu1 %v5209_v33, %s6943_s13 }
 0x22f   : > { %v5296_v17 = vpop.permute.xlu2 %1521 }
 0x235   : > { %1935 = vrot.lane.b32.xlu0 %v5262_v45, %s6943_s13  ;;  %1891 = vrot.lane.b32.xlu2 %v5229_v23, %s6942_s18 }
 0x236   : > { %1889 = vrot.lane.b32.xlu1 %v5209_v33, %s6942_s18 }
 0x237   : > { %v5304_v25 = vpop.permute.xlu2 %1483 }
 0x23d   : > { %1855 = vrot.lane.b32.xlu0 %v5262_v45, %s6944_s19  ;;  %1933 = vrot.lane.b32.xlu2 %v5247_v0, %s6943_s13 }
 0x23e   : > { %1775 = vrot.lane.b32.xlu1 %v5262_v45, %s6941_s23 }
 0x23f   : > { %v5312_v27 = vpop.permute.xlu0 %1561  ;;  %v5314_v40 = vpop.permute.xlu2 %1643 }
 0x240   : > { %v5316_v28 = vpop.permute.xlu1 %1481 }
 0x245   : > { %1853 = vrot.lane.b32.xlu2 %v5247_v0, %s6944_s19  ;;  %1489 = vrot.lane.b32.xlu0 %v5154_v32, %s4310_s26 }
 0x246   : > { %1735 = vrot.lane.b32.xlu1 %v5262_v45, %s6940_s22 }
 0x247   : > { %v5324_v58 = vpop.permute.xlu0 %1443  ;;  %v5326_v55 = vpop.permute.xlu2 %1603 }
 0x248   : > { %v5328_v47 = vpop.permute.xlu1 %1641 }
 0x24d   : > { %1569 = vrot.lane.b32.xlu2 %v5154_v32, %s4308_s24  ;;  %1649 = vrot.lane.b32.xlu0 %v5154_v32, %s6936_s25 }
 0x24e   : > { %1895 = vrot.lane.b32.xlu1 %v5262_v45, %s6942_s18 }
 0x24f   : > { %v5336_v2 = vpop.permute.xlu0 %1523  ;;  %v5338_v54 = vpop.permute.xlu2 %1403 }
 0x250   : > { %v5340_v9 = vpop.permute.xlu1 %1601 }
 0x255   : > { %1451 = vrot.lane.b32.xlu2 %v5168_v35, %s4311_s10  ;;  %1609 = vrot.lane.b32.xlu0 %v5154_v32, %s6937_s20 }
 0x256   : > { %1449 = vrot.lane.b32.xlu1 %v5154_v32, %s4311_s10 }
 0x257   : > { %v5348_v18 = vpop.permute.xlu0 %1445  ;;  %v5350_v26 = vpop.permute.xlu2 %1485 }
 0x258   : > { %v5352_v38 = vpop.permute.xlu1 %1401 }
 0x25d   : > { %1531 = vrot.lane.b32.xlu2 %v5168_v35, %s6935_s17  ;;  %1409 = vrot.lane.b32.xlu0 %v5154_v32, %s6938_s12 }
 0x25e   : > { %1529 = vrot.lane.b32.xlu1 %v5154_v32, %s6935_s17 }
 0x25f   : > { %v5360_v46 = vpop.permute.xlu0 %1605  ;;  %v5362_v42 = vpop.permute.xlu2 %1645 }
 0x260   : > { %6945 = vst [vmem:[#allocation33_spill] sm:$0xff] %v5362_v42  ;;  %v5364_v56 = vpop.permute.xlu1 %1563 }
 0x265   : > { %1493 = vrot.lane.b32.xlu2 %v5184_v1, %s4310_s26  ;;  %1571 = vrot.lane.b32.xlu0 %v5168_v35, %s4308_s24 }
 0x266   : > { %1491 = vrot.lane.b32.xlu1 %v5168_v35, %s4310_s26 }
 0x267   : > { %v5372_v3 = vpop.permute.xlu0 %1405  ;;  %v5374_v60 = vpop.permute.xlu2 %1565 }
 0x268   : > { %6946 = vst [vmem:[#allocation34_spill] sm:$0xff] %v5374_v60  ;;  %v5376_v61 = vpop.permute.xlu1 %1525 }
 0x26d   : > { %1453 = vrot.lane.b32.xlu2 %v5184_v1, %s4311_s10  ;;  %1533 = vrot.lane.b32.xlu0 %v5184_v1, %s6935_s17 }
 0x26e   : > { %1651 = vrot.lane.b32.xlu1 %v5168_v35, %s6936_s25 }
 0x26f   : > { %v5384_v51 = vpop.permute.xlu0 %1685  ;;  %v5386_v31 = vpop.permute.xlu2 %1527 }
 0x270   : > { %6947 = vst [vmem:[#allocation35_spill] sm:$0xff] %v5386_v31  ;;  %v5388_v52 = vpop.permute.xlu1 %1487 }
 0x275   : > { %1613 = vrot.lane.b32.xlu2 %v5184_v1, %s6937_s20  ;;  %1495 = vrot.lane.b32.xlu0 %v5200_v19, %s4310_s26 }
 0x276   : > { %1611 = vrot.lane.b32.xlu1 %v5168_v35, %s6937_s20 }
 0x277   : > { %v5396_v50 = vpop.permute.xlu0 %1647  ;;  %v5398_v62 = vpop.permute.xlu2 %1729 }
 0x278   : > { %6948 = vst [vmem:[#allocation36_spill] sm:$0xff] %v5398_v62  ;;  %v5400_v21 = vpop.permute.xlu1 %1447 }
 0x27d   : > { %1413 = vrot.lane.b32.xlu2 %v5184_v1, %s6938_s12  ;;  %1455 = vrot.lane.b32.xlu0 %v5200_v19, %s4311_s10 }
 0x27e   : > { %1411 = vrot.lane.b32.xlu1 %v5168_v35, %s6938_s12 }
 0x27f   : > { %v5408_v16 = vpop.permute.xlu0 %1567  ;;  %v5410_v63 = vpop.permute.xlu2 %1771 }
 0x280   : > { %6949 = vst [vmem:[#allocation37_spill] sm:$0xff] %v5410_v63  ;;  %v5412_v31 = vpop.permute.xlu1 %1607 }
 0x281   : > { %6950 = vst [vmem:[#allocation38_spill] sm:$0xff] %v5412_v31 }
 0x285   : > { %1693 = vrot.lane.b32.xlu2 %v5184_v1, %s6939_s21  ;;  %1615 = vrot.lane.b32.xlu0 %v5200_v19, %s6937_s20 }
 0x286   : > { %1653 = vrot.lane.b32.xlu1 %v5184_v1, %s6936_s25 }
 0x287   : > { %v5420_v62 = vpop.permute.xlu0 %1731  ;;  %v5422_v60 = vpop.permute.xlu2 %1931 }
 0x288   : > { %6951 = vst [vmem:[#allocation39_spill] sm:$0xff] %v5422_v60  ;;  %v5424_v53 = vpop.permute.xlu1 %1407 }
 0x289   : > { %6952 = vst [vmem:[#allocation40_spill] sm:$0xff] %v5424_v53 }
 0x28d   : > { %1655 = vrot.lane.b32.xlu2 %v5200_v19, %s6936_s25  ;;  %1415 = vrot.lane.b32.xlu0 %v5200_v19, %s6938_s12  ;;  %s309_s25 = sand.u32 1, %s4296_s28  }
 0x28e   : > { %1573 = vrot.lane.b32.xlu1 %v5184_v1, %s4308_s24  ;;  %s3385_s20 = sshll.u32 %s309_s25, 6 }
 0x28f   : > { %v5432_v63 = vpop.permute.xlu0 %1773  ;;  %v5434_v41 = vpop.permute.xlu2 %1891  ;;  %s6715_s12 = scalar_lea.vmem [#allocation4], %s3385_s20 }
 0x290   : > { %6953 = vst [vmem:[#allocation41_spill] sm:$0xff] %v5432_v63  ;;  %v5436_v42 = vpop.permute.xlu1 %1687 }
 0x291   : > { %6954 = vst [vmem:[#allocation42_spill] sm:$0xff] %v5434_v41 }
 0x292   : > { %6955 = vst [vmem:[#allocation43_spill] sm:$0xff] %v5436_v42 }
 0x295   : > { %1575 = vrot.lane.b32.xlu2 %v5200_v19, %s4308_s24  ;;  %1695 = vrot.lane.b32.xlu0 %v5200_v19, %s6939_s21  ;;  %s6967_s24 = smov 94  }
 0x296   : > { %1535 = vrot.lane.b32.xlu1 %v5200_v19, %s6935_s17 }
 0x297   : > { %v5444_v60 = vpop.permute.xlu0 %1733  ;;  %v5446_v53 = vpop.permute.xlu2 %1933 }
 0x298   : > { %6956 = vst [vmem:[#allocation44_spill] sm:$0xff] %v5444_v60  ;;  %v5448_v1 = vpop.permute.xlu1 %1769 }
 0x299   : > { %6957 = vst [vmem:[#allocation45_spill] sm:$0xff] %v5446_v53 }
 0x29a   : > { %6958 = vst [vmem:[#allocation46_spill] sm:$0xff] %v5448_v1 }
 0x29d   : > { %1739 = vrot.lane.b32.xlu2 %v5232_v37, %s6940_s22  ;;  %1777 = vrot.lane.b32.xlu0 %v5216_v34, %s6941_s23 }
 0x29e   : > { %1737 = vrot.lane.b32.xlu1 %v5216_v34, %s6940_s22 }
 0x29f   : > { %v5456_v41 = vpop.permute.xlu0 %1893  ;;  %v5458_v42 = vpop.permute.xlu2 %1853 }
 0x2a0   : > { %6959 = vst [vmem:[#allocation47_spill] sm:$0xff] %v5456_v41  ;;  %v5460_v19 = vpop.permute.xlu1 %1929 }
 0x2a1   : > { %6960 = vst [vmem:[#allocation48_spill] sm:$0xff] %v5458_v42 }
 0x2a2   : > { %6961 = vst [vmem:[#allocation49_spill] sm:$0xff] %v5460_v19 }
 0x2a5   : > { %1781 = vrot.lane.b32.xlu2 %v5250_v57, %s6941_s23  ;;  %1937 = vrot.lane.b32.xlu0 %v5216_v34, %s6943_s13 }
 0x2a6   : > { %1779 = vrot.lane.b32.xlu1 %v5232_v37, %s6941_s23 }
 0x2a7   : > { %v5468_v53 = vpop.permute.xlu0 %1935  ;;  %v1570_v1 = vpop.permute.xlu2 %1569 }
 0x2a8   : > { %6962 = vst [vmem:[#allocation50_spill] sm:$0xff] %v5468_v53  ;;  %v5470_v60 = vpop.permute.xlu1 %1889  ;;  %v1577_v42 = vsel %vm457_vm2, %v5312_v27, %v1570_v1  ;;  %v1581_v19 = vsel %vm457_vm2, %v1570_v1, %v5312_v27 }
 0x2a9   : > { %6963 = vst [vmem:[#allocation51_spill] sm:$0xff] %v5470_v60  ;;  %v1585_v41 = vmul.f32 %v1577_v42, %v4597_v48  ;;  %v1586_v63 = vmul.f32 %v1581_v19, %v4600_v49 }
 0x2ab   : > { %v1593_v24 = vpack.c.bf16 %v1586_v63, %v1585_v41 }
 0x2ad   : > { %1597 = vst [vmem:[#allocation3 + $0xa0] sm:$0xff] %v1593_v24  ;;  %1741 = vrot.lane.b32.xlu2 %v5250_v57, %s6940_s22  ;;  %1897 = vrot.lane.b32.xlu0 %v5216_v34, %s6942_s18 }
 0x2ae   : > { %1939 = vrot.lane.b32.xlu1 %v5232_v37, %s6943_s13 }
 0x2af   : > { %v5486_v60 = vpop.permute.xlu0 %1855  ;;  %v1452_v53 = vpop.permute.xlu2 %1451 }
 0x2b0   : > { %6964 = vst [vmem:[#allocation52_spill] sm:$0xff] %v5486_v60  ;;  %v5488_v22 = vpop.permute.xlu1 %1775  ;;  %v1458_v27 = vsel %vm388_vm5, %v5324_v58, %v1452_v53  ;;  %v1462_v63 = vsel %vm388_vm5, %v1452_v53, %v5324_v58 }
 0x2b1   : > { %6965 = vst [vmem:[#allocation53_spill] sm:$0xff] %v5488_v22  ;;  %v1467_v41 = vmul.f32 %v1462_v63, %v4690_v4  ;;  %v1468_v24 = vmul.f32 %v1458_v27, %v4693_v5 }
 0x2b3   : > { %v1474_v42 = vpack.c.bf16 %v1468_v24, %v1467_v41 }
 0x2b5   : > { %1478 = vst [vmem:[#allocation3 + $0x48] sm:$0xff] %v1474_v42  ;;  %1901 = vrot.lane.b32.xlu2 %v5250_v57, %s6942_s18  ;;  %1783 = vrot.lane.b32.xlu0 %v5264_v6, %s6941_s23 }
 0x2b6   : > { %1899 = vrot.lane.b32.xlu1 %v5232_v37, %s6942_s18 }
 0x2b7   : > { %v1532_v1 = vpop.permute.xlu2 %1531  ;;  %v1490_v19 = vpop.permute.xlu0 %1489 }
 0x2b8   : > { %v5504_v22 = vpop.permute.xlu1 %1735  ;;  %v1538_v53 = vsel %vm434_vm3, %v5336_v2, %v1532_v1  ;;  %v1542_v58 = vsel %vm434_vm3, %v1532_v1, %v5336_v2  ;;  %v1497_v27 = vsel %vm411_vm4, %v5316_v28, %v1490_v19  ;;  %v1501_v63 = vsel %vm411_vm4, %v1490_v19, %v5316_v28 }
 0x2b9   : > { %6966 = vst [vmem:[#allocation54_spill] sm:$0xff] %v5504_v22  ;;  %v1547_v41 = vmul.f32 %v1542_v58, %v4622_v7  ;;  %v1548_v24 = vmul.f32 %v1538_v53, %v4629_v15  ;;  %v1505_v42 = vmul.f32 %v1501_v63, %v4661_v43  ;;  %v1506_v22 = vmul.f32 %v1497_v27, %v4664_v44 }
 0x2bb   : > { %v1554_v60 = vpack.c.bf16 %v1548_v24, %v1547_v41  ;;  %v1513_v31 = vpack.c.bf16 %v1506_v22, %v1505_v42 }
 0x2bd   : > { %1558 = vst [vmem:[#allocation3 + $0x88] sm:$0xff] %v1554_v60  ;;  %2015 = vrot.lane.b32.xlu2 %v5262_v45, %s6967_s24  ;;  %1743 = vrot.lane.b32.xlu0 %v5264_v6, %s6940_s22 }
 0x2be   : > { %1517 = vst [vmem:[#allocation3 + $0x60] sm:$0xff] %v1513_v31  ;;  %1941 = vrot.lane.b32.xlu1 %v5250_v57, %s6943_s13 }
 0x2bf   : > { %v1494_v28 = vpop.permute.xlu2 %1493  ;;  %v1650_v2 = vpop.permute.xlu0 %1649 }
 0x2c0   : > { %v5528_v1 = vpop.permute.xlu1 %1895  ;;  %v1499_v19 = vsel %vm411_vm4, %v5350_v26, %v1494_v28  ;;  %v1503_v22 = vsel %vm411_vm4, %v1494_v28, %v5350_v26  ;;  %v1657_v60 = vsel %vm503_vm0, %v5328_v47, %v1650_v2  ;;  %v1661_v31 = vsel %vm503_vm0, %v1650_v2, %v5328_v47 }
 0x2c1   : > { %v1509_v53 = vmul.f32 %v1503_v22, %v4661_v43  ;;  %v1510_v58 = vmul.f32 %v1499_v19, %v4664_v44  ;;  %v1665_v27 = vmul.f32 %v1657_v60, %v4537_v11  ;;  %v1666_v63 = vmul.f32 %v1661_v31, %v4540_v12 }
 0x2c3   : > { %v1515_v41 = vpack.c.bf16 %v1510_v58, %v1509_v53  ;;  %v1673_v24 = vpack.c.bf16 %v1666_v63, %v1665_v27 }
 0x2c5   : > { %1519 = vst [vmem:[#allocation3 + $0x70] sm:$0xff] %v1515_v41  ;;  %1943 = vrot.lane.b32.xlu2 %v5264_v6, %s6943_s13  ;;  %1903 = vrot.lane.b32.xlu0 %v5264_v6, %s6942_s18  ;;  %s6968_s18 = smov 30   ;;  %s6973_s13 = smov 96  }
 0x2c6   : > { %1677 = vst [vmem:[#allocation3 + $0xe0] sm:$0xff] %v1673_v24  ;;  %1861 = vrot.lane.b32.xlu1 %v5250_v57, %s6944_s19 }
 0x2c7   : > { %v1454_v47 = vpop.permute.xlu2 %1453  ;;  %v1610_v26 = vpop.permute.xlu0 %1609 }
 0x2c8   : > { %v1459_v42 = vsel %vm388_vm5, %v5348_v18, %v1454_v47  ;;  %v1463_v28 = vsel %vm388_vm5, %v1454_v47, %v5348_v18  ;;  %v1450_v2 = vpop.permute.xlu1 %1449  ;;  %v1617_v19 = vsel %vm480_vm1, %v5340_v9, %v1610_v26  ;;  %v1621_v22 = vsel %vm480_vm1, %v1610_v26, %v5340_v9 }
 0x2c9   : > { %v1469_v60 = vmul.f32 %v1463_v28, %v4690_v4  ;;  %v1470_v31 = vmul.f32 %v1459_v42, %v4693_v5  ;;  %v1457_v53 = vsel %vm388_vm5, %v5288_v10, %v1450_v2  ;;  %v1461_v18 = vsel %vm388_vm5, %v1450_v2, %v5288_v10 }
 0x2ca   : > { %v1465_v58 = vmul.f32 %v1461_v18, %v4690_v4  ;;  %v1466_v27 = vmul.f32 %v1457_v53, %v4693_v5  ;;  %v1625_v63 = vmul.f32 %v1617_v19, %v4570_v29  ;;  %v1626_v9 = vmul.f32 %v1621_v22, %v4573_v30 }
 0x2cb   : > { %v1475_v41 = vpack.c.bf16 %v1470_v31, %v1469_v60 }
 0x2cc   : > { %v1473_v24 = vpack.c.bf16 %v1466_v27, %v1465_v58  ;;  %v1633_v47 = vpack.c.bf16 %v1626_v9, %v1625_v63 }
 0x2cd   : > { %1479 = vst [vmem:[#allocation3 + $0x50] sm:$0xff] %v1475_v41  ;;  %1863 = vrot.lane.b32.xlu2 %v5264_v6, %s6944_s19  ;;  %2021 = vrot.lane.b32.xlu0 %v5250_v57, %s6967_s24 }
 0x2ce   : > { %1477 = vst [vmem:[#allocation3 + $0x40] sm:$0xff] %v1473_v24  ;;  %2013 = vrot.lane.b32.xlu1 %v5247_v0, %s6967_s24 }
 0x2cf   : > { %1637 = vst [vmem:[#allocation3 + $0xc0] sm:$0xff] %v1633_v47  ;;  %v1614_v10 = vpop.permute.xlu2 %1613  ;;  %v1410_v26 = vpop.permute.xlu0 %1409 }
 0x2d0   : > { %v1619_v42 = vsel %vm480_vm1, %v5360_v46, %v1614_v10  ;;  %v1623_v28 = vsel %vm480_vm1, %v1614_v10, %v5360_v46  ;;  %v1530_v2 = vpop.permute.xlu1 %1529  ;;  %v1417_v19 = vsel %vm365_vm7, %v5352_v38, %v1410_v26  ;;  %v1421_v22 = vsel %vm365_vm7, %v1410_v26, %v5352_v38 }
 0x2d1   : > { %v1629_v60 = vmul.f32 %v1619_v42, %v4570_v29  ;;  %v1630_v31 = vmul.f32 %v1623_v28, %v4573_v30  ;;  %v1537_v53 = vsel %vm434_vm3, %v5296_v17, %v1530_v2  ;;  %v1541_v46 = vsel %vm434_vm3, %v1530_v2, %v5296_v17 }
 0x2d2   : > { %v1545_v18 = vmul.f32 %v1541_v46, %v4622_v7  ;;  %v1546_v58 = vmul.f32 %v1537_v53, %v4629_v15  ;;  %v1425_v27 = vmul.f32 %v1421_v22, %v4752_v13  ;;  %v1426_v38 = vmul.f32 %v1417_v19, %v4755_v14 }
 0x2d3   : > { %v1635_v63 = vpack.c.bf16 %v1630_v31, %v1629_v60 }
 0x2d4   : > { %v1553_v9 = vpack.c.bf16 %v1546_v58, %v1545_v18  ;;  %v1433_v41 = vpack.c.bf16 %v1426_v38, %v1425_v27  ;;  %v3441_v27 = vld [vmem:[%s6814_s3 + $0x6c] sm:$0xf0] }
 0x2d5   : > { %1639 = vst [vmem:[#allocation3 + $0xd0] sm:$0xff] %v1635_v63  ;;  %1849 = vrot.lane.b32.xlu2 %v5209_v33, %s6944_s19  ;;  %1851 = vrot.lane.b32.xlu0 %v5229_v23, %s6944_s19 }
 0x2d6   : > { %1557 = vst [vmem:[#allocation3 + $0x80] sm:$0xff] %v1553_v9  ;;  %2023 = vrot.lane.b32.xlu1 %v5264_v6, %s6967_s24 }
 0x2d7   : > { %1437 = vst [vmem:[#allocation3 + $0x20] sm:$0xff] %v1433_v41  ;;  %v1414_v17 = vpop.permute.xlu2 %1413  ;;  %v1572_v24 = vpop.permute.xlu0 %1571 }
 0x2d8   : > { %v1419_v47 = vsel %vm365_vm7, %v5372_v3, %v1414_v17  ;;  %v1423_v10 = vsel %vm365_vm7, %v1414_v17, %v5372_v3  ;;  %v1492_v26 = vpop.permute.xlu1 %1491  ;;  %v1578_v42 = vsel %vm457_vm2, %v5364_v56, %v1572_v24  ;;  %v1582_v28 = vsel %vm457_vm2, %v1572_v24, %v5364_v56 }
 0x2d9   : > { %v1429_v2 = vmul.f32 %v1423_v10, %v4752_v13  ;;  %v1430_v19 = vmul.f32 %v1419_v47, %v4755_v14  ;;  %v1498_v22 = vsel %vm411_vm4, %v5304_v25, %v1492_v26  ;;  %v1502_v3 = vsel %vm411_vm4, %v1492_v26, %v5304_v25  ;;  %v4011_v25 = vld [vmem:[%s6814_s3 + $0x64] sm:$0xf] }
 0x2da   : > { %v1507_v60 = vmul.f32 %v1502_v3, %v4661_v43  ;;  %v1508_v31 = vmul.f32 %v1498_v22, %v4664_v44  ;;  %v1587_v53 = vmul.f32 %v1578_v42, %v4597_v48  ;;  %v1588_v56 = vmul.f32 %v1582_v28, %v4600_v49 }
 0x2db   : > { %v1435_v46 = vpack.c.bf16 %v1430_v19, %v1429_v2  ;;  %v3444_v9 = vor.u32 %v4011_v25, %v3441_v27 }
 0x2dc   : > { %v1514_v18 = vpack.c.bf16 %v1508_v31, %v1507_v60  ;;  %v1594_v58 = vpack.c.bf16 %v1588_v56, %v1587_v53 }
 0x2dd   : > { %1439 = vst [vmem:[#allocation3 + $0x30] sm:$0xff] %v1435_v46  ;;  %1859 = vrot.lane.b32.xlu2 %v5232_v37, %s6944_s19  ;;  %1681 = vrot.lane.b32.xlu0 %v5136_v36, %s6939_s21 }
 0x2de   : > { %1518 = vst [vmem:[#allocation3 + $0x68] sm:$0xff] %v1514_v18  ;;  %1857 = vrot.lane.b32.xlu1 %v5216_v34, %s6944_s19  ;;  %1189 = vmatmul.bf16.gmra.mxu1 %v3444_v9 }
 0x2df   : > { %1598 = vst [vmem:[#allocation3 + $0xa8] sm:$0xff] %v1594_v58  ;;  %v1694_v38 = vpop.permute.xlu2 %1693  ;;  %v1534_v63 = vpop.permute.xlu0 %1533  ;;  %1306 = vmatmul.bf16.gmra.mxu2 %v3444_v9 }
 0x2e0   : > { %v1699_v36 = vsel %vm526_vm8, %v5384_v51, %v1694_v38  ;;  %v1703_v41 = vsel %vm526_vm8, %v1694_v38, %v5384_v51  ;;  %v1652_v17 = vpop.permute.xlu1 %1651  ;;  %v1539_v24 = vsel %vm434_vm3, %v5376_v61, %v1534_v63  ;;  %v1543_v47 = vsel %vm434_vm3, %v1534_v63, %v5376_v61 }
 0x2e1   : > { %v1709_v10 = vmul.f32 %v1699_v36, %v4998_v39  ;;  %v1710_v26 = vmul.f32 %v1703_v41, %v5001_v20  ;;  %v1658_v42 = vsel %vm503_vm0, %v5314_v40, %v1652_v17  ;;  %v1662_v51 = vsel %vm503_vm0, %v1652_v17, %v5314_v40 }
 0x2e2   : > { %v1667_v28 = vmul.f32 %v1658_v42, %v4537_v11  ;;  %v1668_v2 = vmul.f32 %v1662_v51, %v4540_v12  ;;  %v1549_v19 = vmul.f32 %v1543_v47, %v4622_v7  ;;  %v1550_v61 = vmul.f32 %v1539_v24, %v4629_v15 }
 0x2e3   : > { %v1715_v22 = vpack.c.bf16 %v1710_v26, %v1709_v10 }
 0x2e4   : > { %v1674_v3 = vpack.c.bf16 %v1668_v2, %v1667_v28  ;;  %v1555_v60 = vpack.c.bf16 %v1550_v61, %v1549_v19 }
 0x2e5   : > { %1719 = vst [vmem:[#allocation3 + $0x110] sm:$0xff] %v1715_v22  ;;  %1689 = vrot.lane.b32.xlu2 %v5154_v32, %s6939_s21  ;;  %1691 = vrot.lane.b32.xlu0 %v5168_v35, %s6939_s21 }
 0x2e6   : > { %1678 = vst [vmem:[#allocation3 + $0xe8] sm:$0xff] %v1674_v3  ;;  %1683 = vrot.lane.b32.xlu1 %v5147_v59, %s6939_s21  ;;  %s4143_s21 = sshll.u32 %s4390_s9, 6  ;;  %s3292_s9 = scalar_lea.sflag [#allocation5], %s309_s25 }
 0x2e7   : > { %1559 = vst [vmem:[#allocation3 + $0x90] sm:$0xff] %v1555_v60  ;;  %v1656_v40 = vpop.permute.xlu2 %1655  ;;  %v1496_v31 = vpop.permute.xlu0 %1495 }
 0x2e8   : > { %v1660_v53 = vsel %vm503_vm0, %v5396_v50, %v1656_v40  ;;  %v1664_v56 = vsel %vm503_vm0, %v1656_v40, %v5396_v50  ;;  %v1612_v46 = vpop.permute.xlu1 %1611  ;;  %v1500_v32 = vsel %vm411_vm4, %v5388_v52, %v1496_v31  ;;  %v1504_v59 = vsel %vm411_vm4, %v1496_v31, %v5388_v52  ;;  %v4085_v31 = vld [vmem:[#allocation3 + $0x74] sm:$0xf] }
 0x2e9   : > { %v1671_v35 = vmul.f32 %v1660_v53, %v4537_v11  ;;  %v1672_v18 = vmul.f32 %v1664_v56, %v4540_v12  ;;  %v1618_v58 = vsel %vm480_vm1, %v5326_v55, %v1612_v46  ;;  %v1622_v50 = vsel %vm480_vm1, %v1612_v46, %v5326_v55 }
 0x2ea   : > { %v1627_v25 = vmul.f32 %v1618_v58, %v4570_v29  ;;  %v1628_v27 = vmul.f32 %v1622_v50, %v4573_v30  ;;  %v1511_v38 = vmul.f32 %v1504_v59, %v4661_v43  ;;  %v1512_v52 = vmul.f32 %v1500_v32, %v4664_v44  ;;  %v4014_v43 = vld [vmem:[%s6814_s3 + $0x7c] sm:$0xf]  ;;  %v3453_v44 = vld [vmem:[%s6814_s3 + $0x84] sm:$0xf0] }
 0x2eb   : > { %v1676_v63 = vpack.c.bf16 %v1672_v18, %v1671_v35  ;;  %v3456_v17 = vor.u32 %v4014_v43, %v3453_v44  ;;  %v6969_v58 = vld [vmem:[#allocation38_spill] sm:$0xff]  ;;  %v3741_v44 = vld [vmem:[#allocation3 + $0x68] sm:$0xf0] }
 0x2ec   : > { %v1634_v9 = vpack.c.bf16 %v1628_v27, %v1627_v25  ;;  %v1516_v36 = vpack.c.bf16 %v1512_v52, %v1511_v38  ;;  %v4084_v27 = vld [vmem:[#allocation3 + $0x64] sm:$0xf0]  ;;  %v6970_v38 = vld [vmem:[#allocation21_spill] sm:$0xff] }
 0x2ed   : > { %1680 = vst [vmem:[#allocation3 + $0xf8] sm:$0xff] %v1676_v63  ;;  %2011 = vrot.lane.b32.xlu2 %v5229_v23, %s6967_s24  ;;  %2017 = vrot.lane.b32.xlu0 %v5216_v34, %s6967_s24  ;;  %v6971_v63 = vld [vmem:[#allocation22_spill] sm:$0xff] }
 0x2ee   : > { %1638 = vst [vmem:[#allocation3 + $0xc8] sm:$0xff] %v1634_v9  ;;  %2009 = vrot.lane.b32.xlu1 %v5209_v33, %s6967_s24  ;;  %1194 = vmatmul.bf16.gmra.mxu1 %v3456_v17 }
 0x2ef   : > { %1520 = vst [vmem:[#allocation3 + $0x78] sm:$0xff] %v1516_v36  ;;  %v1576_v55 = vpop.permute.xlu2 %1575  ;;  %v1456_v41 = vpop.permute.xlu0 %1455  ;;  %1311 = vmatmul.bf16.gmra.mxu2 %v3456_v17  ;;  %v6972_v36 = vld [vmem:[#allocation33_spill] sm:$0xff] }
 0x2f0   : > { %v1580_v24 = vsel %vm457_vm2, %v5408_v16, %v1576_v55  ;;  %v1584_v47 = vsel %vm457_vm2, %v1576_v55, %v5408_v16  ;;  %v1412_v10 = vpop.permute.xlu1 %1411  ;;  %v1460_v26 = vsel %vm388_vm5, %v5400_v21, %v1456_v41  ;;  %v1464_v42 = vsel %vm388_vm5, %v1456_v41, %v5400_v21 }
 0x2f1   : > { %v1591_v51 = vmul.f32 %v1580_v24, %v4597_v48  ;;  %v1592_v28 = vmul.f32 %v1584_v47, %v4600_v49  ;;  %v1418_v2 = vsel %vm365_vm7, %v5338_v54, %v1412_v10  ;;  %v1422_v16 = vsel %vm365_vm7, %v1412_v10, %v5338_v54  ;;  %v3747_v54 = vld [vmem:[#allocation3 + $0x70] sm:$0xf]  ;;  %v3739_v47 = vld [vmem:[#allocation3 + $0x60] sm:$0xf] }
 0x2f2   : > { %v1427_v19 = vmul.f32 %v1422_v16, %v4752_v13  ;;  %v1428_v61 = vmul.f32 %v1418_v2, %v4755_v14  ;;  %v1471_v22 = vmul.f32 %v1464_v42, %v4690_v4  ;;  %v1472_v21 = vmul.f32 %v1460_v26, %v4693_v5  ;;  %v4083_v42 = vld [vmem:[#allocation3 + $0x64] sm:$0xf]  ;;  %v4081_v16 = vld [vmem:[#allocation3 + $0x54] sm:$0xf] }
 0x2f3   : > { %v1596_v3 = vpack.c.bf16 %v1592_v28, %v1591_v51  ;;  %v3740_v26 = vor.u32 %v4084_v27, %v3739_v47  ;;  %v3744_v2 = vor.u32 %v4083_v42, %v3741_v44 }
 0x2f4   : > { %v1434_v60 = vpack.c.bf16 %v1428_v61, %v1427_v19  ;;  %v1476_v40 = vpack.c.bf16 %v1472_v21, %v1471_v22  ;;  %v6974_v21 = vld [vmem:[#allocation41_spill] sm:$0xff] }
 0x2f5   : > { %1600 = vst [vmem:[#allocation3 + $0xb8] sm:$0xff] %v1596_v3  ;;  %1813 = vrot.lane.b32.xlu2 %v5247_v0, %s6968_s18  ;;  %1815 = vrot.lane.b32.xlu0 %v5262_v45, %s6968_s18 }
 0x2f6   : > { %1438 = vst [vmem:[#allocation3 + $0x28] sm:$0xff] %v1434_v60  ;;  %2019 = vrot.lane.b32.xlu1 %v5232_v37, %s6967_s24  ;;  %v4086_v4 = vld [vmem:[#allocation3 + $0x74] sm:$0xf0]  ;;  %v3749_v53 = vld [vmem:[#allocation3 + $0x78] sm:$0xf0] }
 0x2f7   : > { %1480 = vst [vmem:[#allocation3 + $0x58] sm:$0xff] %v1476_v40  ;;  %v1740_v5 = vpop.permute.xlu2 %1739  ;;  %v3748_v56 = vor.u32 %v4086_v4, %v3747_v54  ;;  %v3752_v46 = vor.u32 %v4085_v31, %v3749_v53  ;;  %v1616_v32 = vpop.permute.xlu0 %1615  ;;  %v6975_v54 = vld [vmem:[#allocation40_spill] sm:$0xff]  ;;  %v3723_v4 = vld [vmem:[#allocation3 + $0x40] sm:$0xf] }
 0x2f8   : > { %v1746_v59 = vsel %vm549_vm15, %v5420_v62, %v1740_v5  ;;  %v1750_v35 = vsel %vm549_vm15, %v1740_v5, %v5420_v62  ;;  %v1654_v18 = vpop.permute.xlu1 %1653  ;;  %v1620_v50 = vsel %vm480_vm1, %v6969_v58, %v1616_v32  ;;  %v1624_v25 = vsel %vm480_vm1, %v1616_v32, %v6969_v58  ;;  %v6976_v53 = vld [vmem:[#allocation19_spill] sm:$0xff]  ;;  %v6978_v32 = vld [vmem:[#allocation34_spill] sm:$0xff] }
 0x2f9   : > { %v1755_v52 = vmul.f32 %v1750_v35, %v6970_v38  ;;  %v1756_v9 = vmul.f32 %v1746_v59, %v6971_v63  ;;  %v1659_v43 = vsel %vm503_vm0, %v6972_v36, %v1654_v18  ;;  %v1663_v62 = vsel %vm503_vm0, %v1654_v18, %v6972_v36  ;;  %2658 = vmatpush.bf16.msrb.mxu1 %v3748_v56  ;;  %v6977_v56 = vld [vmem:[#allocation20_spill] sm:$0xff]  ;;  %v4079_v18 = vld [vmem:[#allocation3 + $0x44] sm:$0xf] }
 0x2fa   : > { %v1669_v55 = vmul.f32 %v1659_v43, %v4537_v11  ;;  %v1670_v41 = vmul.f32 %v1663_v62, %v4540_v12  ;;  %2803 = vmatpush.bf16.msra.mxu0 %v3752_v46  ;;  %v1631_v17 = vmul.f32 %v1620_v50, %v4570_v29  ;;  %v1632_v24 = vmul.f32 %v1624_v25, %v4573_v30  ;;  %v3731_v11 = vld [vmem:[#allocation3 + $0x50] sm:$0xf]  ;;  %v3725_v43 = vld [vmem:[#allocation3 + $0x48] sm:$0xf0] }
 0x2fb   : > { %v1762_v10 = vpack.c.bf16 %v1756_v9, %v1755_v52  ;;  %v4080_v52 = vld [vmem:[#allocation3 + $0x44] sm:$0xf0]  ;;  %vm7006_vm0 = vcmp.lt.s32.totalorder %v4519_v8, 96  ;;  %v4052_v8 = vld [vmem:[%s6815_s4 + $0xc] sm:$0xf] }
 0x2fc   : > { %v1675_v51 = vpack.c.bf16 %v1670_v41, %v1669_v55  ;;  %v1636_v28 = vpack.c.bf16 %v1632_v24, %v1631_v17  ;;  %v3724_v36 = vor.u32 %v4080_v52, %v3723_v4  ;;  %v3728_v55 = vor.u32 %v4079_v18, %v3725_v43  ;;  %v4100_v41 = vld [vmem:[#allocation3 + $0xe4] sm:$0xf0]  ;;  %v6983_v52 = vld [vmem:[#allocation46_spill] sm:$0xff]  ;;  %vm7007_vm1 = vmmov %vm7006_vm0 }
 0x2fd   : > { %1766 = vst [vmem:[#allocation3 + $0x148] sm:$0xff] %v1762_v10  ;;  %2659 = vmatpush.bf16.msrb.mxu1 %v3740_v26  ;;  %1823 = vrot.lane.b32.xlu2 %v5264_v6, %s6968_s18  ;;  %v6979_v10 = vld [vmem:[#allocation44_spill] sm:$0xff]  ;;  %vm7012_vm4 = vmmov %vm7006_vm0 }
 0x2fe   : > { %1679 = vst [vmem:[#allocation3 + $0xf0] sm:$0xff] %v1675_v51  ;;  %2804 = vmatpush.bf16.msra.mxu0 %v3744_v2  ;;  %1821 = vrot.lane.b32.xlu1 %v5250_v57, %s6968_s18  ;;  %v4082_v12 = vld [vmem:[#allocation3 + $0x54] sm:$0xf0]  ;;  %v3733_v29 = vld [vmem:[#allocation3 + $0x58] sm:$0xf0]  ;;  %vm7013_vm5 = vmmov %vm7006_vm0 }
 0x2ff   : > { %1640 = vst [vmem:[#allocation3 + $0xd8] sm:$0xff] %v1636_v28  ;;  %1973 = vrot.lane.b32.xlu0 %v5247_v0, %s6973_s13  ;;  %v1782_v30 = vpop.permute.xlu2 %1781  ;;  %v3732_v19 = vor.u32 %v4082_v12, %v3731_v11  ;;  %v3736_v61 = vor.u32 %v4081_v16, %v3733_v29  ;;  %v1416_v22 = vpop.permute.xlu0 %1415  ;;  %v6981_v11 = vld [vmem:[#allocation35_spill] sm:$0xff]  ;;  %v4076_v43 = vld [vmem:[#allocation3 + $0x24] sm:$0xf0] }
 0x300   : > { %v1787_v3 = vsel %vm572_vm14, %v6974_v21, %v1782_v30  ;;  %v1791_v60 = vsel %vm572_vm14, %v1782_v30, %v6974_v21  ;;  %v1574_v40 = vpop.permute.xlu1 %1573  ;;  %v1420_v31 = vsel %vm365_vm7, %v6975_v54, %v1416_v22  ;;  %v1424_v0 = vsel %vm365_vm7, %v1416_v22, %v6975_v54  ;;  %v3787_v54 = vld [vmem:[#allocation3 + $0xc0] sm:$0xf]  ;;  %vm7015_vm7 = vmmov %vm7006_vm0 }
 0x301   : > { %v1797_v5 = vmul.f32 %v1791_v60, %v6976_v53  ;;  %v1798_v46 = vmul.f32 %v1787_v3, %v6977_v56  ;;  %v1579_v59 = vsel %vm457_vm2, %v6978_v32, %v1574_v40  ;;  %v1583_v35 = vsel %vm457_vm2, %v1574_v40, %v6978_v32  ;;  %2660 = vmatpush.bf16.msrb.mxu1 %v3732_v19  ;;  %v3795_v40 = vld [vmem:[#allocation3 + $0xd0] sm:$0xf]  ;;  %vm7010_vm2 = vmmov %vm7006_vm0 }
 0x302   : > { %v1589_v58 = vmul.f32 %v1579_v59, %v4597_v48  ;;  %v1590_v50 = vmul.f32 %v1583_v35, %v4600_v49  ;;  %2805 = vmatpush.bf16.msra.mxu0 %v3736_v61  ;;  %v1431_v25 = vmul.f32 %v1424_v0, %v4752_v13  ;;  %v1432_v27 = vmul.f32 %v1420_v31, %v4755_v14  ;;  %v4102_v49 = vld [vmem:[#allocation3 + $0xf4] sm:$0xf0]  ;;  %v3803_v14 = vld [vmem:[#allocation3 + $0xe0] sm:$0xf]  ;;  %v4096_v31 = vld [vmem:[#allocation3 + $0xc4] sm:$0xf0] }
 0x303   : > { %v1803_v9 = vpack.c.bf16 %v1798_v46, %v1797_v5  ;;  %v3804_v47 = vor.u32 %v4100_v41, %v3803_v14  ;;  %v3715_v0 = vld [vmem:[#allocation3 + $0x30] sm:$0xf]  ;;  %v3788_v18 = vor.u32 %v4096_v31, %v3787_v54  ;;  %v3709_v14 = vld [vmem:[#allocation3 + $0x28] sm:$0xf0] }
 0x304   : > { %v1595_v62 = vpack.c.bf16 %v1590_v50, %v1589_v58  ;;  %v1436_v44 = vpack.c.bf16 %v1432_v27, %v1431_v25  ;;  %v6982_v58 = vld [vmem:[#allocation47_spill] sm:$0xff] }
 0x305   : > { %1807 = vst [vmem:[#allocation3 + $0x170] sm:$0xff] %v1803_v9  ;;  %2661 = vmatpush.bf16.msrb.mxu1 %v3724_v36  ;;  %1981 = vrot.lane.b32.xlu2 %v5250_v57, %s6973_s13  ;;  %v3811_v48 = vld [vmem:[#allocation3 + $0xf0] sm:$0xf] }
 0x306   : > { %1599 = vst [vmem:[#allocation3 + $0xb0] sm:$0xff] %v1595_v62  ;;  %2806 = vmatpush.bf16.msra.mxu0 %v3728_v55  ;;  %1975 = vrot.lane.b32.xlu1 %v5262_v45, %s6973_s13  ;;  %v3812_v13 = vor.u32 %v4102_v49, %v3811_v48  ;;  %v6980_v45 = vld [vmem:[#allocation43_spill] sm:$0xff]  ;;  %v4098_v21 = vld [vmem:[#allocation3 + $0xd4] sm:$0xf0]  ;;  %v6984_v62 = vld [vmem:[#allocation13_spill] sm:$0xff] }
 0x307   : > { %1440 = vst [vmem:[#allocation3 + $0x38] sm:$0xff] %v1436_v44  ;;  %1983 = vrot.lane.b32.xlu0 %v5264_v6, %s6973_s13  ;;  %v1742_v17 = vpop.permute.xlu2 %1741  ;;  %v1696_v24 = vpop.permute.xlu0 %1695  ;;  %v3796_v4 = vor.u32 %v4098_v21, %v3795_v40  ;;  %v6985_v55 = vld [vmem:[#allocation14_spill] sm:$0xff]  ;;  %v6986_v48 = vld [vmem:[#allocation36_spill] sm:$0xff]  ;;  %v6987_v40 = vld [vmem:[#allocation49_spill] sm:$0xff] }
 0x308   : > { %v1747_v57 = vsel %vm549_vm15, %v6979_v10, %v1742_v17  ;;  %v1751_v26 = vsel %vm549_vm15, %v1742_v17, %v6979_v10  ;;  %2687 = vmatpush.bf16.msrb.mxu3 %v3812_v13  ;;  %v1536_v42 = vpop.permute.xlu1 %1535  ;;  %v1700_v51 = vsel %vm526_vm8, %v6980_v45, %v1696_v24  ;;  %v1704_v6 = vsel %vm526_vm8, %v1696_v24, %v6980_v45  ;;  %v4075_v45 = vld [vmem:[#allocation3 + $0x24] sm:$0xf] }
 0x309   : > { %v1757_v28 = vmul.f32 %v1751_v26, %v6970_v38  ;;  %v1758_v2 = vmul.f32 %v1747_v57, %v6971_v63  ;;  %v1540_v16 = vsel %vm434_vm3, %v6981_v11, %v1536_v42  ;;  %v1544_v12 = vsel %vm434_vm3, %v1536_v42, %v6981_v11  ;;  %v3707_v57 = vld [vmem:[#allocation3 + $0x20] sm:$0xf]  ;;  %v4074_v11 = vld [vmem:[#allocation3 + $0x14] sm:$0xf0]  ;;  %vm7011_vm3 = vmmov %vm7006_vm0 }
 0x30a   : > { %v1551_v29 = vmul.f32 %v1544_v12, %v4622_v7  ;;  %v1552_v30 = vmul.f32 %v1540_v16, %v4629_v15  ;;  %v1711_v19 = vmul.f32 %v1700_v51, %v4998_v39  ;;  %v1712_v61 = vmul.f32 %v1704_v6, %v5001_v20  ;;  %v4077_v7 = vld [vmem:[#allocation3 + $0x34] sm:$0xf]  ;;  %v4094_v16 = vld [vmem:[#allocation3 + $0xb4] sm:$0xf0]  ;;  %v3701_v12 = vld [vmem:[#allocation3 + $0x18] sm:$0xf0] }
 0x30b   : > { %v1763_v22 = vpack.c.bf16 %v1758_v2, %v1757_v28  ;;  %v3708_v42 = vor.u32 %v4076_v43, %v3707_v57  ;;  %v3712_v2 = vor.u32 %v4075_v45, %v3709_v14  ;;  %v4071_v43 = vld [vmem:[#allocation3 + $0x4] sm:$0xf]  ;;  %v3755_v14 = vld [vmem:[#allocation3 + $0x80] sm:$0xf] }
 0x30c   : > { %v1556_v3 = vpack.c.bf16 %v1552_v30, %v1551_v29  ;;  %v1716_v60 = vpack.c.bf16 %v1712_v61, %v1711_v19  ;;  %2688 = vmatpush.bf16.msrb.mxu3 %v3804_v47  ;;  %v3699_v29 = vld [vmem:[#allocation3 + $0x10] sm:$0xf] }
 0x30d   : > { %1767 = vst [vmem:[#allocation3 + $0x150] sm:$0xff] %v1763_v22  ;;  %1811 = vrot.lane.b32.xlu2 %v5229_v23, %s6968_s18  ;;  %v3779_v51 = vld [vmem:[#allocation3 + $0xb0] sm:$0xf]  ;;  %v3700_v61 = vor.u32 %v4074_v11, %v3699_v29  ;;  %v4073_v22 = vld [vmem:[#allocation3 + $0x14] sm:$0xf] }
 0x30e   : > { %1560 = vst [vmem:[#allocation3 + $0x98] sm:$0xff] %v1556_v3  ;;  %1809 = vrot.lane.b32.xlu1 %v5209_v33, %s6968_s18  ;;  %v4078_v15 = vld [vmem:[#allocation3 + $0x34] sm:$0xf0]  ;;  %v3717_v5 = vld [vmem:[#allocation3 + $0x38] sm:$0xf0]  ;;  %v3780_v30 = vor.u32 %v4094_v16, %v3779_v51 }
 0x30f   : > { %1720 = vst [vmem:[#allocation3 + $0x118] sm:$0xff] %v1716_v60  ;;  %1817 = vrot.lane.b32.xlu0 %v5216_v34, %s6968_s18  ;;  %v1902_v46 = vpop.permute.xlu2 %1901  ;;  %v3716_v32 = vor.u32 %v4078_v15, %v3715_v0  ;;  %v3720_v59 = vor.u32 %v4077_v7, %v3717_v5  ;;  %v1778_v35 = vpop.permute.xlu0 %1777  ;;  %v4092_v3 = vld [vmem:[#allocation3 + $0xa4] sm:$0xf0]  ;;  %v3704_v60 = vor.u32 %v4073_v22, %v3701_v12  ;;  %v3693_v7 = vld [vmem:[#allocation3 + $0x8] sm:$0xf0]  ;;  %v6989_v5 = vld [vmem:[#allocation11_spill] sm:$0xff] }
 0x310   : > { %v1907_v50 = vsel %vm641_vm11, %v6982_v58, %v1902_v46  ;;  %v1911_v25 = vsel %vm641_vm11, %v1902_v46, %v6982_v58  ;;  %v1738_v27 = vpop.permute.xlu1 %1737  ;;  %2689 = vmatpush.bf16.msrb.mxu3 %v3796_v4  ;;  %v1785_v9 = vsel %vm572_vm14, %v6983_v52, %v1778_v35  ;;  %v1789_v36 = vsel %vm572_vm14, %v1778_v35, %v6983_v52  ;;  %v4072_v0 = vld [vmem:[#allocation3 + $0x4] sm:$0xf0]  ;;  %v3771_v35 = vld [vmem:[#allocation3 + $0xa0] sm:$0xf]  ;;  %v4053_v58 = vld [vmem:[%s6815_s4 + $0x10] sm:$0xf0] }
 0x311   : > { %v1917_v44 = vmul.f32 %v1907_v50, %v6984_v62  ;;  %v1918_v41 = vmul.f32 %v1911_v25, %v6985_v55  ;;  %v1745_v49 = vsel %vm549_vm15, %v6986_v48, %v1738_v27  ;;  %v1749_v13 = vsel %vm549_vm15, %v1738_v27, %v6986_v48  ;;  %2662 = vmatpush.bf16.msrb.mxu1 %v3716_v32  ;;  %v6990_v32 = vld [vmem:[#allocation12_spill] sm:$0xff]  ;;  %v3691_v27 = vld [vmem:[#allocation3] sm:$0xf] }
 0x312   : > { %v1753_v17 = vmul.f32 %v1749_v13, %v6970_v38  ;;  %v1754_v24 = vmul.f32 %v1745_v49, %v6971_v63  ;;  %2807 = vmatpush.bf16.msra.mxu0 %v3720_v59  ;;  %v1793_v47 = vmul.f32 %v1789_v36, %v6976_v53  ;;  %v1794_v10 = vmul.f32 %v1785_v9, %v6977_v56  ;;  %v343_v49 = vld [vmem:[%s6816_s5 + $0x60] sm:$0xff]  ;;  %v6993_v12 = vld [vmem:[#allocation39_spill] sm:$0xff] }
 0x313   : > { %v1923_v26 = vpack.c.bf16 %v1918_v41, %v1917_v44  ;;  %v3772_v52 = vor.u32 %v4092_v3, %v3771_v35  ;;  %v3692_v36 = vor.u32 %v4072_v0, %v3691_v27  ;;  %v3696_v48 = vor.u32 %v4071_v43, %v3693_v7  ;;  %v346_v7 = vld [vmem:[%s6816_s5 + $0x78] sm:$0xff]  ;;  %v6996_v27 = vld [vmem:[#allocation15_spill] sm:$0xff]  ;;  %v6998_v43 = vld [vmem:[#allocation42_spill] sm:$0xff] }
 0x314   : > { %v1761_v6 = vpack.c.bf16 %v1754_v24, %v1753_v17  ;;  %v1801_v28 = vpack.c.bf16 %v1794_v10, %v1793_v47  ;;  %2690 = vmatpush.bf16.msrb.mxu3 %v3788_v18  ;;  %v3611_v18 = vld [vmem:[%s6815_s4] sm:$0xf]  ;;  %v4088_v47 = vld [vmem:[#allocation3 + $0x84] sm:$0xf0] }
 0x315   : > { %1927 = vst [vmem:[#allocation3 + $0x1d0] sm:$0xff] %v1923_v26  ;;  %2663 = vmatpush.bf16.msrb.mxu1 %v3708_v42  ;;  %1969 = vrot.lane.b32.xlu2 %v5209_v33, %s6973_s13  ;;  %v4090_v44 = vld [vmem:[#allocation3 + $0x94] sm:$0xf0]  ;;  %v3612_v13 = vor.u32 %v4053_v58, %v3611_v18  ;;  %v3763_v17 = vld [vmem:[#allocation3 + $0x90] sm:$0xf]  ;;  %v3756_v26 = vor.u32 %v4088_v47, %v3755_v14 }
 0x316   : > { %1765 = vst [vmem:[#allocation3 + $0x140] sm:$0xff] %v1761_v6  ;;  %2808 = vmatpush.bf16.msra.mxu0 %v3712_v2  ;;  %1819 = vrot.lane.b32.xlu1 %v5232_v37, %s6968_s18  ;;  %v3764_v24 = vor.u32 %v4090_v44, %v3763_v17  ;;  %v6991_v42 = vld [vmem:[#allocation50_spill] sm:$0xff]  ;;  %v6992_v6 = vld [vmem:[#allocation51_spill] sm:$0xff]  ;;  %v3613_v2 = vld [vmem:[%s6815_s4 + $0x14] sm:$0xf0]  ;;  %s3303_s18 = scalar_lea.hbm %s6819_s8, %s4143_s21  ;;  %s4262_s21 = scalar_lea.hbm %s6819_s8, 128 }
 0x317   : > { %1805 = vst [vmem:[#allocation3 + $0x160] sm:$0xff] %v1801_v28  ;;  %1971 = vrot.lane.b32.xlu0 %v5229_v23, %s6973_s13  ;;  %v5864_v19 = vpop.permute.xlu2 %2015  ;;  %v1938_v21 = vpop.permute.xlu0 %1937  ;;  %v6988_v23 = vld [vmem:[#allocation37_spill] sm:$0xff]  ;;  %v348_v47 = vld [vmem:[%s6816_s5 + $0x88] sm:$0xff]  ;;  %s3306_s19 = sshll.u32 %s3303_s18, 4  ;;  %s3307_s19 = int_to_ptr.hbm [resolvable:$true] %s3306_s19 }
 0x318   : > { %v1780_v33 = vpop.permute.xlu1 %1779  ;;  %2691 = vmatpush.bf16.msrb.mxu3 %v3780_v30  ;;  %v1945_v54 = vsel %vm664_vm10, %v6987_v40, %v1938_v21  ;;  %v1949_v31 = vsel %vm664_vm10, %v1938_v21, %v6987_v40  ;;  %v4051_v28 = vld [vmem:[%s6815_s4 + $0x4] sm:$0xf]  ;;  %s4256_s24 = sshra.s32 %s3307_s19, 4  ;;  %s4257_s24 = int_to_ptr.hbm [resolvable:$true] %s4256_s24 }
 0x319   : > { %v1786_v15 = vsel %vm572_vm14, %v6988_v23, %v1780_v33  ;;  %v1790_v4 = vsel %vm572_vm14, %v1780_v33, %v6988_v23  ;;  %2664 = vmatpush.bf16.msrb.mxu1 %v3700_v61  ;;  %v1953_v46 = vmul.f32 %v1945_v54, %v6989_v5  ;;  %v1954_v59 = vmul.f32 %v1949_v31, %v6990_v32  ;;  %v345_v33 = vld [vmem:[%s6816_s5 + $0x70] sm:$0xff]  ;;  %v344_v54 = vld [vmem:[%s6816_s5 + $0x68] sm:$0xff]  ;;  %v6995_v58 = vld [vmem:[#allocation53_spill] sm:$0xff]  ;;  %s4258_s26 = scalar_lea.hbm %s4257_s24, 64  ;;  %p4263_p0 = scmp.lt.s32.totalorder %s4257_s24, %s6819_s8 }
 0x31a   : > { %v1795_v50 = vmul.f32 %v1790_v4, %v6976_v53  ;;  %v1796_v25 = vmul.f32 %v1786_v15, %v6977_v56  ;;  %2809 = vmatpush.bf16.msra.mxu0 %v3704_v60  ;;  %v5931_v31 = vor.u32 %v4051_v28, %v3613_v2  ;;  %v4056_v2 = vld [vmem:[%s6815_s4 + $0x2c] sm:$0xf]  ;;  %p4259_p11 = scmp.ne.s32.totalorder %s4257_s24, %s4258_s26  ;;  %p4264_p1 = scmp.lt.s32.totalorder %s4262_s21, %s4258_s26 }
 0x31b   : > { %v1961_v9 = vpack.c.bf16 %v1954_v59, %v1953_v46  ;;  %v6994_v46 = vld [vmem:[#allocation52_spill] sm:$0xff] }
 0x31c   : > { %v1802_v41 = vpack.c.bf16 %v1796_v25, %v1795_v50  ;;  %2692 = vmatpush.bf16.msrb.mxu3 %v3772_v52  ;;  %p4260_p12 = pnand %p4259_p11, %p4407_p5  ;;  %p4265_p2 = por %p4264_p1, %p4263_p0 }
 0x31d   : > { %1965 = vst [vmem:[#allocation3 + $0x1e0] sm:$0xff] %v1961_v9  ;;  %2665 = vmatpush.bf16.msrb.mxu1 %v3692_v36  ;;  %1979 = vrot.lane.b32.xlu2 %v5232_v37, %s6973_s13  ;;  %v6997_v9 = vld [vmem:[#allocation16_spill] sm:$0xff] }
 0x31e   : > { %1806 = vst [vmem:[#allocation3 + $0x168] sm:$0xff] %v1802_v41  ;;  %2810 = vmatpush.bf16.msra.mxu0 %v3696_v48  ;;  %1977 = vrot.lane.b32.xlu1 %v5216_v34, %s6973_s13  ;;  %v3631_v48 = vld [vmem:[%s6815_s4 + $0x28] sm:$0xf]  ;;  %s3304_s13 = sshll.u32 %s6715_s12, 4  ;;  %p4261_p13 = pneg %p4260_p12  ;;  %s3305_s13 = int_to_ptr.vmem [resolvable:$true] %s3304_s13 }
 0x31f   : > { %2147 = vperm.xlu0 %4207, %v343_v49   ;;  %v1944_v10 = vpop.permute.xlu2 %1943  ;;  %v1898_v57 = vpop.permute.xlu0 %1897  ;;  %v4058_v49 = vld [vmem:[%s6815_s4 + $0x38] sm:$0xf0] }
 0x320   : > { %2666 = vmatmul.bf16.vlgmr.msrb.gmra.mxu1 %v3612_v13  ;;  %v1948_v45 = vsel %vm664_vm10, %v6991_v42, %v1944_v10  ;;  %v1952_v37 = vsel %vm664_vm10, %v1944_v10, %v6991_v42  ;;  %v1940_v51 = vpop.permute.xlu1 %1939  ;;  %2693 = vmatpush.bf16.msrb.mxu3 %v3764_v24  ;;  %v1905_v34 = vsel %vm641_vm11, %v6992_v6, %v1898_v57  ;;  %p4266_p3 = pnand %p4265_p2, %p4261_p13 }
 0x321   : > { %2811 = vmatmul.bf16.vlgmr.msra.gmra.mxu0 %v3612_v13  ;;  %v1959_v11 = vmul.f32 %v1948_v45, %v6989_v5  ;;  %v1960_v16 = vmul.f32 %v1952_v37, %v6990_v32  ;;  %v1946_v29 = vsel %vm664_vm10, %v6993_v12, %v1940_v51  ;;  %v1950_v30 = vsel %vm664_vm10, %v1940_v51, %v6993_v12  ;;  %v349_v45 = vld [vmem:[%s6816_s5 + $0x90] sm:$0xff] }
 0x322   : > { %v1955_v61 = vmul.f32 %v1946_v29, %v6989_v5  ;;  %v1956_v22 = vmul.f32 %v1950_v30, %v6990_v32  ;;  %v1909_v21 = vsel %vm641_vm11, %v1898_v57, %v6992_v6  ;;  %v1913_v3 = vmul.f32 %v1905_v34, %v6984_v62  ;;  %v347_v57 = vld [vmem:[%s6816_s5 + $0x80] sm:$0xff]  ;;  %v6999_v6 = vld [vmem:[#allocation54_spill] sm:$0xff] }
 0x323   : > { %v1964_v60 = vpack.c.bf16 %v1960_v16, %v1959_v11  ;;  %v1914_v40 = vmul.f32 %v1909_v21, %v6985_v55  ;;  %v3632_v37 = vor.u32 %v4058_v49, %v3631_v48  ;;  %v3633_v11 = vld [vmem:[%s6815_s4 + $0x3c] sm:$0xf0] }
 0x324   : > { %v1962_v0 = vpack.c.bf16 %v1956_v22, %v1955_v61  ;;  %2694 = vmatpush.bf16.msrb.mxu3 %v3756_v26  ;;  %v7000_v16 = vld [vmem:[#allocation45_spill] sm:$0xff] }
 0x325   : > { %1968 = vst [vmem:[#allocation3 + $0x1f8] sm:$0xff] %v1964_v60  ;;  %v1921_v23 = vpack.c.bf16 %v1914_v40, %v1913_v3  ;;  %2157 = vperm.xlu2 %4206, %v345_v33   ;;  %v350_v33 = vld [vmem:[%s6816_s5 + $0x98] sm:$0xff]  ;;  %v6003_v60 = vor.u32 %v4056_v2, %v3633_v11 }
 0x326   : > { %1966 = vst [vmem:[#allocation3 + $0x1e8] sm:$0xff] %v1962_v0  ;;  %2152 = vperm.xlu1 %4205, %v344_v54   ;;  %v3875_v54 = vld [vmem:[#allocation3 + $0x170] sm:$0xf] }
 0x327   : > { %1925 = vst [vmem:[#allocation3 + $0x1c0] sm:$0xff] %v1921_v23  ;;  %2162 = vperm.xlu0 %4207, %v346_v7   ;;  %2695 = vmatmul.bf16.vlgmr.msrb.gmra.mxu3 %v5931_v31  ;;  %v1864_v15 = vpop.permute.xlu2 %1863  ;;  %v1784_v4 = vpop.permute.xlu0 %1783  ;;  %v4116_v23 = vld [vmem:[#allocation3 + $0x164] sm:$0xf0] }
 0x328   : > { %v1868_v59 = vsel %vm618_vm12, %v6994_v46, %v1864_v15  ;;  %v1872_v35 = vsel %vm618_vm12, %v1864_v15, %v6994_v46  ;;  %v1900_v18 = vpop.permute.xlu1 %1899  ;;  %v1788_v50 = vsel %vm572_vm14, %v6995_v58, %v1784_v4  ;;  %v1792_v25 = vsel %vm572_vm14, %v1784_v4, %v6995_v58  ;;  %v7001_v4 = vld [vmem:[#allocation48_spill] sm:$0xff]  ;;  %v3651_v58 = vld [vmem:[%s6815_s4 + $0x50] sm:$0xf] }
 0x329   : > { %v1879_v52 = vmul.f32 %v1872_v35, %v6996_v27  ;;  %v1880_v36 = vmul.f32 %v1868_v59, %v6997_v9  ;;  %v1906_v44 = vsel %vm641_vm11, %v6998_v43, %v1900_v18  ;;  %v1910_v41 = vsel %vm641_vm11, %v1900_v18, %v6998_v43 }
 0x32a   : > { %v1915_v13 = vmul.f32 %v1906_v44, %v6984_v62  ;;  %v1916_v14 = vmul.f32 %v1910_v41, %v6985_v55  ;;  %v1799_v17 = vmul.f32 %v1792_v25, %v6976_v53  ;;  %v1800_v24 = vmul.f32 %v1788_v50, %v6977_v56  ;;  %v3859_v41 = vld [vmem:[#allocation3 + $0x150] sm:$0xf] }
 0x32b   : > { %v1884_v10 = vpack.c.bf16 %v1880_v36, %v1879_v52  ;;  %v3867_v52 = vld [vmem:[#allocation3 + $0x160] sm:$0xf] }
 0x32c   : > { %v1922_v26 = vpack.c.bf16 %v1916_v14, %v1915_v13  ;;  %v1804_v42 = vpack.c.bf16 %v1800_v24, %v1799_v17  ;;  %v3868_v43 = vor.u32 %v4116_v23, %v3867_v52  ;;  %v4134_v49 = vld [vmem:[#allocation3 + $0x1f4] sm:$0xf0] }
 0x32d   : > { %1888 = vst [vmem:[#allocation3 + $0x1b8] sm:$0xff] %v1884_v10  ;;  %2172 = vperm.xlu2 %4206, %v348_v47   ;;  %v4132_v24 = vld [vmem:[#allocation3 + $0x1e4] sm:$0xf0]  ;;  %v3851_v10 = vld [vmem:[#allocation3 + $0x140] sm:$0xf] }
 0x32e   : > { %1926 = vst [vmem:[#allocation3 + $0x1c8] sm:$0xff] %v1922_v26  ;;  %2167 = vperm.xlu1 %4205, %v347_v57   ;;  %v4061_v57 = vld [vmem:[%s6815_s4 + $0x54] sm:$0xf]  ;;  %v3653_v26 = vld [vmem:[%s6815_s4 + $0x64] sm:$0xf0] }
 0x32f   : > { %1808 = vst [vmem:[#allocation3 + $0x178] sm:$0xff] %v1804_v42  ;;  %2177 = vperm.xlu0 %4207, %v349_v45   ;;  %v5976_v53 = vpop.permute.xlu2 %1849  ;;  %v1744_v56 = vpop.permute.xlu0 %1743 }
 0x330   : > { %2671 = vmatmul.bf16.gmra.mxu1 %v3632_v37  ;;  %v1942_v51 = vpop.permute.xlu1 %1941  ;;  %v1748_v34 = vsel %vm549_vm15, %v6999_v6, %v1744_v56  ;;  %v1752_v28 = vsel %vm549_vm15, %v1744_v56, %v6999_v6  ;;  %v7002_v56 = vld [vmem:[#allocation7_spill] sm:$0xff]  ;;  %v7003_v6 = vld [vmem:[#allocation8_spill] sm:$0xff] }
 0x331   : > { %2816 = vmatmul.bf16.gmra.mxu0 %v3632_v37  ;;  %v1947_v12 = vsel %vm664_vm10, %v7000_v16, %v1942_v51  ;;  %v1951_v29 = vsel %vm664_vm10, %v1942_v51, %v7000_v16  ;;  %v1759_v30 = vmul.f32 %v1752_v28, %v6970_v38  ;;  %v1760_v61 = vmul.f32 %v1748_v34, %v6971_v63  ;;  %v3931_v37 = vld [vmem:[#allocation3 + $0x1e0] sm:$0xf]  ;;  %v4112_v28 = vld [vmem:[#allocation3 + $0x144] sm:$0xf0] }
 0x332   : > { %v1957_v22 = vmul.f32 %v1947_v12, %v6989_v5  ;;  %v1958_v21 = vmul.f32 %v1951_v29, %v6990_v32  ;;  %v3932_v2 = vor.u32 %v4132_v24, %v3931_v37  ;;  %v3852_v16 = vor.u32 %v4112_v28, %v3851_v10  ;;  %v4066_v24 = vld [vmem:[%s6815_s4 + $0x7c] sm:$0xf] }
 0x333   : > { %v1764_v3 = vpack.c.bf16 %v1760_v61, %v1759_v30  ;;  %v6040_v12 = vor.u32 %v4061_v57, %v3653_v26  ;;  %v3923_v30 = vld [vmem:[#allocation3 + $0x1d0] sm:$0xf]  ;;  %vm3020_vm10 = vcmask 31744  }
 0x334   : > { %v1963_v40 = vpack.c.bf16 %v1958_v21, %v1957_v22  ;;  %v4110_v22 = vld [vmem:[#allocation3 + $0x134] sm:$0xf0] }
 0x335   : > { %1768 = vst [vmem:[#allocation3 + $0x158] sm:$0xff] %v1764_v3  ;;  %v3843_v3 = vld [vmem:[#allocation3 + $0x130] sm:$0xf] }
 0x336   : > { %1967 = vst [vmem:[#allocation3 + $0x1f0] sm:$0xff] %v1963_v40  ;;  %2182 = vperm.xlu1 %4205, %v350_v33   ;;  %v4118_v0 = vld [vmem:[#allocation3 + $0x174] sm:$0xf0]  ;;  %v3844_v40 = vor.u32 %v4110_v22, %v3843_v3 }
 0x337   : > { %2700 = vmatmul.bf16.gmra.mxu3 %v6003_v60  ;;  %v1904_v38 = vpop.permute.xlu0 %1903  ;;  %v3876_v63 = vor.u32 %v4118_v0, %v3875_v54  ;;  %v1860_v15 = vpop.permute.xlu2 %1859  ;;  %v4128_v54 = vld [vmem:[#allocation3 + $0x1c4] sm:$0xf0] }
 0x338   : > { %v1862_v5 = vpop.permute.xlu1 %1861  ;;  %v1908_v32 = vsel %vm641_vm11, %v5528_v1, %v1904_v38  ;;  %v1912_v7 = vsel %vm641_vm11, %v1904_v38, %v5528_v1  ;;  %v4063_v1 = vld [vmem:[%s6815_s4 + $0x60] sm:$0xf0] }
 0x339   : > { %v1867_v46 = vsel %vm618_vm12, %v7001_v4, %v1862_v5  ;;  %v1871_v59 = vsel %vm618_vm12, %v1862_v5, %v7001_v4  ;;  %v1919_v35 = vmul.f32 %v1908_v32, %v6984_v62  ;;  %v1920_v18 = vmul.f32 %v1912_v7, %v6985_v55  ;;  %2716 = vmatpush.bf16.msra.mxu1 %v3876_v63  ;;  %v4108_v5 = vld [vmem:[#allocation3 + $0x124] sm:$0xf0] }
 0x33a   : > { %v1877_v50 = vmul.f32 %v1871_v59, %v6996_v27  ;;  %v1878_v25 = vmul.f32 %v1867_v46, %v6997_v9  ;;  %v3652_v62 = vor.u32 %v4063_v1, %v3651_v58  ;;  %v3915_v46 = vld [vmem:[#allocation3 + $0x1c0] sm:$0xf]  ;;  %v3671_v59 = vld [vmem:[%s6815_s4 + $0x78] sm:$0xf] }
 0x33b   : > { %v1924_v36 = vpack.c.bf16 %v1920_v18, %v1919_v35  ;;  %v3835_v58 = vld [vmem:[#allocation3 + $0x120] sm:$0xf] }
 0x33c   : > { %v1883_v44 = vpack.c.bf16 %v1878_v25, %v1877_v50  ;;  %v4114_v55 = vld [vmem:[#allocation3 + $0x154] sm:$0xf0]  ;;  %v3836_v50 = vor.u32 %v4108_v5, %v3835_v58 }
 0x33d   : > { %1928 = vst [vmem:[#allocation3 + $0x1d8] sm:$0xff] %v1924_v36  ;;  %2717 = vmatpush.bf16.msra.mxu1 %v3868_v43  ;;  %v3939_v48 = vld [vmem:[#allocation3 + $0x1f0] sm:$0xf]  ;;  %v3860_v13 = vor.u32 %v4114_v55, %v3859_v41 }
 0x33e   : > { %1887 = vst [vmem:[#allocation3 + $0x1b0] sm:$0xff] %v1883_v44  ;;  %v3940_v14 = vor.u32 %v4134_v49, %v3939_v48  ;;  %v4126_v44 = vld [vmem:[#allocation3 + $0x1b4] sm:$0xf0]  ;;  %v3827_v48 = vld [vmem:[#allocation3 + $0x110] sm:$0xf] }
 0x33f   : > { %v2022_v17 = vpop.permute.xlu0 %2021  ;;  %v1690_v11 = vpop.permute.xlu2 %1689 }
 0x340   : > { %2676 = vmatmul.bf16.gmra.mxu1 %v3652_v62  ;;  %v2014_v47 = vpop.permute.xlu1 %2013  ;;  %2745 = vmatpush.bf16.msra.mxu3 %v3940_v14 }
 0x341   : > { %2821 = vmatmul.bf16.gmra.mxu0 %v3652_v62  ;;  %v2027_v42 = vsel %vm710_vm6, %v2014_v47, %v2022_v17  ;;  %v2031_v45 = vsel %vm710_vm6, %v2022_v17, %v2014_v47  ;;  %2718 = vmatpush.bf16.msra.mxu1 %v3860_v13  ;;  %v4106_v62 = vld [vmem:[#allocation3 + $0x114] sm:$0xf0]  ;;  %v3673_v47 = vld [vmem:[%s6815_s4 + $0x8c] sm:$0xf0] }
 0x342   : > { %v2037_v51 = vmul.f32 %v2027_v42, %v7002_v56  ;;  %v2038_v34 = vmul.f32 %v2031_v45, %v7003_v6  ;;  %v3828_v17 = vor.u32 %v4106_v62, %v3827_v48  ;;  %v3805_v62 = vld [vmem:[#allocation3 + $0xe8] sm:$0xf0]  ;;  %v7004_v48 = vld [vmem:[#allocation17_spill] sm:$0xff] }
 0x344   : > { %v2043_v29 = vpack.c.bf16 %v2038_v34, %v2037_v51  ;;  %2746 = vmatpush.bf16.msra.mxu3 %v3932_v2  ;;  %v4130_v61 = vld [vmem:[#allocation3 + $0x1d4] sm:$0xf0]  ;;  %v6085_v34 = vor.u32 %v4066_v24, %v3673_v47  ;;  %v4099_v47 = vld [vmem:[#allocation3 + $0xe4] sm:$0xf] }
 0x345   : > { %2719 = vmatpush.bf16.msra.mxu1 %v3852_v16  ;;  %v3924_v21 = vor.u32 %v4130_v61, %v3923_v30  ;;  %v3907_v25 = vld [vmem:[#allocation3 + $0x1b0] sm:$0xf] }
 0x346   : > { %2047 = vst [vmem:[#allocation3 + $0x230] sm:$0xff] %v2043_v29  ;;  %v3908_v41 = vor.u32 %v4126_v44, %v3907_v25 }
 0x347   : > { %2705 = vmatmul.bf16.gmra.mxu3 %v6040_v12  ;;  %v1852_v33 = vpop.permute.xlu0 %1851  ;;  %v6063_v43 = vpop.permute.xlu2 %2011 }
 0x348   : > { %v2024_v0 = vpop.permute.xlu1 %2023  ;;  %2747 = vmatpush.bf16.msra.mxu3 %v3924_v21  ;;  %v1866_v38 = vsel %vm618_vm12, %v1852_v33, %v1860_v15  ;;  %v1870_v63 = vsel %vm618_vm12, %v1860_v15, %v1852_v33  ;;  %v4068_v15 = vld [vmem:[%s6815_s4 + $0x88] sm:$0xf0] }
 0x349   : > { %v2028_v32 = vsel %vm710_vm6, %v5864_v19, %v2024_v0  ;;  %v2032_v7 = vsel %vm710_vm6, %v2024_v0, %v5864_v19  ;;  %v1875_v23 = vmul.f32 %v1870_v63, %v6996_v27  ;;  %v1876_v4 = vmul.f32 %v1866_v38, %v6997_v9  ;;  %2720 = vmatpush.bf16.msra.mxu1 %v3844_v40 }
 0x34a   : > { %v2039_v35 = vmul.f32 %v2028_v32, %v7002_v56  ;;  %v2040_v18 = vmul.f32 %v2032_v7, %v7003_v6  ;;  %v3916_v19 = vor.u32 %v4128_v54, %v3915_v46  ;;  %v3672_v36 = vor.u32 %v4068_v15, %v3671_v59  ;;  %v4101_v46 = vld [vmem:[#allocation3 + $0xf4] sm:$0xf]  ;;  %v3619_v59 = vld [vmem:[%s6815_s4 + $0x8] sm:$0xf]  ;;  %v4054_v15 = vld [vmem:[%s6815_s4 + $0x18] sm:$0xf0] }
 0x34b   : > { %v1882_v1 = vpack.c.bf16 %v1876_v4, %v1875_v23  ;;  %v6111_v25 = vor.u32 %v4054_v15, %v3619_v59 }
 0x34c   : > { %v2044_v52 = vpack.c.bf16 %v2040_v18, %v2039_v35  ;;  %2748 = vmatpush.bf16.msra.mxu3 %v3916_v19  ;;  %v3813_v19 = vld [vmem:[#allocation3 + $0xf8] sm:$0xf0] }
 0x34d   : > { %1886 = vst [vmem:[#allocation3 + $0x1a8] sm:$0xff] %v1882_v1  ;;  %2721 = vmatpush.bf16.msra.mxu1 %v3836_v50  ;;  %v3971_v2 = vld [vmem:[#allocation3 + $0x230] sm:$0xf]  ;;  %v3816_v50 = vor.u32 %v4101_v46, %v3813_v19  ;;  %v3781_v46 = vld [vmem:[#allocation3 + $0xb8] sm:$0xf0] }
 0x34e   : > { %2048 = vst [vmem:[#allocation3 + $0x238] sm:$0xff] %v2044_v52 }
 0x34f   : > { %v1682_v55 = vpop.permute.xlu0 %1681  ;;  %v6089_v61 = vpop.permute.xlu2 %1813 }
 0x350   : > { %2681 = vmatmul.bf16.gmra.mxu1 %v3672_v36  ;;  %v1858_v49 = vpop.permute.xlu1 %1857  ;;  %2749 = vmatpush.bf16.msra.mxu3 %v3908_v41  ;;  %v1697_v13 = vsel %vm526_vm8, %v1682_v55, %v1690_v11  ;;  %v1701_v14 = vsel %vm526_vm8, %v1690_v11, %v1682_v55  ;;  %v4141_v11 = vld [vmem:[#allocation3 + $0x234] sm:$0xf] }
 0x351   : > { %2826 = vmatmul.bf16.gmra.mxu0 %v3672_v36  ;;  %v1865_v10 = vsel %vm618_vm12, %v5976_v53, %v1858_v49  ;;  %v1869_v57 = vsel %vm618_vm12, %v1858_v49, %v5976_v53  ;;  %v1705_v26 = vmul.f32 %v1697_v13, %v4998_v39  ;;  %v1706_v42 = vmul.f32 %v1701_v14, %v5001_v20  ;;  %v7005_v13 = vld [vmem:[#allocation18_spill] sm:$0xff] }
 0x352   : > { %v1873_v45 = vmul.f32 %v1869_v57, %v6996_v27  ;;  %v1874_v37 = vmul.f32 %v1865_v10, %v6997_v9  ;;  %2722 = vmatpush.bf16.msra.mxu1 %v3828_v17 }
 0x353   : > { %v1713_v51 = vpack.c.bf16 %v1706_v42, %v1705_v26  ;;  %v3808_v26 = vor.u32 %v4099_v47, %v3805_v62  ;;  %v3765_v62 = vld [vmem:[#allocation3 + $0x98] sm:$0xf0] }
 0x354   : > { %v1881_v28 = vpack.c.bf16 %v1874_v37, %v1873_v45  ;;  %v4124_v0 = vld [vmem:[#allocation3 + $0x1a4] sm:$0xf0]  ;;  %v3797_v45 = vld [vmem:[#allocation3 + $0xd8] sm:$0xf0] }
 0x355   : > { %1717 = vst [vmem:[#allocation3 + $0x100] sm:$0xff] %v1713_v51  ;;  %v4142_v16 = vld [vmem:[#allocation3 + $0x234] sm:$0xf0]  ;;  %v3973_v29 = vld [vmem:[#allocation3 + $0x238] sm:$0xf0] }
 0x356   : > { %1885 = vst [vmem:[#allocation3 + $0x1a0] sm:$0xff] %v1881_v28  ;;  %v3972_v53 = vor.u32 %v4142_v16, %v3971_v2  ;;  %v6087_v30 = vor.u32 %v4141_v11, %v3973_v29  ;;  %v3789_v28 = vld [vmem:[#allocation3 + $0xc8] sm:$0xf0] }
 0x357   : > { %2710 = vmatmul.bf16.gmra.mxu3 %v6085_v34  ;;  %v1692_v27 = vpop.permute.xlu0 %1691  ;;  %v1824_v32 = vpop.permute.xlu2 %1823 }
 0x358   : > { %v1684_v9 = vpop.permute.xlu1 %1683  ;;  %2778 = vmatpush.bf16.msra.mxu2 %v3972_v53  ;;  %2923 = vmatpush.bf16.msrb.mxu0 %v6087_v30 }
 0x359   : > { %v1698_v22 = vsel %vm526_vm8, %v1684_v9, %v1692_v27  ;;  %v1702_v21 = vsel %vm526_vm8, %v1692_v27, %v1684_v9  ;;  %v4095_v27 = vld [vmem:[#allocation3 + $0xc4] sm:$0xf]  ;;  %v7008_v9 = vld [vmem:[#allocation9_spill] sm:$0xff]  ;;  %vm2645_vm8 = vcmask 523264  }
 0x35a   : > { %v1707_v3 = vmul.f32 %v1698_v22, %v4998_v39  ;;  %v1708_v33 = vmul.f32 %v1702_v21, %v5001_v20  ;;  %v7009_v21 = vld [vmem:[#allocation10_spill] sm:$0xff] }
 0x35c   : > { %v1714_v40 = vpack.c.bf16 %v1708_v33, %v1707_v3  ;;  %v3819_v35 = vld [vmem:[#allocation3 + $0x100] sm:$0xf]  ;;  %v3792_v33 = vor.u32 %v4095_v27, %v3789_v28 }
 0x35d   : > { %v3899_v54 = vld [vmem:[#allocation3 + $0x1a0] sm:$0xf] }
 0x35e   : > { %1718 = vst [vmem:[#allocation3 + $0x108] sm:$0xff] %v1714_v40  ;;  %v3900_v38 = vor.u32 %v4124_v0, %v3899_v54  ;;  %v4093_v40 = vld [vmem:[#allocation3 + $0xb4] sm:$0xf]  ;;  %v3639_v0 = vld [vmem:[%s6815_s4 + $0x30] sm:$0xf] }
 0x35f   : > { %v2018_v63 = vpop.permute.xlu0 %2017  ;;  %v1982_v10 = vpop.permute.xlu2 %1981  ;;  %v3784_v59 = vor.u32 %v4093_v40, %v3781_v46 }
 0x360   : > { %v2010_v5 = vpop.permute.xlu1 %2009  ;;  %2750 = vmatpush.bf16.msra.mxu3 %v3900_v38  ;;  %v4059_v38 = vld [vmem:[%s6815_s4 + $0x40] sm:$0xf0] }
 0x361   : > { %v2025_v7 = vsel %vm710_vm6, %v2010_v5, %v2018_v63  ;;  %v2029_v23 = vsel %vm710_vm6, %v2018_v63, %v2010_v5  ;;  %v6148_v63 = vpop.f32.mrf.mxu1  ;;  %v6154_v15 = vor.u32 %v4059_v38, %v3639_v0 }
 0x362   : > { %v2033_v4 = vmul.f32 %v2025_v7, %v7002_v56  ;;  %v2034_v39 = vmul.f32 %v2029_v23, %v7003_v6 }
 0x364   : > { %v2041_v20 = vpack.c.bf16 %v2034_v39, %v2033_v4 }
 0x365   : > { %v4104_v18 = vld [vmem:[#allocation3 + $0x104] sm:$0xf0] }
 0x366   : > { %2045 = vst [vmem:[#allocation3 + $0x220] sm:$0xff] %v2041_v20  ;;  %v3820_v58 = vor.u32 %v4104_v18, %v3819_v35  ;;  %v3773_v18 = vld [vmem:[#allocation3 + $0xa8] sm:$0xf0] }
 0x367   : > { %v1816_v1 = vpop.permute.xlu0 %1815  ;;  %v6150_v5 = vpop.permute.xlu2 %1811 }
 0x368   : > { %v2020_v52 = vpop.permute.xlu1 %2019  ;;  %v1828_v36 = vsel %vm595_vm13, %v1816_v1, %v1824_v32  ;;  %v1832_v44 = vsel %vm595_vm13, %v1824_v32, %v1816_v1  ;;  %2723 = vmatpush.bf16.msra.mxu1 %v3820_v58 }
 0x369   : > { %v2026_v41 = vsel %vm710_vm6, %v6063_v43, %v2020_v52  ;;  %v2030_v55 = vsel %vm710_vm6, %v2020_v52, %v6063_v43  ;;  %v1839_v49 = vmul.f32 %v1832_v44, %v7004_v48  ;;  %v1840_v14 = vmul.f32 %v1828_v36, %v7005_v13  ;;  %v4097_v43 = vld [vmem:[#allocation3 + $0xd4] sm:$0xf]  ;;  %vm7014_vm6 = vmmov %vm7006_vm0 }
 0x36a   : > { %v2035_v17 = vmul.f32 %v2026_v41, %v7002_v56  ;;  %v2036_v24 = vmul.f32 %v2030_v55, %v7003_v6  ;;  %v3800_v37 = vor.u32 %v4097_v43, %v3797_v45 }
 0x36b   : > { %v1844_v57 = vpack.c.bf16 %v1840_v14, %v1839_v49  ;;  %2724 = vmatmul.bf16.vlgmr.msra.gmra.mxu1 %v6111_v25 }
 0x36c   : > { %2832 = vmatpush.bf16.msrb.mxu1 %v3816_v50  ;;  %v2042_v42 = vpack.c.bf16 %v2036_v24, %v2035_v17  ;;  %v4091_v50 = vld [vmem:[#allocation3 + $0xa4] sm:$0xf]  ;;  %v4089_v17 = vld [vmem:[#allocation3 + $0x94] sm:$0xf]  ;;  %v6164_v24 = vpop.f32.mrf.mxu1 }
 0x36d   : > { %1848 = vst [vmem:[#allocation3 + $0x198] sm:$0xff] %v1844_v57  ;;  %v3963_v54 = vld [vmem:[#allocation3 + $0x220] sm:$0xf]  ;;  %v4139_v23 = vld [vmem:[#allocation3 + $0x224] sm:$0xf]  ;;  %v3776_v44 = vor.u32 %v4091_v50, %v3773_v18 }
 0x36e   : > { %2046 = vst [vmem:[#allocation3 + $0x228] sm:$0xff] %v2042_v42  ;;  %v3877_v50 = vld [vmem:[#allocation3 + $0x178] sm:$0xf0] }
 0x36f   : > { %v1970_v47 = vpop.permute.xlu2 %1969 }
 0x370   : > { %2833 = vmatpush.bf16.msrb.mxu1 %v3808_v26  ;;  %v1822_v51 = vpop.permute.xlu1 %1821  ;;  %v4087_v26 = vld [vmem:[#allocation3 + $0x84] sm:$0xf] }
 0x371   : > { %v1827_v56 = vsel %vm595_vm13, %v6089_v61, %v1822_v51  ;;  %v1831_v6 = vsel %vm595_vm13, %v1822_v51, %v6089_v61  ;;  %v1974_v2 = vpop.permute.xlu0 %1973  ;;  %v6170_v51 = vpop.f32.mrf.mxu3 }
 0x372   : > { %v1837_v11 = vmul.f32 %v1831_v6, %v7004_v48  ;;  %v1838_v16 = vmul.f32 %v1827_v56, %v7005_v13  ;;  %v1987_v29 = vsel %vm7006_vm0, %v1974_v2, %v1982_v10  ;;  %v1991_v53 = vsel %vm7007_vm1, %v1982_v10, %v1974_v2  ;;  %v3659_v2 = vld [vmem:[%s6815_s4 + $0x58] sm:$0xf] }
 0x373   : > { %v1997_v22 = vmul.f32 %v1987_v29, %v7008_v9  ;;  %v1998_v3 = vmul.f32 %v1991_v53, %v7009_v21  ;;  %v3768_v10 = vor.u32 %v4089_v17, %v3765_v62 }
 0x374   : > { %2834 = vmatpush.bf16.msrb.mxu1 %v3800_v37  ;;  %v1843_v61 = vpack.c.bf16 %v1838_v16, %v1837_v11  ;;  %v4122_v49 = vld [vmem:[#allocation3 + $0x194] sm:$0xf0]  ;;  %v3757_v37 = vld [vmem:[#allocation3 + $0x88] sm:$0xf0]  ;;  %v4064_v11 = vld [vmem:[%s6815_s4 + $0x68] sm:$0xf0] }
 0x375   : > { %v2003_v32 = vpack.c.bf16 %v1998_v3, %v1997_v22  ;;  %v4140_v7 = vld [vmem:[#allocation3 + $0x224] sm:$0xf0]  ;;  %v3965_v4 = vld [vmem:[#allocation3 + $0x228] sm:$0xf0]  ;;  %v3760_v6 = vor.u32 %v4087_v26, %v3757_v37  ;;  %v6181_v40 = vor.u32 %v4064_v11, %v3659_v2  ;;  %v3627_v37 = vld [vmem:[%s6815_s4 + $0x10] sm:$0xf] }
 0x376   : > { %1847 = vst [vmem:[#allocation3 + $0x190] sm:$0xff] %v1843_v61  ;;  %v3964_v39 = vor.u32 %v4140_v7, %v3963_v54  ;;  %v6152_v20 = vor.u32 %v4139_v23, %v3965_v4  ;;  %v6183_v54 = vpop.f32.mrf.mxu1 }
 0x377   : > { %2007 = vst [vmem:[#allocation3 + $0x210] sm:$0xff] %v2003_v32  ;;  %v1980_v0 = vpop.permute.xlu2 %1979 }
 0x378   : > { %2835 = vmatpush.bf16.msrb.mxu1 %v3792_v33  ;;  %v1976_v35 = vpop.permute.xlu1 %1975  ;;  %2779 = vmatpush.bf16.msra.mxu2 %v3964_v39 }
 0x379   : > { %2924 = vmatpush.bf16.msrb.mxu0 %v6152_v20  ;;  %v1984_v58 = vpop.permute.xlu0 %1983 }
 0x37a   : > { %v1988_v19 = vsel %vm7010_vm2, %v1976_v35, %v1984_v58  ;;  %v1992_v1 = vsel %vm7011_vm3, %v1984_v58, %v1976_v35  ;;  %v6201_v35 = vpop.f32.mrf.mxu3 }
 0x37b   : > { %v1999_v52 = vmul.f32 %v1988_v19, %v7008_v9  ;;  %v2000_v36 = vmul.f32 %v1992_v1, %v7009_v21  ;;  %2729 = vmatmul.bf16.gmra.mxu1 %v6154_v15 }
 0x37c   : > { %2836 = vmatpush.bf16.msrb.mxu1 %v3784_v59 }
 0x37d   : > { %v2004_v41 = vpack.c.bf16 %v2000_v36, %v1999_v52  ;;  %v3891_v55 = vld [vmem:[#allocation3 + $0x190] sm:$0xf] }
 0x37e   : > { %v3892_v14 = vor.u32 %v4122_v49, %v3891_v55  ;;  %v3955_v29 = vld [vmem:[#allocation3 + $0x210] sm:$0xf]  ;;  %v4137_v27 = vld [vmem:[#allocation3 + $0x214] sm:$0xf]  ;;  %v6209_v1 = vpop.f32.mrf.mxu1 }
 0x37f   : > { %2008 = vst [vmem:[#allocation3 + $0x218] sm:$0xff] %v2004_v41  ;;  %v3679_v52 = vld [vmem:[%s6815_s4 + $0x80] sm:$0xf]  ;;  %v4117_v55 = vld [vmem:[#allocation3 + $0x174] sm:$0xf] }
 0x380   : > { %2837 = vmatpush.bf16.msrb.mxu1 %v3776_v44  ;;  %v1810_v57 = vpop.permute.xlu1 %1809  ;;  %2751 = vmatpush.bf16.msra.mxu3 %v3892_v14  ;;  %v4069_v44 = vld [vmem:[%s6815_s4 + $0x90] sm:$0xf0]  ;;  %v3880_v14 = vor.u32 %v4117_v55, %v3877_v50  ;;  %v3837_v50 = vld [vmem:[#allocation3 + $0x128] sm:$0xf0]  ;;  %v3829_v55 = vld [vmem:[#allocation3 + $0x118] sm:$0xf0] }
 0x381   : > { %v1818_v42 = vpop.permute.xlu0 %1817  ;;  %v6225_v17 = vor.u32 %v4069_v44, %v3679_v52 }
 0x382   : > { %v1825_v45 = vsel %vm595_vm13, %v1810_v57, %v1818_v42  ;;  %v1829_v43 = vsel %vm595_vm13, %v1818_v42, %v1810_v57  ;;  %v6223_v49 = vpop.f32.mrf.mxu3  ;;  %v4115_v57 = vld [vmem:[#allocation3 + $0x164] sm:$0xf]  ;;  %v3861_v42 = vld [vmem:[#allocation3 + $0x158] sm:$0xf0] }
 0x383   : > { %v1833_v28 = vmul.f32 %v1829_v43, %v7004_v48  ;;  %v1834_v56 = vmul.f32 %v1825_v45, %v7005_v13  ;;  %v4133_v45 = vld [vmem:[#allocation3 + $0x1f4] sm:$0xf] }
 0x384   : > { %2838 = vmatpush.bf16.msrb.mxu1 %v3768_v10  ;;  %v3869_v10 = vld [vmem:[#allocation3 + $0x168] sm:$0xf0] }
 0x385   : > { %v1841_v16 = vpack.c.bf16 %v1834_v56, %v1833_v28  ;;  %v3872_v26 = vor.u32 %v4115_v57, %v3869_v10  ;;  %v4055_v28 = vld [vmem:[%s6815_s4 + $0x20] sm:$0xf0]  ;;  %v4060_v10 = vld [vmem:[%s6815_s4 + $0x48] sm:$0xf0] }
 0x386   : > { %v4138_v53 = vld [vmem:[#allocation3 + $0x214] sm:$0xf0]  ;;  %v3957_v22 = vld [vmem:[#allocation3 + $0x218] sm:$0xf0] }
 0x387   : > { %1845 = vst [vmem:[#allocation3 + $0x180] sm:$0xff] %v1841_v16  ;;  %v3956_v3 = vor.u32 %v4138_v53, %v3955_v29  ;;  %v3960_v33 = vor.u32 %v4137_v27, %v3957_v22  ;;  %v4113_v53 = vld [vmem:[#allocation3 + $0x154] sm:$0xf]  ;;  %v3941_v22 = vld [vmem:[#allocation3 + $0x1f8] sm:$0xf0] }
 0x388   : > { %2839 = vmatpush.bf16.msrb.mxu1 %v3760_v6  ;;  %v1820_v61 = vpop.permute.xlu1 %1819  ;;  %v3864_v27 = vor.u32 %v4113_v53, %v3861_v42  ;;  %v4105_v42 = vld [vmem:[#allocation3 + $0x114] sm:$0xf]  ;;  %v4062_v53 = vld [vmem:[%s6815_s4 + $0x5c] sm:$0xf] }
 0x389   : > { %v1826_v38 = vsel %vm595_vm13, %v6150_v5, %v1820_v61  ;;  %2780 = vmatpush.bf16.msra.mxu2 %v3956_v3  ;;  %v1972_v32 = vpop.permute.xlu0 %1971  ;;  %2925 = vmatpush.bf16.msrb.mxu0 %v3960_v33  ;;  %v3628_v3 = vor.u32 %v4055_v28, %v3627_v37  ;;  %v3821_v28 = vld [vmem:[#allocation3 + $0x108] sm:$0xf0] }
 0x38a   : > { %v1836_v23 = vmul.f32 %v1826_v38, %v7005_v13  ;;  %v1986_v4 = vsel %vm7012_vm4, %v1972_v32, %v1980_v0  ;;  %v1990_v39 = vsel %vm7013_vm5, %v1980_v0, %v1972_v32  ;;  %v4111_v0 = vld [vmem:[#allocation3 + $0x144] sm:$0xf]  ;;  %v3933_v38 = vld [vmem:[#allocation3 + $0x1e8] sm:$0xf0] }
 0x38b   : > { %v1995_v46 = vmul.f32 %v1986_v4, %v7008_v9  ;;  %v1996_v59 = vmul.f32 %v1990_v39, %v7009_v21  ;;  %2734 = vmatmul.bf16.gmra.mxu1 %v6181_v40  ;;  %v3845_v4 = vld [vmem:[#allocation3 + $0x138] sm:$0xf0]  ;;  %v4057_v39 = vld [vmem:[%s6815_s4 + $0x34] sm:$0xf] }
 0x38c   : > { %4144 = vmatpush.bf16.msra.mxu1 %v6087_v30  ;;  %v1830_v30 = vsel %vm595_vm13, %v1820_v61, %v6150_v5  ;;  %v6237_v61 = vpop.f32.mrf.mxu3 }
 0x38d   : > { %v1835_v7 = vmul.f32 %v1830_v30, %v7004_v48  ;;  %v2002_v48 = vpack.c.bf16 %v1996_v59, %v1995_v46  ;;  %v3853_v30 = vld [vmem:[#allocation3 + $0x148] sm:$0xf0]  ;;  %v3641_v46 = vld [vmem:[%s6815_s4 + $0x44] sm:$0xf0] }
 0x38e   : > { %v3856_v32 = vor.u32 %v4111_v0, %v3853_v30 }
 0x38f   : > { %v1842_v5 = vpack.c.bf16 %v1836_v23, %v1835_v7  ;;  %2006 = vst [vmem:[#allocation3 + $0x208] sm:$0xff] %v2002_v48  ;;  %v4131_v7 = vld [vmem:[#allocation3 + $0x1e4] sm:$0xf]  ;;  %v4109_v48 = vld [vmem:[#allocation3 + $0x134] sm:$0xf] }
 0x390   : > { %4145 = vmatpush.bf16.msra.mxu1 %v6152_v20  ;;  %v1978_v13 = vpop.permute.xlu1 %1977  ;;  %v3936_v23 = vor.u32 %v4131_v7, %v3933_v38  ;;  %v6276_v38 = vpop.permute.xlu2 %2157 }
 0x391   : > { %1846 = vst [vmem:[#allocation3 + $0x188] sm:$0xff] %v1842_v5  ;;  %v1985_v18 = vsel %vm7014_vm6, %v1970_v47, %v1978_v13  ;;  %v1989_v20 = vsel %vm7015_vm7, %v1978_v13, %v1970_v47  ;;  %v3925_v5 = vld [vmem:[#allocation3 + $0x1d8] sm:$0xf0]  ;;  %v3848_v13 = vor.u32 %v4109_v48, %v3845_v4  ;;  %v4065_v48 = vld [vmem:[%s6815_s4 + $0x70] sm:$0xf0] }
 0x392   : > { %v1993_v58 = vmul.f32 %v1985_v18, %v7008_v9  ;;  %v1994_v19 = vmul.f32 %v1989_v20, %v7009_v21  ;;  %v3621_v9 = vld [vmem:[%s6815_s4 + $0x1c] sm:$0xf0]  ;;  %v3883_v21 = vld [vmem:[#allocation3 + $0x180] sm:$0xf]  ;;  %v4129_v18 = vld [vmem:[#allocation3 + $0x1d4] sm:$0xf]  ;;  %v6249_v20 = vor.u32 %v4057_v39, %v3641_v46 }
 0x393   : > { %v6227_v47 = vor.u32 %v4052_v8, %v3621_v9  ;;  %v4107_v8 = vld [vmem:[#allocation3 + $0x124] sm:$0xf] }
 0x394   : > { %4146 = vmatpush.bf16.msra.mxu1 %v3960_v33  ;;  %v2001_v36 = vpack.c.bf16 %v1994_v19, %v1993_v58  ;;  %v3944_v33 = vor.u32 %v4133_v45, %v3941_v22  ;;  %v6251_v58 = vpop.permute.xlu0 %2147  ;;  %v3928_v19 = vor.u32 %v4129_v18, %v3925_v5  ;;  %v3832_v45 = vor.u32 %v4105_v42, %v3829_v55  ;;  %v4121_v22 = vld [vmem:[#allocation3 + $0x194] sm:$0xf]  ;;  %v4119_v39 = vld [vmem:[#allocation3 + $0x184] sm:$0xf]  ;;  %v3667_v5 = vld [vmem:[%s6815_s4 + $0x60] sm:$0xf] }
 0x395   : > { %v3668_v18 = vor.u32 %v4065_v48, %v3667_v5 }
 0x396   : > { %2005 = vst [vmem:[#allocation3 + $0x200] sm:$0xff] %v2001_v36  ;;  %v4136_v43 = vld [vmem:[#allocation3 + $0x204] sm:$0xf0]  ;;  %v3949_v11 = vld [vmem:[#allocation3 + $0x208] sm:$0xf0] }
 0x397   : > { %v3917_v36 = vld [vmem:[#allocation3 + $0x1c8] sm:$0xf0] }
 0x398   : > { %v4120_v62 = vld [vmem:[#allocation3 + $0x184] sm:$0xf0]  ;;  %v3885_v7 = vld [vmem:[#allocation3 + $0x188] sm:$0xf0] }
 0x399   : > { %v3884_v41 = vor.u32 %v4120_v62, %v3883_v21  ;;  %v3840_v21 = vor.u32 %v4107_v8, %v3837_v50  ;;  %v4127_v62 = vld [vmem:[#allocation3 + $0x1c4] sm:$0xf]  ;;  %v3888_v46 = vor.u32 %v4119_v39, %v3885_v7  ;;  %v3681_v8 = vld [vmem:[%s6815_s4 + $0x94] sm:$0xf0] }
 0x39b   : > { %2752 = vmatpush.bf16.msra.mxu3 %v3884_v41  ;;  %2739 = vmatmul.bf16.gmra.mxu1 %v6225_v17  ;;  %v3920_v41 = vor.u32 %v4127_v62, %v3917_v36 }
 0x39d   : > { %v2667_v56 = vpop.f32.mrf.mxu1  ;;  %v3947_v6 = vld [vmem:[#allocation3 + $0x200] sm:$0xf]  ;;  %v4135_v2 = vld [vmem:[#allocation3 + $0x204] sm:$0xf] }
 0x39e   : > { %2753 = vmatmul.bf16.vlgmr.msra.gmra.mxu3 %v6227_v47  ;;  %v3948_v16 = vor.u32 %v4136_v43, %v3947_v6  ;;  %v3952_v29 = vor.u32 %v4135_v2, %v3949_v11  ;;  %v2668_v52 = vadd.f32 %v2667_v56, %v6251_v58  ;;  %v3909_v43 = vld [vmem:[#allocation3 + $0x1b8] sm:$0xf0]  ;;  %v4123_v56 = vld [vmem:[#allocation3 + $0x1a4] sm:$0xf] }
 0x39f   : > { %2861 = vmatpush.bf16.msrb.mxu3 %v3880_v14  ;;  %v3647_v14 = vld [vmem:[%s6815_s4 + $0x38] sm:$0xf]  ;;  %v4103_v2 = vld [vmem:[#allocation3 + $0x104] sm:$0xf] }
 0x3a0   : > { %2781 = vmatpush.bf16.msra.mxu2 %v3948_v16  ;;  %2926 = vmatpush.bf16.msrb.mxu0 %v3952_v29  ;;  %v3824_v11 = vor.u32 %v4103_v2, %v3821_v28  ;;  %v3901_v16 = vld [vmem:[#allocation3 + $0x1a8] sm:$0xf0] }
 0x3a1   : > { %4147 = vmatpush.bf16.msra.mxu1 %v3952_v29  ;;  %v3904_v29 = vor.u32 %v4123_v56, %v3901_v16 }
 0x3a3   : > { %2862 = vmatpush.bf16.msrb.mxu3 %v3872_v26  ;;  %3977 = vmatmul.msk.bf16.vlgmr.msra.gmra.mxu2 %vm2645_vm8, %v3628_v3  ;;  %v4125_v26 = vld [vmem:[#allocation3 + $0x1b4] sm:$0xf] }
 0x3a4   : > { %2890 = vmatpush.bf16.msrb.mxu2 %v3944_v33  ;;  %3981 = vmatmul.msk.bf16.vlgmr.msrb.gmra.mxu0 %vm2645_vm8, %v3628_v3  ;;  %v3912_v37 = vor.u32 %v4125_v26, %v3909_v43  ;;  %v3893_v33 = vld [vmem:[#allocation3 + $0x198] sm:$0xf0]  ;;  %v4070_v26 = vld [vmem:[%s6815_s4 + $0x98] sm:$0xf0] }
 0x3a5   : > { %v6247_v59 = vpop.f32.mrf.mxu1  ;;  %v3896_v30 = vor.u32 %v4121_v22, %v3893_v33 }
 0x3a7   : > { %2863 = vmatpush.bf16.msrb.mxu3 %v3864_v27  ;;  %v3661_v27 = vld [vmem:[%s6815_s4 + $0x6c] sm:$0xf0] }
 0x3a8   : > { %2891 = vmatpush.bf16.msrb.mxu2 %v3936_v23  ;;  %v6274_v0 = vor.u32 %v4062_v53, %v3661_v27 }
 0x3aa   : > { %v2696_v44 = vpop.f32.mrf.mxu3 }
 0x3ab   : > { %2864 = vmatpush.bf16.msrb.mxu3 %v3856_v32  ;;  %v6254_v9 = vadd.f32 %v2696_v44, %v2668_v52  ;;  %2840 = vmatmul.bf16.vlgmr.msrb.gmra.mxu1 %v5931_v31  ;;  %v3648_v31 = vor.u32 %v4060_v10, %v3647_v14  ;;  %v4067_v44 = vld [vmem:[%s6815_s4 + $0x84] sm:$0xf] }
 0x3ac   : > { %2892 = vmatpush.bf16.msrb.mxu2 %v3928_v19  ;;  %v6289_v19 = vpop.permute.xlu0 %2162 }
 0x3ad   : > { %v2672_v57 = vpop.f32.mrf.mxu1 }
 0x3ae   : > { %2758 = vmatmul.bf16.gmra.mxu3 %v6249_v20  ;;  %v2673_v32 = vadd.f32 %v2672_v57, %v6276_v38  ;;  %v3687_v57 = vld [vmem:[%s6815_s4 + $0x88] sm:$0xf] }
 0x3af   : > { %2865 = vmatpush.bf16.msrb.mxu3 %v3848_v13  ;;  %v6287_v13 = vpop.permute.xlu1 %2152  ;;  %v3688_v42 = vor.u32 %v4070_v26, %v3687_v57 }
 0x3b0   : > { %2893 = vmatpush.bf16.msrb.mxu2 %v3920_v41 }
 0x3b2   : > { %v6264_v6 = vpop.f32.mrf.mxu3 }
 0x3b3   : > { %2866 = vmatpush.bf16.msrb.mxu3 %v3840_v21  ;;  %3978 = vmatmul.msk.bf16.gmra.mxu2 %vm2645_vm8, %v3648_v31  ;;  %v3684_v21 = vor.u32 %v4067_v44, %v3681_v8 }
 0x3b4   : > { %2894 = vmatpush.bf16.msrb.mxu2 %v3912_v37  ;;  %3982 = vmatmul.msk.bf16.gmra.mxu0 %vm2645_vm8, %v3648_v31  ;;  %v6314_v56 = vpop.permute.xlu0 %2177 }
 0x3b5   : > { %v2674_v3 = vpop.f32.mrf.mxu1 }
 0x3b6   : > { %v2675_v52 = vadd.f32 %v2674_v3, %v6289_v19  ;;  %v6323_v3 = vpop.f32.mrf.mxu0 }
 0x3b7   : > { %2867 = vmatpush.bf16.msrb.mxu3 %v3832_v45  ;;  %v6300_v62 = vpop.permute.xlu1 %2167  ;;  %v6310_v45 = vpop.permute.xlu2 %2172 }
 0x3b8   : > { %2895 = vmatpush.bf16.msrb.mxu2 %v3904_v29 }
 0x3ba   : > { %v2701_v23 = vpop.f32.mrf.mxu3 }
 0x3bb   : > { %2868 = vmatpush.bf16.msrb.mxu3 %v3824_v11  ;;  %v2702_v4 = vadd.f32 %v2701_v23, %v2673_v32  ;;  %2845 = vmatmul.bf16.gmra.mxu1 %v6003_v60 }
 0x3bc   : > { %2896 = vmatpush.bf16.msrb.mxu2 %v3896_v30 }
 0x3bd   : > { %v2677_v50 = vpop.f32.mrf.mxu1 }
 0x3be   : > { %2763 = vmatmul.bf16.gmra.mxu3 %v6274_v0  ;;  %v2678_v41 = vadd.f32 %v2677_v50, %v6300_v62 }
 0x3bf   : > { %v6319_v29 = vpop.permute.xlu1 %2182 }
 0x3c0   : > { %2897 = vmatpush.bf16.msrb.mxu2 %v3888_v46 }
 0x3c2   : > { %v2703_v60 = vpop.f32.mrf.mxu3 }
 0x3c3   : > { %v2704_v36 = vadd.f32 %v2703_v60, %v2675_v52  ;;  %3979 = vmatmul.msk.bf16.gmra.mxu2 %vm2645_vm8, %v3668_v18 }
 0x3c4   : > { %3983 = vmatmul.msk.bf16.gmra.mxu0 %vm2645_vm8, %v3668_v18 }
 0x3c5   : > { %v2679_v55 = vpop.f32.mrf.mxu1 }
 0x3c6   : > { %v2680_v43 = vadd.f32 %v2679_v55, %v6310_v45 }
 0x3ca   : > { %v2706_v14 = vpop.f32.mrf.mxu3 }
 0x3cb   : > { %v2707_v10 = vadd.f32 %v2706_v14, %v2678_v41  ;;  %2850 = vmatmul.bf16.gmra.mxu1 %v6040_v12 }
 0x3cd   : > { %v2682_v28 = vpop.f32.mrf.mxu1 }
 0x3ce   : > { %2768 = vmatmul.bf16.gmra.mxu3 %v3684_v21  ;;  %v2683_v12 = vadd.f32 %v2682_v28, %v6314_v56 }
 0x3d2   : > { %v2708_v31 = vpop.f32.mrf.mxu3 }
 0x3d3   : > { %v2709_v37 = vadd.f32 %v2708_v31, %v2680_v43  ;;  %3980 = vmatmul.msk.bf16.gmra.mxu2 %vm2645_vm8, %v3688_v42 }
 0x3d5   : > { %v2684_v16 = vpop.f32.mrf.mxu1 }
 0x3d6   : > { %v2685_v53 = vadd.f32 %v2684_v16, %v6319_v29 }
 0x3da   : > { %v2711_v2 = vpop.f32.mrf.mxu3 }
 0x3db   : > { %v2712_v11 = vadd.f32 %v2711_v2, %v2683_v12  ;;  %2855 = vmatmul.bf16.gmra.mxu1 %v6085_v34  ;;  %v2670_v34 = vadd.f32 %v6247_v59, %v6287_v13 }
 0x3dd   : > { %v2699_v32 = vadd.f32 %v6264_v6, %v2670_v34  ;;  %v7017_v34 = vld [vmem:[#allocation30_spill] sm:$0xff] }
 0x3de   : > { %2869 = vmatmul.bf16.vlgmr.msrb.gmra.mxu3 %v6111_v25  ;;  %v6330_v25 = vpop.f32.mrf.mxu0 }
 0x3df   : > { %7016 = vst [vmem:[#allocation38_spill] sm:$0xff] %v6330_v25 }
 0x3e2   : > { %v2713_v27 = vpop.f32.mrf.mxu3 }
 0x3e3   : > { %v2714_v22 = vadd.f32 %v2713_v27, %v2685_v53  ;;  %2898 = vmatmul.bf16.vlgmr.msrb.gmra.mxu2 %v6227_v47 }
 0x3e6   : > { %v6334_v39 = vpop.f32.mrf.mxu0 }
 0x3e8   : > { %v2725_v33 = vpop.f32.mrf.mxu1 }
 0x3e9   : > { %v2726_v30 = vadd.f32 %v2725_v33, %v6254_v9  ;;  %v6337_v9 = vpop.f32.mrf.mxu2 }
 0x3eb   : > { %3984 = vmatmul.msk.bf16.vlgmr.msra.gmra.mxu1 %vm2645_vm8, %v3688_v42 }
 0x3ee   : > { %2874 = vmatmul.bf16.gmra.mxu3 %v6154_v15  ;;  %v6339_v48 = vpop.f32.mrf.mxu0 }
 0x3f0   : > { %v2727_v7 = vpop.f32.mrf.mxu1 }
 0x3f1   : > { %v2728_v23 = vadd.f32 %v2727_v7, %v2699_v32  ;;  %v6342_v18 = vpop.f32.mrf.mxu2  ;;  %v2965_v32 = vsel %vm2964_vm9, %v7017_v34, 0.0  ;;  %v7018_v7 = vld [vmem:[#allocation32_spill] sm:$0xff] }
 0x3f3   : > { %2903 = vmatmul.bf16.gmra.mxu2 %v6249_v20 }
 0x3f6   : > { %v2812_v20 = vpop.f32.mrf.mxu0 }
 0x3f8   : > { %v2730_v47 = vpop.f32.mrf.mxu1 }
 0x3f9   : > { %v2731_v46 = vadd.f32 %v2730_v47, %v2702_v4  ;;  %v6345_v4 = vpop.f32.mrf.mxu2 }
 0x3fe   : > { %2879 = vmatmul.bf16.gmra.mxu3 %v6181_v40  ;;  %v2814_v40 = vpop.f32.mrf.mxu0 }
 0x400   : > { %v2732_v15 = vpop.f32.mrf.mxu1 }
 0x401   : > { %v2733_v5 = vadd.f32 %v2732_v15, %v2704_v36  ;;  %v6347_v36 = vpop.f32.mrf.mxu2 }
 0x403   : > { %2908 = vmatmul.bf16.gmra.mxu2 %v6274_v0 }
 0x406   : > { %v6349_v55 = vpop.f32.mrf.mxu0 }
 0x408   : > { %v2735_v59 = vpop.f32.mrf.mxu1 }
 0x409   : > { %v2736_v6 = vadd.f32 %v2735_v59, %v2707_v10 }
 0x40e   : > { %2884 = vmatmul.bf16.gmra.mxu3 %v6225_v17  ;;  %v6351_v42 = vpop.f32.mrf.mxu0 }
 0x410   : > { %v2737_v50 = vpop.f32.mrf.mxu1 }
 0x411   : > { %v2738_v52 = vadd.f32 %v2737_v50, %v2709_v37 }
 0x413   : > { %2913 = vmatmul.bf16.gmra.mxu2 %v3684_v21 }
 0x416   : > { %v6353_v28 = vpop.f32.mrf.mxu0 }
 0x418   : > { %v2740_v60 = vpop.f32.mrf.mxu1 }
 0x419   : > { %v2741_v44 = vadd.f32 %v2740_v60, %v2712_v11 }
 0x420   : > { %v2742_v0 = vpop.f32.mrf.mxu1 }
 0x421   : > { %v2754_v8 = vpop.f32.mrf.mxu3  ;;  %v2743_v14 = vadd.f32 %v2742_v0, %v2714_v22  ;;  %v6357_v22 = vpop.f32.mrf.mxu0 }
 0x422   : > { %v2755_v41 = vadd.f32 %v2754_v8, %v2726_v30 }
 0x426   : > { %v2783_v57 = vpop.f32.mrf.mxu2 }
 0x427   : > { %v2784_v26 = vadd.f32 %v2783_v57, %v2755_v41 }
 0x428   : > { %v2841_v59 = vpop.f32.mrf.mxu1 }
 0x429   : > { %v2756_v10 = vpop.f32.mrf.mxu3  ;;  %v6365_v60 = vpop.f32.mrf.mxu0 }
 0x42a   : > { %v2757_v17 = vadd.f32 %v2756_v10, %v2728_v23  ;;  %v2966_v23 = vsel %vm2964_vm9, %v7018_v7, 0.0 }
 0x42b   : > { %v2967_v47 = vadd.f32 %v2966_v23, %v2965_v32 }
 0x42d   : > { %2968 = vadd.xlane.f32.xlu2 %v2967_v47 }
 0x42e   : > { %v2785_v43 = vpop.f32.mrf.mxu2 }
 0x42f   : > { %v2786_v37 = vadd.f32 %v2785_v43, %v2757_v17 }
 0x430   : > { %v2843_v10 = vpop.f32.mrf.mxu1 }
 0x431   : > { %v2759_v21 = vpop.f32.mrf.mxu3  ;;  %v6369_v57 = vpop.f32.mrf.mxu0 }
 0x432   : > { %v2760_v31 = vadd.f32 %v2759_v21, %v2731_v46 }
 0x436   : > { %v2788_v2 = vpop.f32.mrf.mxu2 }
 0x437   : > { %v6355_v16 = vadd.f32 %v2788_v2, %v2760_v31 }
 0x439   : > { %v2761_v12 = vpop.f32.mrf.mxu3  ;;  %v2928_v2 = vpop.f32.mrf.mxu0 }
 0x43a   : > { %v2762_v11 = vadd.f32 %v2761_v12, %v2733_v5  ;;  %v2846_v12 = vpop.f32.mrf.mxu1 }
 0x43e   : > { %v2790_v27 = vpop.f32.mrf.mxu2 }
 0x43f   : > { %v6359_v30 = vadd.f32 %v2790_v27, %v2762_v11  ;;  %v2813_v27 = vadd.f32 %v2812_v20, %v6251_v58 }
 0x441   : > { %v2764_v53 = vpop.f32.mrf.mxu3  ;;  %v2930_v23 = vpop.f32.mrf.mxu0 }
 0x442   : > { %v2765_v33 = vadd.f32 %v2764_v53, %v2736_v6 }
 0x446   : > { %v2793_v15 = vpop.f32.mrf.mxu2 }
 0x447   : > { %v6363_v50 = vadd.f32 %v2793_v15, %v2765_v33  ;;  %v2842_v33 = vadd.f32 %v2841_v59, %v2813_v27 }
 0x449   : > { %v2766_v46 = vpop.f32.mrf.mxu3 }
 0x44a   : > { %v2767_v5 = vadd.f32 %v2766_v46, %v2738_v52 }
 0x44e   : > { %v2795_v41 = vpop.f32.mrf.mxu2 }
 0x44f   : > { %v6367_v0 = vadd.f32 %v2795_v41, %v2767_v5  ;;  %v2815_v5 = vadd.f32 %v2814_v40, %v6287_v13  ;;  %v2818_v13 = vadd.f32 %v6349_v55, %v6276_v38 }
 0x451   : > { %v2769_v8 = vpop.f32.mrf.mxu3  ;;  %v2844_v41 = vadd.f32 %v2843_v10, %v2815_v5  ;;  %v2847_v10 = vadd.f32 %v2846_v12, %v2818_v13 }
 0x452   : > { %v2770_v6 = vadd.f32 %v2769_v8, %v2741_v44  ;;  %v2848_v44 = vpop.f32.mrf.mxu1  ;;  %v6378_v8 = vmul.f32 %v2784_v26, %v7017_v34  ;;  %v6388_v26 = vmul.f32 %v2786_v37, %v7017_v34  ;;  %v6399_v37 = vmul.f32 %v6355_v16, %v7017_v34 }
 0x453   : > { %v6410_v16 = vmul.f32 %v6359_v30, %v7017_v34  ;;  %v6421_v30 = vmul.f32 %v6363_v50, %v7017_v34  ;;  %v6432_v50 = vmul.f32 %v6367_v0, %v7017_v34 }
 0x455   : > { %7019 = vst [vmem:[#allocation21_spill] sm:$0xff] %v6432_v50 }
 0x456   : > { %v2798_v21 = vpop.f32.mrf.mxu2 }
 0x457   : > { %v6371_v31 = vadd.f32 %v2798_v21, %v2770_v6 }
 0x459   : > { %v2771_v17 = vpop.f32.mrf.mxu3  ;;  %v6443_v0 = vmul.f32 %v6371_v31, %v7017_v34 }
 0x45a   : > { %v2772_v43 = vadd.f32 %v2771_v17, %v2743_v14  ;;  %v2851_v21 = vpop.f32.mrf.mxu1 }
 0x45e   : > { %v2800_v52 = vpop.f32.mrf.mxu2 }
 0x45f   : > { %v6373_v53 = vadd.f32 %v2800_v52, %v2772_v43  ;;  %v2933_v52 = vpop.f32.mrf.mxu0 }
 0x461   : > { %v2870_v11 = vpop.f32.mrf.mxu3 }
 0x462   : > { %v2871_v32 = vadd.f32 %v2870_v11, %v2842_v33  ;;  %v2853_v38 = vpop.f32.mrf.mxu1 }
 0x466   : > { %v2899_v46 = vpop.f32.mrf.mxu2 }
 0x467   : > { %v2900_v15 = vadd.f32 %v2899_v46, %v2871_v32  ;;  %v2820_v46 = vadd.f32 %v6351_v42, %v6289_v19  ;;  %v2823_v19 = vadd.f32 %v6353_v28, %v6300_v62  ;;  %v2825_v62 = vadd.f32 %v6357_v22, %v6310_v45 }
 0x468   : > { %v2828_v45 = vadd.f32 %v6365_v60, %v6314_v56  ;;  %v2830_v56 = vadd.f32 %v6369_v57, %v6319_v29  ;;  %v6452_v29 = vmul.f32 %v6373_v53, %v7017_v34 }
 0x469   : > { %v2872_v47 = vpop.f32.mrf.mxu3  ;;  %v2929_v14 = vadd.f32 %v2928_v2, %v2900_v15  ;;  %v2849_v12 = vadd.f32 %v2848_v44, %v2820_v46  ;;  %v2852_v44 = vadd.f32 %v2851_v21, %v2823_v19  ;;  %v2854_v21 = vadd.f32 %v2853_v38, %v2825_v62  ;;  %v339_v62 = vld [vmem:[%s6816_s5 + $0x40] sm:$0xff] }
 0x46a   : > { %v2873_v17 = vadd.f32 %v2872_v47, %v2844_v41 }
 0x46b   : > { %v6381_v6 = vmul.f32 %v2929_v14, %v7018_v7 }
 0x46d   : > { %v2970_v58 = vadd.f32 %v6381_v6, %v6378_v8 }
 0x46e   : > { %v2901_v59 = vpop.f32.mrf.mxu2 }
 0x46f   : > { %v2902_v43 = vadd.f32 %v2901_v59, %v2873_v17  ;;  %2971 = vadd.xlane.f32.xlu0 %v2970_v58 }
 0x471   : > { %v2875_v20 = vpop.f32.mrf.mxu3  ;;  %v2931_v40 = vadd.f32 %v2930_v23, %v2902_v43  ;;  %v2935_v23 = vpop.f32.mrf.mxu0 }
 0x472   : > { %v2876_v11 = vadd.f32 %v2875_v20, %v2847_v10  ;;  %v2856_v20 = vpop.f32.mrf.mxu1 }
 0x473   : > { %v6391_v2 = vmul.f32 %v2931_v40, %v7018_v7  ;;  %v2857_v38 = vadd.f32 %v2856_v20, %v2828_v45 }
 0x475   : > { %v2973_v27 = vadd.f32 %v6391_v2, %v6388_v26 }
 0x476   : > { %v2904_v32 = vpop.f32.mrf.mxu2 }
 0x477   : > { %v2905_v47 = vadd.f32 %v2904_v32, %v2876_v11  ;;  %2974 = vadd.xlane.f32.xlu1 %v2973_v27 }
 0x479   : > { %v2877_v33 = vpop.f32.mrf.mxu3  ;;  %v2934_v55 = vadd.f32 %v2933_v52, %v2905_v47  ;;  %v2938_v43 = vpop.f32.mrf.mxu0 }
 0x47a   : > { %v2878_v5 = vadd.f32 %v2877_v33, %v2849_v12  ;;  %v2858_v33 = vpop.f32.mrf.mxu1 }
 0x47b   : > { %v6402_v15 = vmul.f32 %v2934_v55, %v7018_v7 }
 0x47d   : > { %v2976_v14 = vadd.f32 %v6402_v15, %v6399_v37 }
 0x47e   : > { %v2906_v17 = vpop.f32.mrf.mxu2 }
 0x47f   : > { %v2907_v58 = vadd.f32 %v2906_v17, %v2878_v5  ;;  %2977 = vadd.xlane.f32.xlu2 %v2976_v14 }
 0x481   : > { %v2880_v41 = vpop.f32.mrf.mxu3  ;;  %v2936_v42 = vadd.f32 %v2935_v23, %v2907_v58  ;;  %v2940_v55 = vpop.f32.mrf.mxu0 }
 0x482   : > { %v2881_v52 = vadd.f32 %v2880_v41, %v2852_v44  ;;  %v2943_v58 = vpop.f32.mrf.mxu1  ;;  %v2859_v44 = vadd.f32 %v2858_v33, %v2830_v56 }
 0x483   : > { %v6413_v59 = vmul.f32 %v2936_v42, %v7018_v7 }
 0x485   : > { %v2979_v13 = vadd.f32 %v6413_v59, %v6410_v16 }
 0x486   : > { %v2909_v10 = vpop.f32.mrf.mxu2 }
 0x487   : > { %v2910_v11 = vadd.f32 %v2909_v10, %v2881_v52  ;;  %2980 = vadd.xlane.f32.xlu2 %v2979_v13 }
 0x489   : > { %v2882_v40 = vpop.f32.mrf.mxu3  ;;  %v2939_v28 = vadd.f32 %v2938_v43, %v2910_v11 }
 0x48a   : > { %v2883_v32 = vadd.f32 %v2882_v40, %v2854_v21  ;;  %v2945_v10 = vpop.f32.mrf.mxu1 }
 0x48b   : > { %v6424_v27 = vmul.f32 %v2939_v28, %v7018_v7 }
 0x48d   : > { %v2982_v47 = vadd.f32 %v6424_v27, %v6421_v30 }
 0x48e   : > { %v2911_v46 = vpop.f32.mrf.mxu2 }
 0x48f   : > { %v2912_v23 = vadd.f32 %v2911_v46, %v2883_v32  ;;  %2983 = vadd.xlane.f32.xlu0 %v2982_v47 }
 0x491   : > { %v2885_v12 = vpop.f32.mrf.mxu3  ;;  %v2941_v22 = vadd.f32 %v2940_v55, %v2912_v23  ;;  %v3005_v55 = vld [vmem:[%s6817_s6 + $0x8] sm:$0xff] }
 0x492   : > { %v2886_v14 = vadd.f32 %v2885_v12, %v2857_v38  ;;  %v3006_v38 = vld [vmem:[%s6817_s6 + $0x10] sm:$0xff] }
 0x493   : > { %v6435_v5 = vmul.f32 %v2941_v22, %v7018_v7  ;;  %v3004_v22 = vld [vmem:[%s6817_s6] sm:$0xff] }
 0x495   : > { %7020 = vst [vmem:[#allocation22_spill] sm:$0xff] %v6435_v5  ;;  %v2985_v41 = vadd.f32 %v6435_v5, %v6432_v50 }
 0x496   : > { %v2914_v17 = vpop.f32.mrf.mxu2 }
 0x497   : > { %v2915_v19 = vadd.f32 %v2914_v17, %v2886_v14  ;;  %2986 = vadd.xlane.f32.xlu1 %v2985_v41 }
 0x499   : > { %v2944_v60 = vadd.f32 %v2943_v58, %v2915_v19  ;;  %v2887_v42 = vpop.f32.mrf.mxu3  ;;  %v3007_v58 = vld [vmem:[%s6817_s6 + $0x18] sm:$0xff] }
 0x49a   : > { %v2888_v43 = vadd.f32 %v2887_v42, %v2859_v44  ;;  %v3008_v44 = vld [vmem:[%s6817_s6 + $0x20] sm:$0xff] }
 0x49b   : > { %v6446_v20 = vmul.f32 %v2944_v60, %v7018_v7 }
 0x49d   : > { %v2988_v52 = vadd.f32 %v6446_v20, %v6443_v0 }
 0x49e   : > { %v2916_v13 = vpop.f32.mrf.mxu2 }
 0x49f   : > { %v2917_v40 = vadd.f32 %v2916_v13, %v2888_v43  ;;  %2989 = vadd.xlane.f32.xlu2 %v2988_v52 }
 0x4a0   : > { %v2969_v28 = vpop.xlane.xlu2 %2968 }
 0x4a1   : > { %v2946_v11 = vadd.f32 %v2945_v10, %v2917_v40  ;;  %4208 = vrcp.f32 %v2969_v28  ;;  %v3009_v40 = vld [vmem:[%s6817_s6 + $0x28] sm:$0xff] }
 0x4a3   : > { %v6455_v57 = vmul.f32 %v2946_v11, %v7018_v7 }
 0x4a5   : > { %v2991_v31 = vadd.f32 %v6455_v57, %v6452_v29 }
 0x4a7   : > { %2992 = vadd.xlane.f32.xlu0 %v2991_v31  ;;  %v4209_v33 = vpop.eup %4208 }
 0x4a8   : > { %v2995_v53 = vperm.slane %v4209_v33, 0  ;;  %v3010_v33 = vld [vmem:[%s6817_s6 + $0x30] sm:$0xff] }
 0x4bb   : > { %825 = vperm.xlu0 %4207, %v339_v62  }
 0x4e2   : > { %v2972_v32 = vpop.xlane.xlu0 %2971 }
 0x4e3   : > { %v2996_v12 = vmul.f32 %v2995_v53, %v2972_v32 }
 0x4e5   : > { %v3012_v56 = vmul.f32 %v3004_v22, %v2996_v12 }
 0x4e7   : > { %v3021_v11 = vsel %vm3020_vm10, %v3012_v56, 0.0 }
 0x4ea   : > { %v2975_v47 = vpop.xlane.xlu1 %2974 }
 0x4eb   : > { %v2997_v46 = vmul.f32 %v2995_v53, %v2975_v47 }
 0x4ed   : > { %v3013_v41 = vmul.f32 %v3005_v55, %v2997_v46 }
 0x4ef   : > { %v3022_v43 = vsel %vm3020_vm10, %v3013_v41, 0.0 }
 0x4f2   : > { %v2978_v21 = vpop.xlane.xlu2 %2977 }
 0x4f3   : > { %v2998_v45 = vmul.f32 %v2995_v53, %v2978_v21  ;;  %v3023_v21 = vadd.f32 %v3022_v43, %v3021_v11  ;;  %v3045_v11 = vld [vmem:[%s6818_s7 + $0x10] sm:$0xff] }
 0x4f5   : > { %v3014_v60 = vmul.f32 %v3006_v38, %v2998_v45  ;;  %v3011_v38 = vld [vmem:[%s6817_s6 + $0x38] sm:$0xff] }
 0x4f7   : > { %v3024_v31 = vsel %vm3020_vm10, %v3014_v60, 0.0 }
 0x4f8   : > { %v3025_v46 = vadd.f32 %v3024_v31, %v3023_v21 }
 0x4fa   : > { %v2981_v23 = vpop.xlane.xlu2 %2980 }
 0x4fb   : > { %v2999_v17 = vmul.f32 %v2995_v53, %v2981_v23 }
 0x4fd   : > { %v3015_v52 = vmul.f32 %v3007_v58, %v2999_v17 }
 0x4ff   : > { %v3026_v32 = vsel %vm3020_vm10, %v3015_v52, 0.0 }
 0x500   : > { %v3027_v12 = vadd.f32 %v3026_v32, %v3025_v46 }
 0x502   : > { %v2984_v14 = vpop.xlane.xlu0 %2983 }
 0x503   : > { %v3000_v42 = vmul.f32 %v2995_v53, %v2984_v14 }
 0x505   : > { %v3016_v62 = vmul.f32 %v3008_v44, %v3000_v42 }
 0x507   : > { %v3028_v55 = vsel %vm3020_vm10, %v3016_v62, 0.0  ;;  %v3043_v62 = vld [vmem:[%s6818_s7] sm:$0xff] }
 0x508   : > { %v3029_v22 = vadd.f32 %v3028_v55, %v3027_v12  ;;  %v3048_v55 = vld [vmem:[%s6818_s7 + $0x28] sm:$0xff]  ;;  %v3046_v12 = vld [vmem:[%s6818_s7 + $0x18] sm:$0xff] }
 0x50a   : > { %v2987_v19 = vpop.xlane.xlu1 %2986 }
 0x50b   : > { %v3001_v13 = vmul.f32 %v2995_v53, %v2987_v19 }
 0x50d   : > { %v3017_v47 = vmul.f32 %v3009_v40, %v3001_v13 }
 0x50f   : > { %v3030_v45 = vsel %vm3020_vm10, %v3017_v47, 0.0 }
 0x510   : > { %v3031_v58 = vadd.f32 %v3030_v45, %v3029_v22 }
 0x512   : > { %v2990_v10 = vpop.xlane.xlu2 %2989 }
 0x513   : > { %v3002_v28 = vmul.f32 %v2995_v53, %v2990_v10 }
 0x515   : > { %v3018_v23 = vmul.f32 %v3010_v33, %v3002_v28 }
 0x517   : > { %v3032_v41 = vsel %vm3020_vm10, %v3018_v23, 0.0  ;;  %v3047_v23 = vld [vmem:[%s6818_s7 + $0x20] sm:$0xff] }
 0x518   : > { %v3033_v56 = vadd.f32 %v3032_v41, %v3031_v58  ;;  %v3050_v58 = vld [vmem:[%s6818_s7 + $0x38] sm:$0xff] }
 0x51a   : > { %v2993_v14 = vpop.xlane.xlu0 %2992 }
 0x51b   : > { %v3003_v17 = vmul.f32 %v2995_v53, %v2993_v14  ;;  %v3044_v53 = vld [vmem:[%s6818_s7 + $0x8] sm:$0xff] }
 0x51d   : > { %v3019_v19 = vmul.f32 %v3011_v38, %v3003_v17 }
 0x51f   : > { %v3034_v60 = vsel %vm3020_vm10, %v3019_v19, 0.0  ;;  %v3049_v19 = vld [vmem:[%s6818_s7 + $0x30] sm:$0xff] }
 0x520   : > { %v3035_v42 = vadd.f32 %v3034_v60, %v3033_v56 }
 0x522   : > { %v3036_v44 = vrot.slane %v3035_v42, 4 }
 0x524   : > { %v3037_v43 = vadd.f32 %v3036_v44, %v3035_v42 }
 0x526   : > { %v3038_v52 = vrot.slane %v3037_v43, 2 }
 0x528   : > { %v3039_v13 = vadd.f32 %v3038_v52, %v3037_v43  ;;  %v342_v43 = vld [vmem:[%s6816_s5 + $0x58] sm:$0xff]  ;;  %v341_v52 = vld [vmem:[%s6816_s5 + $0x50] sm:$0xff] }
 0x52a   : > { %v3040_v40 = vrot.slane %v3039_v13, 1 }
 0x52c   : > { %v3041_v10 = vadd.f32 %v3040_v40, %v3039_v13  ;;  %v340_v13 = vld [vmem:[%s6816_s5 + $0x48] sm:$0xff] }
 0x52d   : > { %v826_v40 = vpop.permute.xlu0 %825 }
 0x52e   : > { %v3042_v31 = vmax.f32 %v3041_v10, 0.0 }
 0x530   : > { %v3053_v28 = vmul.f32 %v3045_v11, %v3042_v31  ;;  %v3052_v21 = vmul.f32 %v3044_v53, %v3042_v31  ;;  %v3051_v33 = vmul.f32 %v3043_v62, %v3042_v31  ;;  %v3056_v45 = vmul.f32 %v3048_v55, %v3042_v31 }
 0x531   : > { %v3055_v22 = vmul.f32 %v3047_v23, %v3042_v31  ;;  %v3054_v38 = vmul.f32 %v3046_v12, %v3042_v31  ;;  %v3058_v56 = vmul.f32 %v3050_v58, %v3042_v31  ;;  %v3057_v60 = vmul.f32 %v3049_v19, %v3042_v31 }
 0x532   : > { %v3065_v32 = vsel %vm3020_vm10, %v3053_v28, 0.0  ;;  %v3062_v47 = vsel %vm3020_vm10, %v3052_v21, 0.0  ;;  %v3059_v46 = vsel %vm3020_vm10, %v3051_v33, 0.0  ;;  %v3074_v14 = vsel %vm3020_vm10, %v3056_v45, 0.0  ;;  %v7021_v45 = vld [vmem:[#allocation24_spill] sm:$0xff] }
 0x533   : > { %3066 = vadd.xlane.f32.xlu0 %v3065_v32  ;;  %3063 = vadd.xlane.f32.xlu2 %v3062_v47  ;;  %v3071_v41 = vsel %vm3020_vm10, %v3055_v22, 0.0  ;;  %v3068_v17 = vsel %vm3020_vm10, %v3054_v38, 0.0  ;;  %v3080_v42 = vsel %vm3020_vm10, %v3058_v56, 0.0  ;;  %v3077_v44 = vsel %vm3020_vm10, %v3057_v60, 0.0 }
 0x534   : > { %3060 = vadd.xlane.f32.xlu1 %v3059_v46  ;;  %v1152_v22 = vadd.f32 %v7021_v45, %v826_v40 }
 0x536   : > { %v1191_v19 = vadd.f32 %v6148_v63, %v1152_v22 }
 0x53b   : > { %3075 = vadd.xlane.f32.xlu0 %v3074_v14  ;;  %3072 = vadd.xlane.f32.xlu2 %v3071_v41  ;;  %v1269_v41 = vadd.f32 %v6170_v51, %v826_v40 }
 0x53c   : > { %3069 = vadd.xlane.f32.xlu1 %v3068_v17 }
 0x53d   : > { %v1308_v56 = vadd.f32 %v6337_v9, %v1269_v41 }
 0x543   : > { %3081 = vadd.xlane.f32.xlu2 %v3080_v42 }
 0x544   : > { %3078 = vadd.xlane.f32.xlu1 %v3077_v44 }
 0x54f   : > { %840 = vperm.xlu0 %4207, %v342_v43  }
 0x55b   : > { %835 = vperm.xlu2 %4206, %v341_v52  }
 0x55d   : > { %830 = vperm.xlu1 %4205, %v340_v13  }
 0x5a6   : > { %v3064_v10 = vpop.xlane.xlu2 %3063  ;;  %v3067_v11 = vpop.xlane.xlu0 %3066 }
 0x5a7   : > { %v3986_v53 = vmul.f32 -1.442695, %v3064_v10  ;;  %v3061_v31 = vpop.xlane.xlu1 %3060  ;;  %v3987_v62 = vmul.f32 -1.442695, %v3067_v11 }
 0x5a8   : > { %v3985_v28 = vmul.f32 -1.442695, %v3061_v31 }
 0x5a9   : > { %4210 = vpow2.f32 %v3986_v53 }
 0x5aa   : > { %4212 = vpow2.f32 %v3985_v28 }
 0x5ab   : > { %4214 = vpow2.f32 %v3987_v62  ;;  %v7022_v62 = vld [vmem:[#allocation23_spill] sm:$0xff] }
 0x5ac   : > { %v6561_v28 = vadd.f32 %v7022_v62, %v1191_v19 }
 0x5ae   : > { %v3073_v21 = vpop.xlane.xlu2 %3072  ;;  %v3076_v46 = vpop.xlane.xlu0 %3075 }
 0x5af   : > { %v4211_v33 = vpop.eup %4210  ;;  %v3989_v32 = vmul.f32 -1.442695, %v3073_v21  ;;  %v3070_v47 = vpop.xlane.xlu1 %3069  ;;  %v3990_v58 = vmul.f32 -1.442695, %v3076_v46  ;;  %v6564_v21 = vadd.f32 %v6323_v3, %v1308_v56 }
 0x5b0   : > { %v4213_v55 = vpop.eup %4212  ;;  %v6535_v23 = vadd.f32 1.0, %v4211_v33  ;;  %v3988_v14 = vmul.f32 -1.442695, %v3070_v47 }
 0x5b1   : > { %v4215_v12 = vpop.eup %4214  ;;  %v6538_v38 = vadd.f32 1.0, %v4213_v55  ;;  %4216 = vpow2.f32 %v3989_v32 }
 0x5b2   : > { %4218 = vrcp.f32 %v6535_v23  ;;  %v6542_v17 = vadd.f32 1.0, %v4215_v12  ;;  %v3141_v44 = vand.u32 2147483648, %v6535_v23 }
 0x5b3   : > { %4220 = vrcp.f32 %v6538_v38  ;;  %v3124_v51 = vand.u32 2147483647, %v6538_v38  ;;  %v3126_v40 = vand.u32 2147483648, %v6538_v38  ;;  %vm3120_vm11 = vweird.f32 %v6538_v38 }
 0x5b4   : > { %4222 = vrcp.f32 %v6542_v17  ;;  %v3156_v9 = vand.u32 2147483648, %v6542_v17  ;;  %v6568_v47 = vor.u32 1.1754944e-38, %v3141_v44  ;;  %v3154_v19 = vand.u32 2147483647, %v6542_v17 }
 0x5b5   : > { %4224 = vpow2.f32 %v3988_v14  ;;  %vm6571_vm12 = vcmp.eq.f32.partialorder %v3124_v51, 8.507059e+37  ;;  %v3127_v3 = vor.u32 1.1754944e-38, %v3126_v40  ;;  %vm3150_vm14 = vweird.f32 %v6542_v17 }
 0x5b6   : > { %4226 = vpow2.f32 %v3990_v58  ;;  %v3082_v60 = vpop.xlane.xlu2 %3081  ;;  %v6579_v41 = vor.u32 1.1754944e-38, %v3156_v9  ;;  %vm6606_vm3 = vcmp.eq.f32.partialorder %v3154_v19, 8.507059e+37 }
 0x5b7   : > { %v4217_v42 = vpop.eup %4216  ;;  %v3992_v43 = vmul.f32 -1.442695, %v3082_v60  ;;  %v3079_v52 = vpop.xlane.xlu1 %3078 }
 0x5b8   : > { %v6550_v13 = vpop.eup %4218  ;;  %v6553_v10 = vadd.f32 1.0, %v4217_v42  ;;  %v3991_v11 = vmul.f32 -1.442695, %v3079_v52 }
 0x5b9   : > { %v4221_v53 = vpop.eup %4220  ;;  %v3131_v63 = vmul.f32 %v6550_v13, %v6535_v23  ;;  %4228 = vpow2.f32 %v3992_v43 }
 0x5ba   : > { %v6558_v31 = vpop.eup %4222  ;;  %v3116_v33 = vmul.f32 %v4221_v53, %v6538_v38  ;;  %4230 = vrcp.f32 %v6553_v10  ;;  %v3184_v58 = vand.u32 2147483647, %v6553_v10  ;;  %vm3121_vm13 = vweird.f32 %v4221_v53  ;;  %v7029_v38 = vld [vmem:[#allocation28_spill] sm:$0xff] }
 0x5bb   : > { %v4225_v32 = vpop.eup %4224  ;;  %v3146_v55 = vmul.f32 %v6558_v31, %v6542_v17  ;;  %4232 = vpow2.f32 %v3991_v11  ;;  %v3132_v14 = vsub.f32 1.0, %v3131_v63  ;;  %vm3180_vm15 = vweird.f32 %v6553_v10  ;;  %vm3122_vm1 = vmor %vm3120_vm11, %vm3121_vm13 }
 0x5bc   : > { %v4227_v12 = vpop.eup %4226  ;;  %v3117_v45 = vsub.f32 1.0, %v3116_v33  ;;  %v6577_v22 = vadd.f32 1.0, %v4225_v32  ;;  %v3186_v44 = vand.u32 2147483648, %v6553_v10  ;;  %vm3151_vm0 = vweird.f32 %v6558_v31 }
 0x5bd   : > { %v3147_v60 = vsub.f32 1.0, %v3146_v55  ;;  %v6587_v51 = vadd.f32 1.0, %v4227_v12  ;;  %v6595_v62 = vmul.f32 %v6550_v13, %v3132_v14  ;;  %vm6601_vm2 = vcmp.eq.f32.partialorder %v3184_v58, 8.507059e+37  ;;  %vm3152_vm7 = vmor %vm3150_vm14, %vm3151_vm0 }
 0x5be   : > { %v3118_v56 = vmul.f32 %v4221_v53, %v3117_v45  ;;  %4234 = vrcp.f32 %v6577_v22  ;;  %v836_v43 = vpop.permute.xlu2 %835  ;;  %v3171_v63 = vand.u32 2147483648, %v6577_v22  ;;  %v3187_v50 = vor.u32 1.1754944e-38, %v3186_v44 }
 0x5bf   : > { %v4229_v42 = vpop.eup %4228  ;;  %4236 = vrcp.f32 %v6587_v51  ;;  %v3148_v14 = vmul.f32 %v6558_v31, %v3147_v60  ;;  %v3169_v60 = vand.u32 2147483647, %v6577_v22  ;;  %vm3165_vm5 = vweird.f32 %v6577_v22 }
 0x5c0   : > { %v4231_v40 = vpop.eup %4230  ;;  %v3119_v11 = vadd.f32 %v4221_v53, %v3118_v56  ;;  %v6591_v9 = vadd.f32 1.0, %v4229_v42  ;;  %v1157_v56 = vadd.f32 %v7029_v38, %v836_v43  ;;  %v6620_v25 = vor.u32 1.1754944e-38, %v3171_v63 }
 0x5c1   : > { %v3176_v33 = vmul.f32 %v4231_v40, %v6553_v10  ;;  %v4233_v12 = vpop.eup %4232  ;;  %vm3181_vm4 = vweird.f32 %v4231_v40  ;;  %v3149_v38 = vadd.f32 %v6558_v31, %v3148_v14  ;;  %vm3136_vm11 = vweird.f32 %v6550_v13 }
 0x5c2   : > { %v3123_v45 = vsel %vm3122_vm1, %v4221_v53, %v3119_v11  ;;  %4238 = vrcp.f32 %v6591_v9  ;;  %v3231_v52 = vand.u32 2147483648, %v6591_v9  ;;  %v6616_v5 = vadd.f32 1.0, %v4233_v12  ;;  %vm3182_vm8 = vmor %vm3180_vm15, %vm3181_vm4 }
 0x5c3   : > { %v3128_v58 = vsel %vm6571_vm12, %v3127_v3, %v3123_v45  ;;  %v3177_v42 = vsub.f32 1.0, %v3176_v33  ;;  %v1274_v53 = vadd.f32 %v6223_v49, %v836_v43  ;;  %v6632_v63 = vadd.f32 %v6183_v54, %v1157_v56 }
 0x5c4   : > { %v6618_v19 = vpop.eup %4234  ;;  %4240 = vrcp.f32 %v6616_v5  ;;  %v3235_v3 = vmul.f32 %v3128_v58, %v6378_v8  ;;  %v3236_v33 = vmul.f32 %v3128_v58, %v6381_v6  ;;  %v3216_v44 = vand.u32 2147483648, %v6616_v5 }
 0x5c5   : > { %v3178_v11 = vmul.f32 %v4231_v40, %v3177_v42  ;;  %v3161_v46 = vmul.f32 %v6618_v19, %v6577_v22  ;;  %v6634_v49 = vpop.eup %4236  ;;  %vm3225_vm6 = vweird.f32 %v6591_v9  ;;  %v3232_v45 = vor.u32 1.1754944e-38, %v3231_v52  ;;  %v7032_v22 = vld [vmem:[#allocation31_spill] sm:$0xff] }
 0x5c6   : > { %v3191_v54 = vmul.f32 %v6634_v49, %v6587_v51  ;;  %v6647_v6 = vor.u32 1.1754944e-38, %v3216_v44  ;;  %v6650_v56 = vadd.f32 %v6345_v4, %v1274_v53  ;;  %v3214_v52 = vand.u32 2147483647, %v6616_v5 }
 0x5c7   : > { %v3179_v43 = vadd.f32 %v4231_v40, %v3178_v11  ;;  %v3162_v12 = vsub.f32 1.0, %v3161_v46  ;;  %v3153_v42 = vsel %vm3152_vm7, %v6558_v31, %v3149_v38  ;;  %vm3210_vm9 = vweird.f32 %v6616_v5 }
 0x5c8   : > { %v4239_v8 = vpop.eup %4238  ;;  %v3192_v11 = vsub.f32 1.0, %v3191_v54  ;;  %v3158_v4 = vsel %vm6606_vm3, %v6579_v41, %v3153_v42  ;;  %vm3166_vm10 = vweird.f32 %v6618_v19  ;;  %vm3135_vm12 = vweird.f32 %v6535_v23  ;;  %v7041_v42 = vld [vmem:[#allocation25_spill] sm:$0xff] }
 0x5c9   : > { %v3183_v14 = vsel %vm3182_vm8, %v4231_v40, %v3179_v43  ;;  %v3163_v17 = vmul.f32 %v6618_v19, %v3162_v12  ;;  %v3221_v58 = vmul.f32 %v4239_v8, %v6591_v9  ;;  %v6667_v32 = vmul.f32 %v3158_v4, %v6399_v37  ;;  %v841_v12 = vpop.permute.xlu0 %840  ;;  %vm3167_vm15 = vmor %vm3165_vm5, %vm3166_vm10 }
 0x5ca   : > { %v3188_v10 = vsel %vm6601_vm2, %v3187_v50, %v3183_v14  ;;  %v4241_v40 = vpop.eup %4240  ;;  %v6672_v50 = vmul.f32 %v6634_v49, %v3192_v11  ;;  %vm6675_vm14 = vcmp.eq.f32.partialorder %v3214_v52, 8.507059e+37  ;;  %vm3170_vm0 = vcmp.eq.f32.partialorder %v3169_v60, 8.507059e+37 }
 0x5cb   : > { %v3243_v53 = vmul.f32 %v3188_v10, %v6421_v30  ;;  %v3244_v46 = vmul.f32 %v3188_v10, %v6424_v27  ;;  %v3222_v31 = vsub.f32 1.0, %v3221_v58  ;;  %v3206_v41 = vmul.f32 %v4241_v40, %v6616_v5 }
 0x5cc   : > { %vm3211_vm13 = vweird.f32 %v4241_v40  ;;  %v3240_v30 = vmul.f32 %v3158_v4, %v6402_v15  ;;  %v3164_v43 = vadd.f32 %v6618_v19, %v3163_v17  ;;  %vm3226_vm1 = vweird.f32 %v4239_v8 }
 0x5cd   : > { %v3251_v27 = vadd.f32 %v3243_v53, %v3235_v3  ;;  %v3252_v44 = vadd.f32 %v3244_v46, %v3236_v33  ;;  %v3223_v37 = vmul.f32 %v4239_v8, %v3222_v31  ;;  %v3207_v38 = vsub.f32 1.0, %v3206_v41  ;;  %vm3227_vm2 = vmor %vm3225_vm6, %vm3226_vm1 }
 0x5ce   : > { %v3229_v54 = vand.u32 2147483647, %v6591_v9  ;;  %v3168_v33 = vsel %vm3167_vm15, %v6618_v19, %v3164_v43  ;;  %v1159_v60 = vadd.f32 %v7032_v22, %v841_v12  ;;  %v7033_v58 = vand.u32 2147483647, %v6535_v23  ;;  %vm3212_vm5 = vmor %vm3210_vm9, %vm3211_vm13  ;;  %v7040_v23 = vld [vmem:[#allocation27_spill] sm:$0xff] }
 0x5cf   : > { %v3259_v15 = vadd.f32 %v3251_v27, %v6561_v28  ;;  %v3260_v3 = vadd.f32 %v3252_v44, %v6564_v21  ;;  %v3224_v52 = vadd.f32 %v4239_v8, %v3223_v37  ;;  %v3208_v14 = vmul.f32 %v4241_v40, %v3207_v38  ;;  %v831_v53 = vpop.permute.xlu1 %830  ;;  %v7036_v27 = vld [vmem:[#allocation29_spill] sm:$0xff]  ;;  %vm6725_vm6 = vmor %vm3135_vm12, %vm3136_vm11 }
 0x5d0   : > { %v3173_v17 = vsel %vm3170_vm0, %v6620_v25, %v3168_v33  ;;  %vm3230_vm3 = vcmp.eq.f32.partialorder %v3229_v54, 8.507059e+37  ;;  %vm6697_vm4 = vcmp.eq.f32.partialorder %v7033_v58, 8.507059e+37  ;;  %v1198_v9 = vadd.f32 %v6209_v1, %v1159_v60 }
 0x5d1   : > { %v3267_v28 = vmax.f32 %v3259_v15, 0.0  ;;  %v3268_v21 = vmax.f32 %v3260_v3, 0.0  ;;  %v3228_v10 = vsel %vm3227_vm2, %v4239_v8, %v3224_v52  ;;  %v3241_v19 = vmul.f32 %v3173_v17, %v6410_v16 }
 0x5d2   : > { %v3209_v11 = vadd.f32 %v4241_v40, %v3208_v14  ;;  %v3233_v4 = vsel %vm3230_vm3, %v3232_v45, %v3228_v10  ;;  %v3242_v25 = vmul.f32 %v3173_v17, %v6413_v59  ;;  %v1237_v45 = vadd.f32 %v7036_v27, %v1198_v9 }
 0x5d3   : > { %v3275_v46 = vmul.f32 %v3267_v28, %v7017_v34  ;;  %v3276_v31 = vmul.f32 %v3268_v21, %v7018_v7  ;;  %v3249_v41 = vmul.f32 %v3233_v4, %v6452_v29  ;;  %v3250_v8 = vmul.f32 %v3233_v4, %v6455_v57  ;;  %v7039_v57 = vld [vmem:[#allocation26_spill] sm:$0xff] }
 0x5d4   : > { %v3213_v16 = vsel %vm3212_vm5, %v4241_v40, %v3209_v11  ;;  %v1276_v59 = vadd.f32 %v6237_v61, %v841_v12  ;;  %v3134_v1 = vadd.f32 %v6550_v13, %v6595_v62  ;;  %v1154_v62 = vadd.f32 %v7039_v57, %v831_v53  ;;  %v7042_v21 = vld [vmem:[#allocation38_spill] sm:$0xff] }
 0x5d5   : > { %3283 = vst [vmem:[%s6715_s12] sm:$0xff] %v3275_v46  ;;  %v3218_v5 = vsel %vm6675_vm14, %v6647_v6, %v3213_v16  ;;  %v3257_v29 = vadd.f32 %v3249_v41, %v3241_v19  ;;  %v3258_v44 = vadd.f32 %v3250_v8, %v3242_v25  ;;  %v3201_v43 = vand.u32 2147483648, %v6587_v51  ;;  %v7043_v19 = vld [vmem:[#allocation21_spill] sm:$0xff]  ;;  %v7044_v11 = vld [vmem:[#allocation22_spill] sm:$0xff] }
 0x5d6   : > { %3284 = vst [vmem:[%s6715_s12 + $0x8] sm:$0xff] %v3276_v31  ;;  %v3247_v40 = vmul.f32 %v3218_v5, %v6443_v0  ;;  %v3248_v37 = vmul.f32 %v3218_v5, %v6446_v20  ;;  %v1315_v55 = vadd.f32 %v6347_v36, %v1276_v59  ;;  %v3138_v6 = vsel %vm6725_vm6, %v6550_v13, %v3134_v1 }
 0x5d7   : > { %v1235_v12 = vadd.f32 %v7040_v23, %v6632_v63  ;;  %v3265_v38 = vadd.f32 %v3257_v29, %v1237_v45  ;;  %v1271_v54 = vadd.f32 %v6201_v35, %v831_v53  ;;  %v1352_v15 = vadd.f32 %v6334_v39, %v6650_v56 }
 0x5d8   : > { %v3255_v0 = vadd.f32 %v3247_v40, %v6667_v32  ;;  %v3256_v20 = vadd.f32 %v3248_v37, %v3240_v30  ;;  %v1354_v36 = vadd.f32 %v6339_v48, %v1315_v55  ;;  %vm3195_vm7 = vweird.f32 %v6587_v51 }
 0x5d9   : > { %v3273_v3 = vmax.f32 %v3265_v38, 0.0  ;;  %v3143_v13 = vsel %vm6697_vm4, %v6568_v47, %v3138_v6  ;;  %v1193_v63 = vadd.f32 %v6164_v24, %v1154_v62  ;;  %v3194_v39 = vadd.f32 %v6634_v49, %v6672_v50 }
 0x5da   : > { %v3263_v33 = vadd.f32 %v3255_v0, %v1235_v12  ;;  %v3264_v35 = vadd.f32 %v3256_v20, %v1352_v15  ;;  %v3266_v52 = vadd.f32 %v3258_v44, %v1354_v36  ;;  %v1310_v48 = vadd.f32 %v6342_v18, %v1271_v54 }
 0x5db   : > { %v3281_v56 = vmul.f32 %v3273_v3, %v7017_v34  ;;  %vm3196_vm8 = vweird.f32 %v6634_v49  ;;  %v3199_v32 = vand.u32 2147483647, %v6587_v51  ;;  %v3202_v30 = vor.u32 1.1754944e-38, %v3201_v43 }
 0x5dc   : > { %v3271_v14 = vmax.f32 %v3263_v33, 0.0  ;;  %v3272_v17 = vmax.f32 %v3264_v35, 0.0  ;;  %v3274_v47 = vmax.f32 %v3266_v52, 0.0  ;;  %vm3197_vm9 = vmor %vm3195_vm7, %vm3196_vm8  ;;  %v3237_v24 = vmul.f32 %v3143_v13, %v6388_v26 }
 0x5dd   : > { %3289 = vst [vmem:[%s6715_s12 + $0x30] sm:$0xff] %v3281_v56  ;;  %v3238_v50 = vmul.f32 %v3143_v13, %v6391_v2  ;;  %v3198_v18 = vsel %vm3197_vm9, %v6634_v49, %v3194_v39  ;;  %vm3200_vm10 = vcmp.eq.f32.partialorder %v3199_v32, 8.507059e+37  ;;  %v1232_v28 = vadd.f32 %v7041_v42, %v1193_v63 }
 0x5de   : > { %v3279_v22 = vmul.f32 %v3271_v14, %v7017_v34  ;;  %v3280_v60 = vmul.f32 %v3272_v17, %v7018_v7  ;;  %v3282_v58 = vmul.f32 %v3274_v47, %v7018_v7  ;;  %v3203_v51 = vsel %vm3200_vm10, %v3202_v30, %v3198_v18 }
 0x5df   : > { %v1349_v10 = vadd.f32 %v7042_v21, %v1310_v48  ;;  %v3245_v26 = vmul.f32 %v3203_v51, %v7043_v19  ;;  %v3246_v2 = vmul.f32 %v3203_v51, %v7044_v11 }
 0x5e0   : > { %3287 = vst [vmem:[%s6715_s12 + $0x20] sm:$0xff] %v3279_v22 }
 0x5e1   : > { %3288 = vst [vmem:[%s6715_s12 + $0x28] sm:$0xff] %v3280_v60  ;;  %v3253_v49 = vadd.f32 %v3245_v26, %v3237_v24  ;;  %v3254_v4 = vadd.f32 %v3246_v2, %v3238_v50 }
 0x5e2   : > { %3290 = vst [vmem:[%s6715_s12 + $0x38] sm:$0xff] %v3282_v58 }
 0x5e3   : > { %v3261_v25 = vadd.f32 %v3253_v49, %v1232_v28  ;;  %v3262_v9 = vadd.f32 %v3254_v4, %v1349_v10 }
 0x5e5   : > { %v3269_v53 = vmax.f32 %v3261_v25, 0.0  ;;  %v3270_v46 = vmax.f32 %v3262_v9, 0.0 }
 0x5e7   : > { %v3277_v31 = vmul.f32 %v3269_v53, %v7017_v34  ;;  %v3278_v41 = vmul.f32 %v3270_v46, %v7018_v7 }
 0x5e9   : > { %3285 = vst [vmem:[%s6715_s12 + $0x10] sm:$0xff] %v3277_v31 }
 0x5ea   : > { %3286 = vst [vmem:[%s6715_s12 + $0x18] sm:$0xff] %v3278_v41 }
 0x5eb   : > { %4269 = shalt.err (!%p4266_p3)
}
 0x5ec   : > { %s4323_s25 = smov 256  }
 0x5ed   : > { %4148 = dma.vmem_to_hbm [thread:$0]  (%p4407_p5), %s3305_s13, 1024, %s3307_s19, %s3292_s9, %s4323_s25, %s4323_s25, %s4311_s10  }
 0x5ee PF: > { %p4154_p4 = scmp.ge.s32.totalorder %s4304_s30, 2  ;;  %s3321_s12 = sand.u32 1, %s4292_s27  }
 0x5ef   : > { %s3322_s18 = scalar_lea.sflag [#allocation5], %s3321_s12 }
 0x5f0   : > { %p4151_p7 = pnand %p4154_p4, %p4411_p6 }
 0x5f2   : > { %p4152_p8 = pneg %p4151_p7 }
 0x5f4   : > { %4287 = dma.done.wait (%p4152_p8), %s3322_s18, 1024  }
 0x5f5   : > { %4289 = vsyncadd (%p4152_p8), %s3322_s18, 4294966272  ;;  %p18_p9 = scmp.ge.s32.totalorder %s4394_s11, 4   ;;  %s7045_s27 = smov %s4296_s28 }
 0x5f6   : > { %s7046_s28 = smov %s4300_s29  ;;  %s7047_s29 = smov %s4405_s14 }
 0x5f7   : > { %s7048_s30 = smov %s4394_s11  ;;  %20 = sbr.rel (!%p18_p9) target bundleno = 3 (0x3), region = 90 }
 0x5fc   :  { %3328 = vsyncpa [#allocation5], 1 }
 0x5fd   :  { %3330 = vsyncpa [#allocation5 + $0x1], 1 }

</bundles_post_ra>
